<compile_context>
chip_gen: v7x
topology: tpu7x:2x2x1
jax: 0.10.0
libtpu: 0.0.40
codegen_flags: <defaults>
</compile_context>

<pallas_src>
import functools
import math

import jax
import jax.numpy as jnp
from jax.experimental import pallas as pl
from jax.experimental.pallas import tpu as pltpu


_Q_CHUNK = 256   # q rows per attention sub-step; bounds score temporaries to (tq, T)


def _norm(z, eps=1e-5):
    """LayerNorm without the affine part (affine folded into the next matmul)."""
    mu = jnp.mean(z, axis=-1, keepdims=True)
    var = jnp.mean(jnp.square(z - mu), axis=-1, keepdims=True)
    return (z - mu) * jax.lax.rsqrt(var + eps)


def _layer_norm(z, w, b, eps=1e-5):
    return _norm(z, eps) * w + b


def _conformer_kernel(num_heads,
                      x_ref,
                      w_qkv, w_o, w_f1a, w_f1b, cw1, cw2, w_f2a, w_f2b,
                      b_qkv_ref, vec4_ref, vecd_ref,
                      o_ref):
    T, D = x_ref.shape[1], x_ref.shape[2]
    H = num_heads
    hd = D // H
    bf16 = jnp.bfloat16

    # bf16 MXU matmul with f32 accumulation.
    def mm(a_f32, w):
        return jnp.dot(a_f32.astype(bf16), w, preferred_element_type=jnp.float32)

    # Packed bias / LayerNorm tables (each row broadcasts over T).
    vd = vecd_ref[...]                      # (7, D)  f32
    v4 = vec4_ref[...]                      # (2, 4D) f32 (ln-folded FFN biases)
    b_qkv = b_qkv_ref[...]                  # (1, 3D) f32 (Q part pre-scaled)
    b_o, b_f1b, cb1 = vd[0:1], vd[1:2], vd[2:3]
    cb2, b_f2b = vd[3:4], vd[4:5]
    lnf_w, lnf_b = vd[5:6], vd[6:7]
    b_f1a, b_f2a = v4[0:1], v4[1:2]

    x = x_ref[0].astype(jnp.float32)                     # (T, D)

    # ---- multi-head self-attention (eval mode: dropout = identity) -----------
    # 1/sqrt(hd) is folded into the Q columns of w_qkv / b_qkv at wrapper time.
    qkv = mm(x, w_qkv[...]) + b_qkv                      # (T, 3D) f32
    q_bf = qkv[:, :D].astype(bf16)
    k_bf = qkv[:, D:2 * D].astype(bf16)
    v_bf = qkv[:, 2 * D:].astype(bf16)

    # Per-head static lane slices (no (T,H,hd)<->(H,T,hd) relayouts); q rows in
    # static chunks so score temporaries stay (tq, T) per head, not (H, T, T).
    # TODO(synk): flash-style K/V tiling + q-row grid axis for very long T.
    dn_qk = (((1,), (1,)), ((), ()))                     # contract hd, no batch dims
    row_blocks = []
    for c0 in range(0, T, _Q_CHUNK):
        c1 = min(c0 + _Q_CHUNK, T)
        head_ctx = []
        for h in range(H):
            lo, hi = h * hd, (h + 1) * hd
            s = jax.lax.dot_general(q_bf[c0:c1, lo:hi], k_bf[:, lo:hi], dn_qk,
                                    preferred_element_type=jnp.float32)   # (tq, T)
            s = s - jnp.max(s, axis=-1, keepdims=True)
            p = jnp.exp(s)                                                # un-normalized
            inv_l = pl.reciprocal(jnp.sum(p, axis=-1, keepdims=True), approx=True)
            ctx = jnp.dot(p.astype(bf16), v_bf[:, lo:hi],
                          preferred_element_type=jnp.float32)             # (tq, hd)
            head_ctx.append(ctx * inv_l)                 # normalize after PV matmul
        row_blocks.append(jnp.concatenate(head_ctx, axis=-1))
    attn = row_blocks[0] if len(row_blocks) == 1 else jnp.concatenate(row_blocks, 0)
    x = x + mm(attn, w_o[...]) + b_o                     # residual

    # ---- FFN 1: LN -> Linear(4D) -> ReLU -> (Dropout=id) -> Linear(D) --------
    # ln1 affine is folded into (w_f1a, b_f1a) at wrapper time.
    h1 = jnp.maximum(mm(_norm(x), w_f1a[...]) + b_f1a, 0.0)
    x = x + mm(h1, w_f1b[...]) + b_f1b

    # ---- conv module: Conv1d(k=3,pad=1) -> ReLU -> Conv1d(k=3,pad=1) ---------
    zero_row = jnp.zeros((1, D), bf16)

    def conv1d(z_f32, w3, b):
        # Shifted taps built once in bf16; three accumulated (T,D)@(D,D) matmuls
        # (no (T,3D) buffer materialized).
        # TODO(synk): replace the row concats with pltpu.roll + edge-row mask.
        zb = z_f32.astype(bf16)
        zm = jnp.concatenate([zero_row, zb[:T - 1, :]], axis=0)   # z[t-1], zero pad
        zp = jnp.concatenate([zb[1:, :], zero_row], axis=0)       # z[t+1], zero pad
        acc = jnp.dot(zm, w3[0:D, :], preferred_element_type=jnp.float32)
        acc += jnp.dot(zb, w3[D:2 * D, :], preferred_element_type=jnp.float32)
        acc += jnp.dot(zp, w3[2 * D:, :], preferred_element_type=jnp.float32)
        return acc + b

    c = jnp.maximum(conv1d(x, cw1[...], cb1), 0.0)
    x = x + conv1d(c, cw2[...], cb2)

    # ---- FFN 2 (ln2 affine folded into w_f2a / b_f2a) -------------------------
    h2 = jnp.maximum(mm(_norm(x), w_f2a[...]) + b_f2a, 0.0)
    x = x + mm(h2, w_f2b[...]) + b_f2b

    # ---- final LayerNorm (affine applied in-kernel; nothing to fold into) -----
    o_ref[0] = _layer_norm(x, lnf_w, lnf_b).astype(o_ref.dtype)


def conformer_block(x, params, num_heads):
    B, T, D = x.shape
    assert D % num_heads == 0
    hd = D // num_heads
    bf16 = jnp.bfloat16
    f32 = jnp.float32
    p = params

    # ---- wrapper-time weight folds (free at trace time) -----------------------
    # 1) 1/sqrt(hd) attention scale into the Q columns of w_qkv / b_qkv.
    scale = 1.0 / math.sqrt(hd)
    qcol = jnp.concatenate([jnp.full((D,), scale, f32), jnp.ones((2 * D,), f32)], 0)
    w_qkv = p["w_qkv"] * qcol[None, :]
    b_qkv = p["b_qkv"] * qcol[None, :]

    # 2) LN(x) @ W + b == norm(x) @ (ln_w^T * W) + (ln_b @ W + b)
    def fold_ln(ln_w, ln_b, w, b):
        return ln_w.reshape(D, 1) * w, b + ln_b @ w

    w_f1a, b_f1a = fold_ln(p["ln1_w"], p["ln1_b"], p["w_f1a"], p["b_f1a"])
    w_f2a, b_f2a = fold_ln(p["ln2_w"], p["ln2_b"], p["w_f2a"], p["b_f2a"])

    # Grid-invariant matmul weights in bf16 (MXU-native, half the weight VMEM).
    mats = [
        w_qkv.astype(bf16),                                                     # (D, 3D)
        p["w_o"].astype(bf16),                                                  # (D, D)
        w_f1a.astype(bf16),                                                     # (D, 4D)
        p["w_f1b"].astype(bf16),                                                # (4D, D)
        jnp.concatenate([p["cw1_0"], p["cw1_1"], p["cw1_2"]], 0).astype(bf16),  # (3D, D)
        jnp.concatenate([p["cw2_0"], p["cw2_1"], p["cw2_2"]], 0).astype(bf16),  # (3D, D)
        w_f2a.astype(bf16),                                                     # (D, 4D)
        p["w_f2b"].astype(bf16),                                                # (4D, D)
    ]
    # Packed f32 bias / LN tables (few DMAs instead of ~20 tiny ones).
    vec4 = jnp.concatenate([b_f1a, b_f2a], axis=0)                              # (2, 4D)
    vecd = jnp.concatenate(
        [p["b_o"], p["b_f1b"], p["cb1"], p["cb2"], p["b_f2b"],
         p["lnf_w"], p["lnf_b"]], axis=0)                                       # (7, D)
    weights = mats + [b_qkv, vec4, vecd]

    # ---- VMEM budget: ~85% of physical capacity (headroom for internal scratch).
    try:
        vmem_cap = pltpu.get_tpu_info().vmem_capacity_bytes
    except Exception:
        vmem_cap = 64 * 1024 * 1024          # conservative fallback (v7x-sized)
    vmem_limit = int(vmem_cap * 0.85)        # ~54 MiB v7x, ~109 MiB v5e/v6e

    # Advisory cost estimate for the XLA scheduler.
    flops = int(B * (52 * T * D * D + 4 * T * T * D))
    transcendentals = int(B * (num_heads * T * T + 6 * T))
    bytes_accessed = int(2 * B * T * D * 4
                         + sum(int(w.size) * w.dtype.itemsize for w in weights))
    cost = pl.CostEstimate(flops=flops, transcendentals=transcendentals,
                           bytes_accessed=bytes_accessed)

    kernel = functools.partial(_conformer_kernel, num_heads)
    out_shape = jax.ShapeDtypeStruct((B, T, D), x.dtype)

    def build(single_buffer_weights):
        in_specs = [pl.BlockSpec((1, T, D), lambda b: (b, 0, 0))]
        for w in weights:
            if single_buffer_weights:
                # Constant index_map -> fetched once; single-buffer to halve VMEM.
                spec = pl.BlockSpec(w.shape, lambda b: (0, 0),
                                    pipeline_mode=pl.Buffered(1))
            else:
                spec = pl.BlockSpec(w.shape, lambda b: (0, 0))
            in_specs.append(spec)
        return pl.pallas_call(
            kernel,
            out_shape=out_shape,
            grid_spec=pltpu.PrefetchScalarGridSpec(
                num_scalar_prefetch=0,
                grid=(B,),
                in_specs=in_specs,
                out_specs=pl.BlockSpec((1, T, D), lambda b: (b, 0, 0)),
            ),
            compiler_params=pltpu.CompilerParams(
                dimension_semantics=("parallel",),   # batch steps are independent
                vmem_limit_bytes=vmem_limit,
            ),
            cost_estimate=cost,
        )

    try:
        return build(single_buffer_weights=True)(x, *weights)
    except Exception:
        # Fallback if this jax build rejects pipeline_mode=pl.Buffered(1);
        # identical semantics, just default double-buffered weights.
        return build(single_buffer_weights=False)(x, *weights)


def init_params(key, d_model):
    """Deterministic synthetic parameters (shapes match the PyTorch module).

    Linear / conv weights are stored PRE-TRANSPOSED to (in, out) so the kernel
    computes plain x @ W.  Conv1d weights (out, in, 3) are stored as three
    (in, out) tap matrices cw*_0 / cw*_1 / cw*_2 (taps t-1, t, t+1).
    LayerNorm affines are given non-trivial values so the wrapper-time folds
    are actually exercised by the correctness check.
    """
    d = d_model
    ks = jax.random.split(key, 26)

    def normal(k, shape, scl=0.05):
        return (scl * jax.random.normal(k, shape)).astype(jnp.float32)

    def ln_w(k):
        return (1.0 + 0.1 * jax.random.normal(k, (1, d))).astype(jnp.float32)

    def ln_b(k):
        return (0.05 * jax.random.normal(k, (1, d))).astype(jnp.float32)

    p = {}
    p["w_qkv"] = normal(ks[0], (d, 3 * d))     # in_proj_weight.T
    p["b_qkv"] = normal(ks[1], (1, 3 * d))     # in_proj_bias
    p["w_o"] = normal(ks[2], (d, d))           # out_proj.weight.T
    p["b_o"] = normal(ks[3], (1, d))
    p["ln1_w"] = ln_w(ks[4])
    p["ln1_b"] = ln_b(ks[5])
    p["w_f1a"] = normal(ks[6], (d, 4 * d))
    p["b_f1a"] = normal(ks[7], (1, 4 * d))
    p["w_f1b"] = normal(ks[8], (4 * d, d))
    p["b_f1b"] = normal(ks[9], (1, d))
    p["cw1_0"] = normal(ks[10], (d, d))        # conv1 tap t-1 (transposed)
    p["cw1_1"] = normal(ks[11], (d, d))        # conv1 tap t
    p["cw1_2"] = normal(ks[12], (d, d))        # conv1 tap t+1
    p["cb1"] = normal(ks[13], (1, d))
    p["cw2_0"] = normal(ks[14], (d, d))
    p["cw2_1"] = normal(ks[15], (d, d))
    p["cw2_2"] = normal(ks[16], (d, d))
    p["cb2"] = normal(ks[17], (1, d))
    p["ln2_w"] = ln_w(ks[18])
    p["ln2_b"] = ln_b(ks[19])
    p["w_f2a"] = normal(ks[20], (d, 4 * d))
    p["b_f2a"] = normal(ks[21], (1, 4 * d))
    p["w_f2b"] = normal(ks[22], (4 * d, d))
    p["b_f2b"] = normal(ks[23], (1, d))
    p["lnf_w"] = ln_w(ks[24])
    p["lnf_b"] = ln_b(ks[25])
    return p


def conformer_ref(x, p, num_heads):
    """Plain-JAX f32 reference (mirrors the PyTorch forward in eval mode)."""
    B, T, D = x.shape
    hd = D // num_heads

    def ln(z, w, b):
        mu = jnp.mean(z, -1, keepdims=True)
        var = jnp.mean(jnp.square(z - mu), -1, keepdims=True)
        return (z - mu) / jnp.sqrt(var + 1e-5) * w + b

    qkv = x @ p["w_qkv"] + p["b_qkv"]
    q, k, v = jnp.split(qkv, 3, axis=-1)
    q = q.reshape(B, T, num_heads, hd).transpose(0, 2, 1, 3)
    k = k.reshape(B, T, num_heads, hd).transpose(0, 2, 1, 3)
    v = v.reshape(B, T, num_heads, hd).transpose(0, 2, 1, 3)
    s = jnp.einsum("bhqd,bhkd->bhqk", q, k) / math.sqrt(hd)
    a = jax.nn.softmax(s, axis=-1)
    o = jnp.einsum("bhqk,bhkd->bhqd", a, v).transpose(0, 2, 1, 3).reshape(B, T, D)
    x = x + (o @ p["w_o"] + p["b_o"])

    h1 = ln(x, p["ln1_w"], p["ln1_b"]) @ p["w_f1a"] + p["b_f1a"]
    h1 = jnp.maximum(h1, 0.0) @ p["w_f1b"] + p["b_f1b"]
    x = x + h1

    def conv(z, w0, w1, w2, b):
        zm = jnp.pad(z, ((0, 0), (1, 0), (0, 0)))[:, :-1]
        zp = jnp.pad(z, ((0, 0), (0, 1), (0, 0)))[:, 1:]
        return zm @ w0 + z @ w1 + zp @ w2 + b

    c = conv(x, p["cw1_0"], p["cw1_1"], p["cw1_2"], p["cb1"])
    c = jnp.maximum(c, 0.0)
    c = conv(c, p["cw2_0"], p["cw2_1"], p["cw2_2"], p["cb2"])
    x = x + c

    h2 = ln(x, p["ln2_w"], p["ln2_b"]) @ p["w_f2a"] + p["b_f2a"]
    h2 = jnp.maximum(h2, 0.0) @ p["w_f2b"] + p["b_f2b"]
    x = x + h2

    return ln(x, p["lnf_w"], p["lnf_b"])


if __name__ == "__main__":
    # Small test shapes.  For deployment prefer D a multiple of 128 and T a
    # multiple of 8 (lane-dense output stores / no masked vst).
    B, T, D, H = 2, 8, 32, 4      # batch, seq, d_model, num_heads
    key = jax.random.PRNGKey(0)
    kx, kp = jax.random.split(key)
    x = jax.random.normal(kx, (B, T, D), jnp.float32)
    params = init_params(kp, D)

    out = jax.block_until_ready(conformer_block(x, params, H))
    assert out.shape == (B, T, D)

    ref = conformer_ref(x, params, H)
    err = float(jnp.max(jnp.abs(out - ref)))
    # Kernel uses bf16 MXU operands (f32 accumulation), an approx EUP reciprocal
    # for the softmax denominator, and wrapper-time scale/LN folds, so tolerance
    # vs. the pure-f32 reference is loosened accordingly.
    if not err < 5e-2:
        raise AssertionError(f"kernel mismatch vs reference, max abs err = {err}")

    print("KERNEL_OK")
</pallas_src>

<mosaic_0001>
module attributes {stable_mosaic.version = 11 : i64} {
  func.func @_conformer_kernel(%arg0: i32, %arg1: memref<1x8x32xf32, #tpu.memory_space<vmem>>, %arg2: memref<32x96xbf16, #tpu.memory_space<vmem>>, %arg3: memref<32x32xbf16, #tpu.memory_space<vmem>>, %arg4: memref<32x128xbf16, #tpu.memory_space<vmem>>, %arg5: memref<128x32xbf16, #tpu.memory_space<vmem>>, %arg6: memref<96x32xbf16, #tpu.memory_space<vmem>>, %arg7: memref<96x32xbf16, #tpu.memory_space<vmem>>, %arg8: memref<32x128xbf16, #tpu.memory_space<vmem>>, %arg9: memref<128x32xbf16, #tpu.memory_space<vmem>>, %arg10: memref<1x96xf32, #tpu.memory_space<vmem>>, %arg11: memref<2x128xf32, #tpu.memory_space<vmem>>, %arg12: memref<7x32xf32, #tpu.memory_space<vmem>>, %arg13: memref<1x8x32xf32, #tpu.memory_space<vmem>>) attributes {dimension_semantics = [#tpu.dimension_semantics<parallel>], iteration_bounds = array<i64: 2>, scalar_prefetch = 0 : i64, scratch_operands = 0 : i64, tpu.core_type = #tpu.core_type<tc>, window_params = [{transform_indices = @transform_0, window_bounds = array<i64: 1, 8, 32>}, {pipeline_mode = #tpu.pipeline_mode<synchronous>, transform_indices = @transform_1, window_bounds = array<i64: 32, 96>}, {pipeline_mode = #tpu.pipeline_mode<synchronous>, transform_indices = @transform_2, window_bounds = array<i64: 32, 32>}, {pipeline_mode = #tpu.pipeline_mode<synchronous>, transform_indices = @transform_3, window_bounds = array<i64: 32, 128>}, {pipeline_mode = #tpu.pipeline_mode<synchronous>, transform_indices = @transform_4, window_bounds = array<i64: 128, 32>}, {pipeline_mode = #tpu.pipeline_mode<synchronous>, transform_indices = @transform_5, window_bounds = array<i64: 96, 32>}, {pipeline_mode = #tpu.pipeline_mode<synchronous>, transform_indices = @transform_6, window_bounds = array<i64: 96, 32>}, {pipeline_mode = #tpu.pipeline_mode<synchronous>, transform_indices = @transform_7, window_bounds = array<i64: 32, 128>}, {pipeline_mode = #tpu.pipeline_mode<synchronous>, transform_indices = @transform_8, window_bounds = array<i64: 128, 32>}, {pipeline_mode = #tpu.pipeline_mode<synchronous>, transform_indices = @transform_9, window_bounds = array<i64: 1, 96>}, {pipeline_mode = #tpu.pipeline_mode<synchronous>, transform_indices = @transform_10, window_bounds = array<i64: 2, 128>}, {pipeline_mode = #tpu.pipeline_mode<synchronous>, transform_indices = @transform_11, window_bounds = array<i64: 7, 32>}, {transform_indices = @transform_12, window_bounds = array<i64: 1, 8, 32>}]} {
    %c0 = arith.constant 0 : index
    %c0_0 = arith.constant 0 : index
    %0 = vector.load %arg12[%c0, %c0_0] : memref<7x32xf32, #tpu.memory_space<vmem>>, vector<7x32xf32>
    %c0_1 = arith.constant 0 : index
    %c0_2 = arith.constant 0 : index
    %1 = vector.load %arg11[%c0_1, %c0_2] : memref<2x128xf32, #tpu.memory_space<vmem>>, vector<2x128xf32>
    %c0_3 = arith.constant 0 : index
    %c0_4 = arith.constant 0 : index
    %2 = vector.load %arg10[%c0_3, %c0_4] : memref<1x96xf32, #tpu.memory_space<vmem>>, vector<1x96xf32>
    %3 = vector.extract_strided_slice %0 {offsets = [0, 0], sizes = [1, 32], strides = [1, 1]} : vector<7x32xf32> to vector<1x32xf32>
    %4 = vector.extract_strided_slice %0 {offsets = [1, 0], sizes = [1, 32], strides = [1, 1]} : vector<7x32xf32> to vector<1x32xf32>
    %5 = vector.extract_strided_slice %0 {offsets = [2, 0], sizes = [1, 32], strides = [1, 1]} : vector<7x32xf32> to vector<1x32xf32>
    %6 = vector.extract_strided_slice %0 {offsets = [3, 0], sizes = [1, 32], strides = [1, 1]} : vector<7x32xf32> to vector<1x32xf32>
    %7 = vector.extract_strided_slice %0 {offsets = [4, 0], sizes = [1, 32], strides = [1, 1]} : vector<7x32xf32> to vector<1x32xf32>
    %8 = vector.extract_strided_slice %0 {offsets = [5, 0], sizes = [1, 32], strides = [1, 1]} : vector<7x32xf32> to vector<1x32xf32>
    %9 = vector.extract_strided_slice %0 {offsets = [6, 0], sizes = [1, 32], strides = [1, 1]} : vector<7x32xf32> to vector<1x32xf32>
    %10 = vector.extract_strided_slice %1 {offsets = [0, 0], sizes = [1, 128], strides = [1, 1]} : vector<2x128xf32> to vector<1x128xf32>
    %11 = vector.extract_strided_slice %1 {offsets = [1, 0], sizes = [1, 128], strides = [1, 1]} : vector<2x128xf32> to vector<1x128xf32>
    %c0_5 = arith.constant 0 : index
    %c0_6 = arith.constant 0 : index
    %c0_7 = arith.constant 0 : index
    %12 = vector.load %arg1[%c0_5, %c0_6, %c0_7] : memref<1x8x32xf32, #tpu.memory_space<vmem>>, vector<1x8x32xf32>
    %13 = vector.shape_cast %12 : vector<1x8x32xf32> to vector<8x32xf32>
    %c0_8 = arith.constant 0 : index
    %c0_9 = arith.constant 0 : index
    %14 = vector.load %arg2[%c0_8, %c0_9] : memref<32x96xbf16, #tpu.memory_space<vmem>>, vector<32x96xbf16>
    %15 = arith.truncf %13 : vector<8x32xf32> to vector<8x32xbf16>
    %cst = arith.constant dense<0.000000e+00> : vector<8x96xf32>
    %16 = tpu.matmul %15, %14, %cst {dimension_numbers = #tpu.dot_dimension_numbers<[1], [0], [0], [1], [0, 0, 1, 1], [], []>} : vector<8x32xbf16>, vector<32x96xbf16>, vector<8x96xf32> -> vector<8x96xf32>
    %17 = vector.broadcast %2 : vector<1x96xf32> to vector<8x96xf32>
    %18 = arith.addf %16, %17 : vector<8x96xf32>
    %19 = vector.extract_strided_slice %18 {offsets = [0, 0], sizes = [8, 32], strides = [1, 1]} : vector<8x96xf32> to vector<8x32xf32>
    %20 = arith.truncf %19 : vector<8x32xf32> to vector<8x32xbf16>
    %21 = vector.extract_strided_slice %18 {offsets = [0, 32], sizes = [8, 32], strides = [1, 1]} : vector<8x96xf32> to vector<8x32xf32>
    %22 = arith.truncf %21 : vector<8x32xf32> to vector<8x32xbf16>
    %23 = vector.extract_strided_slice %18 {offsets = [0, 64], sizes = [8, 32], strides = [1, 1]} : vector<8x96xf32> to vector<8x32xf32>
    %24 = arith.truncf %23 : vector<8x32xf32> to vector<8x32xbf16>
    %25 = vector.extract_strided_slice %20 {offsets = [0, 0], sizes = [8, 8], strides = [1, 1]} : vector<8x32xbf16> to vector<8x8xbf16>
    %26 = vector.extract_strided_slice %22 {offsets = [0, 0], sizes = [8, 8], strides = [1, 1]} : vector<8x32xbf16> to vector<8x8xbf16>
    %cst_10 = arith.constant dense<0.000000e+00> : vector<8x8xf32>
    %27 = tpu.matmul %25, %26, %cst_10 {dimension_numbers = #tpu.dot_dimension_numbers<[1], [1], [0], [0], [0, 0, 1, 0], [], []>} : vector<8x8xbf16>, vector<8x8xbf16>, vector<8x8xf32> -> vector<8x8xf32>
    %cst_11 = arith.constant dense<0xFF800000> : vector<8xf32>
    %28 = vector.multi_reduction <maximumf>, %27, %cst_11 [1] : vector<8x8xf32> to vector<8xf32>
    %29 = vector.shape_cast %28 : vector<8xf32> to vector<8x1xf32>
    %30 = vector.broadcast %29 : vector<8x1xf32> to vector<8x8xf32>
    %31 = arith.subf %27, %30 : vector<8x8xf32>
    %32 = math.exp %31 : vector<8x8xf32>
    %cst_12 = arith.constant dense<0.000000e+00> : vector<8xf32>
    %33 = vector.multi_reduction <add>, %32, %cst_12 [1] : vector<8x8xf32> to vector<8xf32>
    %34 = vector.shape_cast %33 : vector<8xf32> to vector<8x1xf32>
    %35 = tpu.reciprocal %34 {approx = true} : vector<8x1xf32> -> vector<8x1xf32>
    %36 = arith.truncf %32 : vector<8x8xf32> to vector<8x8xbf16>
    %37 = vector.extract_strided_slice %24 {offsets = [0, 0], sizes = [8, 8], strides = [1, 1]} : vector<8x32xbf16> to vector<8x8xbf16>
    %cst_13 = arith.constant dense<0.000000e+00> : vector<8x8xf32>
    %38 = tpu.matmul %36, %37, %cst_13 {dimension_numbers = #tpu.dot_dimension_numbers<[1], [0], [0], [1], [0, 0, 1, 1], [], []>} : vector<8x8xbf16>, vector<8x8xbf16>, vector<8x8xf32> -> vector<8x8xf32>
    %39 = vector.broadcast %35 : vector<8x1xf32> to vector<8x8xf32>
    %40 = arith.mulf %38, %39 : vector<8x8xf32>
    %41 = vector.extract_strided_slice %20 {offsets = [0, 8], sizes = [8, 8], strides = [1, 1]} : vector<8x32xbf16> to vector<8x8xbf16>
    %42 = vector.extract_strided_slice %22 {offsets = [0, 8], sizes = [8, 8], strides = [1, 1]} : vector<8x32xbf16> to vector<8x8xbf16>
    %cst_14 = arith.constant dense<0.000000e+00> : vector<8x8xf32>
    %43 = tpu.matmul %41, %42, %cst_14 {dimension_numbers = #tpu.dot_dimension_numbers<[1], [1], [0], [0], [0, 0, 1, 0], [], []>} : vector<8x8xbf16>, vector<8x8xbf16>, vector<8x8xf32> -> vector<8x8xf32>
    %cst_15 = arith.constant dense<0xFF800000> : vector<8xf32>
    %44 = vector.multi_reduction <maximumf>, %43, %cst_15 [1] : vector<8x8xf32> to vector<8xf32>
    %45 = vector.shape_cast %44 : vector<8xf32> to vector<8x1xf32>
    %46 = vector.broadcast %45 : vector<8x1xf32> to vector<8x8xf32>
    %47 = arith.subf %43, %46 : vector<8x8xf32>
    %48 = math.exp %47 : vector<8x8xf32>
    %cst_16 = arith.constant dense<0.000000e+00> : vector<8xf32>
    %49 = vector.multi_reduction <add>, %48, %cst_16 [1] : vector<8x8xf32> to vector<8xf32>
    %50 = vector.shape_cast %49 : vector<8xf32> to vector<8x1xf32>
    %51 = tpu.reciprocal %50 {approx = true} : vector<8x1xf32> -> vector<8x1xf32>
    %52 = arith.truncf %48 : vector<8x8xf32> to vector<8x8xbf16>
    %53 = vector.extract_strided_slice %24 {offsets = [0, 8], sizes = [8, 8], strides = [1, 1]} : vector<8x32xbf16> to vector<8x8xbf16>
    %cst_17 = arith.constant dense<0.000000e+00> : vector<8x8xf32>
    %54 = tpu.matmul %52, %53, %cst_17 {dimension_numbers = #tpu.dot_dimension_numbers<[1], [0], [0], [1], [0, 0, 1, 1], [], []>} : vector<8x8xbf16>, vector<8x8xbf16>, vector<8x8xf32> -> vector<8x8xf32>
    %55 = vector.broadcast %51 : vector<8x1xf32> to vector<8x8xf32>
    %56 = arith.mulf %54, %55 : vector<8x8xf32>
    %57 = vector.extract_strided_slice %20 {offsets = [0, 16], sizes = [8, 8], strides = [1, 1]} : vector<8x32xbf16> to vector<8x8xbf16>
    %58 = vector.extract_strided_slice %22 {offsets = [0, 16], sizes = [8, 8], strides = [1, 1]} : vector<8x32xbf16> to vector<8x8xbf16>
    %cst_18 = arith.constant dense<0.000000e+00> : vector<8x8xf32>
    %59 = tpu.matmul %57, %58, %cst_18 {dimension_numbers = #tpu.dot_dimension_numbers<[1], [1], [0], [0], [0, 0, 1, 0], [], []>} : vector<8x8xbf16>, vector<8x8xbf16>, vector<8x8xf32> -> vector<8x8xf32>
    %cst_19 = arith.constant dense<0xFF800000> : vector<8xf32>
    %60 = vector.multi_reduction <maximumf>, %59, %cst_19 [1] : vector<8x8xf32> to vector<8xf32>
    %61 = vector.shape_cast %60 : vector<8xf32> to vector<8x1xf32>
    %62 = vector.broadcast %61 : vector<8x1xf32> to vector<8x8xf32>
    %63 = arith.subf %59, %62 : vector<8x8xf32>
    %64 = math.exp %63 : vector<8x8xf32>
    %cst_20 = arith.constant dense<0.000000e+00> : vector<8xf32>
    %65 = vector.multi_reduction <add>, %64, %cst_20 [1] : vector<8x8xf32> to vector<8xf32>
    %66 = vector.shape_cast %65 : vector<8xf32> to vector<8x1xf32>
    %67 = tpu.reciprocal %66 {approx = true} : vector<8x1xf32> -> vector<8x1xf32>
    %68 = arith.truncf %64 : vector<8x8xf32> to vector<8x8xbf16>
    %69 = vector.extract_strided_slice %24 {offsets = [0, 16], sizes = [8, 8], strides = [1, 1]} : vector<8x32xbf16> to vector<8x8xbf16>
    %cst_21 = arith.constant dense<0.000000e+00> : vector<8x8xf32>
    %70 = tpu.matmul %68, %69, %cst_21 {dimension_numbers = #tpu.dot_dimension_numbers<[1], [0], [0], [1], [0, 0, 1, 1], [], []>} : vector<8x8xbf16>, vector<8x8xbf16>, vector<8x8xf32> -> vector<8x8xf32>
    %71 = vector.broadcast %67 : vector<8x1xf32> to vector<8x8xf32>
    %72 = arith.mulf %70, %71 : vector<8x8xf32>
    %73 = vector.extract_strided_slice %20 {offsets = [0, 24], sizes = [8, 8], strides = [1, 1]} : vector<8x32xbf16> to vector<8x8xbf16>
    %74 = vector.extract_strided_slice %22 {offsets = [0, 24], sizes = [8, 8], strides = [1, 1]} : vector<8x32xbf16> to vector<8x8xbf16>
    %cst_22 = arith.constant dense<0.000000e+00> : vector<8x8xf32>
    %75 = tpu.matmul %73, %74, %cst_22 {dimension_numbers = #tpu.dot_dimension_numbers<[1], [1], [0], [0], [0, 0, 1, 0], [], []>} : vector<8x8xbf16>, vector<8x8xbf16>, vector<8x8xf32> -> vector<8x8xf32>
    %cst_23 = arith.constant dense<0xFF800000> : vector<8xf32>
    %76 = vector.multi_reduction <maximumf>, %75, %cst_23 [1] : vector<8x8xf32> to vector<8xf32>
    %77 = vector.shape_cast %76 : vector<8xf32> to vector<8x1xf32>
    %78 = vector.broadcast %77 : vector<8x1xf32> to vector<8x8xf32>
    %79 = arith.subf %75, %78 : vector<8x8xf32>
    %80 = math.exp %79 : vector<8x8xf32>
    %cst_24 = arith.constant dense<0.000000e+00> : vector<8xf32>
    %81 = vector.multi_reduction <add>, %80, %cst_24 [1] : vector<8x8xf32> to vector<8xf32>
    %82 = vector.shape_cast %81 : vector<8xf32> to vector<8x1xf32>
    %83 = tpu.reciprocal %82 {approx = true} : vector<8x1xf32> -> vector<8x1xf32>
    %84 = arith.truncf %80 : vector<8x8xf32> to vector<8x8xbf16>
    %85 = vector.extract_strided_slice %24 {offsets = [0, 24], sizes = [8, 8], strides = [1, 1]} : vector<8x32xbf16> to vector<8x8xbf16>
    %cst_25 = arith.constant dense<0.000000e+00> : vector<8x8xf32>
    %86 = tpu.matmul %84, %85, %cst_25 {dimension_numbers = #tpu.dot_dimension_numbers<[1], [0], [0], [1], [0, 0, 1, 1], [], []>} : vector<8x8xbf16>, vector<8x8xbf16>, vector<8x8xf32> -> vector<8x8xf32>
    %87 = vector.broadcast %83 : vector<8x1xf32> to vector<8x8xf32>
    %88 = arith.mulf %86, %87 : vector<8x8xf32>
    %89 = tpu.concatenate %40, %56, %72, %88 in 1 : vector<8x8xf32>, vector<8x8xf32>, vector<8x8xf32>, vector<8x8xf32> -> vector<8x32xf32>
    %c0_26 = arith.constant 0 : index
    %c0_27 = arith.constant 0 : index
    %90 = vector.load %arg3[%c0_26, %c0_27] : memref<32x32xbf16, #tpu.memory_space<vmem>>, vector<32x32xbf16>
    %91 = arith.truncf %89 : vector<8x32xf32> to vector<8x32xbf16>
    %cst_28 = arith.constant dense<0.000000e+00> : vector<8x32xf32>
    %92 = tpu.matmul %91, %90, %cst_28 {dimension_numbers = #tpu.dot_dimension_numbers<[1], [0], [0], [1], [0, 0, 1, 1], [], []>} : vector<8x32xbf16>, vector<32x32xbf16>, vector<8x32xf32> -> vector<8x32xf32>
    %93 = arith.addf %13, %92 : vector<8x32xf32>
    %94 = vector.broadcast %3 : vector<1x32xf32> to vector<8x32xf32>
    %95 = arith.addf %93, %94 : vector<8x32xf32>
    %cst_29 = arith.constant dense<0.000000e+00> : vector<8xf32>
    %96 = vector.multi_reduction <add>, %95, %cst_29 [1] : vector<8x32xf32> to vector<8xf32>
    %97 = vector.shape_cast %96 : vector<8xf32> to vector<8x1xf32>
    %cst_30 = arith.constant 3.200000e+01 : f32
    %98 = vector.broadcast %cst_30 : f32 to vector<8x1xf32>
    %99 = arith.divf %97, %98 : vector<8x1xf32>
    %100 = vector.broadcast %99 : vector<8x1xf32> to vector<8x32xf32>
    %101 = arith.subf %95, %100 : vector<8x32xf32>
    %102 = arith.mulf %101, %101 : vector<8x32xf32>
    %cst_31 = arith.constant dense<0.000000e+00> : vector<8xf32>
    %103 = vector.multi_reduction <add>, %102, %cst_31 [1] : vector<8x32xf32> to vector<8xf32>
    %104 = vector.shape_cast %103 : vector<8xf32> to vector<8x1xf32>
    %cst_32 = arith.constant 3.200000e+01 : f32
    %105 = vector.broadcast %cst_32 : f32 to vector<8x1xf32>
    %106 = arith.divf %104, %105 : vector<8x1xf32>
    %107 = vector.broadcast %99 : vector<8x1xf32> to vector<8x32xf32>
    %108 = arith.subf %95, %107 : vector<8x32xf32>
    %cst_33 = arith.constant 9.99999974E-6 : f32
    %109 = vector.broadcast %cst_33 : f32 to vector<8x1xf32>
    %110 = arith.addf %106, %109 : vector<8x1xf32>
    %111 = math.rsqrt %110 : vector<8x1xf32>
    %112 = vector.broadcast %111 : vector<8x1xf32> to vector<8x32xf32>
    %113 = arith.mulf %108, %112 : vector<8x32xf32>
    %c0_34 = arith.constant 0 : index
    %c0_35 = arith.constant 0 : index
    %114 = vector.load %arg4[%c0_34, %c0_35] : memref<32x128xbf16, #tpu.memory_space<vmem>>, vector<32x128xbf16>
    %115 = arith.truncf %113 : vector<8x32xf32> to vector<8x32xbf16>
    %cst_36 = arith.constant dense<0.000000e+00> : vector<8x128xf32>
    %116 = tpu.matmul %115, %114, %cst_36 {dimension_numbers = #tpu.dot_dimension_numbers<[1], [0], [0], [1], [0, 0, 1, 1], [], []>} : vector<8x32xbf16>, vector<32x128xbf16>, vector<8x128xf32> -> vector<8x128xf32>
    %117 = vector.broadcast %10 : vector<1x128xf32> to vector<8x128xf32>
    %118 = arith.addf %116, %117 : vector<8x128xf32>
    %cst_37 = arith.constant 0.000000e+00 : f32
    %119 = vector.broadcast %cst_37 : f32 to vector<8x128xf32>
    %120 = arith.maximumf %118, %119 : vector<8x128xf32>
    %c0_38 = arith.constant 0 : index
    %c0_39 = arith.constant 0 : index
    %121 = vector.load %arg5[%c0_38, %c0_39] : memref<128x32xbf16, #tpu.memory_space<vmem>>, vector<128x32xbf16>
    %122 = arith.truncf %120 : vector<8x128xf32> to vector<8x128xbf16>
    %cst_40 = arith.constant dense<0.000000e+00> : vector<8x32xf32>
    %123 = tpu.matmul %122, %121, %cst_40 {dimension_numbers = #tpu.dot_dimension_numbers<[1], [0], [0], [1], [0, 0, 1, 1], [], []>} : vector<8x128xbf16>, vector<128x32xbf16>, vector<8x32xf32> -> vector<8x32xf32>
    %124 = arith.addf %95, %123 : vector<8x32xf32>
    %125 = vector.broadcast %4 : vector<1x32xf32> to vector<8x32xf32>
    %126 = arith.addf %124, %125 : vector<8x32xf32>
    %cst_41 = arith.constant 0.000000e+00 : bf16
    %127 = vector.broadcast %cst_41 : bf16 to vector<1x32xbf16>
    %c0_42 = arith.constant 0 : index
    %c0_43 = arith.constant 0 : index
    %128 = vector.load %arg6[%c0_42, %c0_43] : memref<96x32xbf16, #tpu.memory_space<vmem>>, vector<96x32xbf16>
    %129 = arith.truncf %126 : vector<8x32xf32> to vector<8x32xbf16>
    %130 = vector.extract_strided_slice %129 {offsets = [0, 0], sizes = [7, 32], strides = [1, 1]} : vector<8x32xbf16> to vector<7x32xbf16>
    %131 = tpu.concatenate %127, %130 in 0 : vector<1x32xbf16>, vector<7x32xbf16> -> vector<8x32xbf16>
    %132 = vector.extract_strided_slice %129 {offsets = [1, 0], sizes = [7, 32], strides = [1, 1]} : vector<8x32xbf16> to vector<7x32xbf16>
    %133 = tpu.concatenate %132, %127 in 0 : vector<7x32xbf16>, vector<1x32xbf16> -> vector<8x32xbf16>
    %134 = vector.extract_strided_slice %128 {offsets = [0, 0], sizes = [32, 32], strides = [1, 1]} : vector<96x32xbf16> to vector<32x32xbf16>
    %cst_44 = arith.constant dense<0.000000e+00> : vector<8x32xf32>
    %135 = tpu.matmul %131, %134, %cst_44 {dimension_numbers = #tpu.dot_dimension_numbers<[1], [0], [0], [1], [0, 0, 1, 1], [], []>} : vector<8x32xbf16>, vector<32x32xbf16>, vector<8x32xf32> -> vector<8x32xf32>
    %136 = vector.extract_strided_slice %128 {offsets = [32, 0], sizes = [32, 32], strides = [1, 1]} : vector<96x32xbf16> to vector<32x32xbf16>
    %cst_45 = arith.constant dense<0.000000e+00> : vector<8x32xf32>
    %137 = tpu.matmul %129, %136, %cst_45 {dimension_numbers = #tpu.dot_dimension_numbers<[1], [0], [0], [1], [0, 0, 1, 1], [], []>} : vector<8x32xbf16>, vector<32x32xbf16>, vector<8x32xf32> -> vector<8x32xf32>
    %138 = arith.addf %135, %137 : vector<8x32xf32>
    %139 = vector.extract_strided_slice %128 {offsets = [64, 0], sizes = [32, 32], strides = [1, 1]} : vector<96x32xbf16> to vector<32x32xbf16>
    %cst_46 = arith.constant dense<0.000000e+00> : vector<8x32xf32>
    %140 = tpu.matmul %133, %139, %cst_46 {dimension_numbers = #tpu.dot_dimension_numbers<[1], [0], [0], [1], [0, 0, 1, 1], [], []>} : vector<8x32xbf16>, vector<32x32xbf16>, vector<8x32xf32> -> vector<8x32xf32>
    %141 = arith.addf %138, %140 : vector<8x32xf32>
    %142 = vector.broadcast %5 : vector<1x32xf32> to vector<8x32xf32>
    %143 = arith.addf %141, %142 : vector<8x32xf32>
    %cst_47 = arith.constant 0.000000e+00 : f32
    %144 = vector.broadcast %cst_47 : f32 to vector<8x32xf32>
    %145 = arith.maximumf %143, %144 : vector<8x32xf32>
    %c0_48 = arith.constant 0 : index
    %c0_49 = arith.constant 0 : index
    %146 = vector.load %arg7[%c0_48, %c0_49] : memref<96x32xbf16, #tpu.memory_space<vmem>>, vector<96x32xbf16>
    %147 = arith.truncf %145 : vector<8x32xf32> to vector<8x32xbf16>
    %148 = vector.extract_strided_slice %147 {offsets = [0, 0], sizes = [7, 32], strides = [1, 1]} : vector<8x32xbf16> to vector<7x32xbf16>
    %149 = tpu.concatenate %127, %148 in 0 : vector<1x32xbf16>, vector<7x32xbf16> -> vector<8x32xbf16>
    %150 = vector.extract_strided_slice %147 {offsets = [1, 0], sizes = [7, 32], strides = [1, 1]} : vector<8x32xbf16> to vector<7x32xbf16>
    %151 = tpu.concatenate %150, %127 in 0 : vector<7x32xbf16>, vector<1x32xbf16> -> vector<8x32xbf16>
    %152 = vector.extract_strided_slice %146 {offsets = [0, 0], sizes = [32, 32], strides = [1, 1]} : vector<96x32xbf16> to vector<32x32xbf16>
    %cst_50 = arith.constant dense<0.000000e+00> : vector<8x32xf32>
    %153 = tpu.matmul %149, %152, %cst_50 {dimension_numbers = #tpu.dot_dimension_numbers<[1], [0], [0], [1], [0, 0, 1, 1], [], []>} : vector<8x32xbf16>, vector<32x32xbf16>, vector<8x32xf32> -> vector<8x32xf32>
    %154 = vector.extract_strided_slice %146 {offsets = [32, 0], sizes = [32, 32], strides = [1, 1]} : vector<96x32xbf16> to vector<32x32xbf16>
    %cst_51 = arith.constant dense<0.000000e+00> : vector<8x32xf32>
    %155 = tpu.matmul %147, %154, %cst_51 {dimension_numbers = #tpu.dot_dimension_numbers<[1], [0], [0], [1], [0, 0, 1, 1], [], []>} : vector<8x32xbf16>, vector<32x32xbf16>, vector<8x32xf32> -> vector<8x32xf32>
    %156 = arith.addf %153, %155 : vector<8x32xf32>
    %157 = vector.extract_strided_slice %146 {offsets = [64, 0], sizes = [32, 32], strides = [1, 1]} : vector<96x32xbf16> to vector<32x32xbf16>
    %cst_52 = arith.constant dense<0.000000e+00> : vector<8x32xf32>
    %158 = tpu.matmul %151, %157, %cst_52 {dimension_numbers = #tpu.dot_dimension_numbers<[1], [0], [0], [1], [0, 0, 1, 1], [], []>} : vector<8x32xbf16>, vector<32x32xbf16>, vector<8x32xf32> -> vector<8x32xf32>
    %159 = arith.addf %156, %158 : vector<8x32xf32>
    %160 = vector.broadcast %6 : vector<1x32xf32> to vector<8x32xf32>
    %161 = arith.addf %159, %160 : vector<8x32xf32>
    %162 = arith.addf %126, %161 : vector<8x32xf32>
    %cst_53 = arith.constant dense<0.000000e+00> : vector<8xf32>
    %163 = vector.multi_reduction <add>, %162, %cst_53 [1] : vector<8x32xf32> to vector<8xf32>
    %164 = vector.shape_cast %163 : vector<8xf32> to vector<8x1xf32>
    %cst_54 = arith.constant 3.200000e+01 : f32
    %165 = vector.broadcast %cst_54 : f32 to vector<8x1xf32>
    %166 = arith.divf %164, %165 : vector<8x1xf32>
    %167 = vector.broadcast %166 : vector<8x1xf32> to vector<8x32xf32>
    %168 = arith.subf %162, %167 : vector<8x32xf32>
    %169 = arith.mulf %168, %168 : vector<8x32xf32>
    %cst_55 = arith.constant dense<0.000000e+00> : vector<8xf32>
    %170 = vector.multi_reduction <add>, %169, %cst_55 [1] : vector<8x32xf32> to vector<8xf32>
    %171 = vector.shape_cast %170 : vector<8xf32> to vector<8x1xf32>
    %cst_56 = arith.constant 3.200000e+01 : f32
    %172 = vector.broadcast %cst_56 : f32 to vector<8x1xf32>
    %173 = arith.divf %171, %172 : vector<8x1xf32>
    %174 = vector.broadcast %166 : vector<8x1xf32> to vector<8x32xf32>
    %175 = arith.subf %162, %174 : vector<8x32xf32>
    %cst_57 = arith.constant 9.99999974E-6 : f32
    %176 = vector.broadcast %cst_57 : f32 to vector<8x1xf32>
    %177 = arith.addf %173, %176 : vector<8x1xf32>
    %178 = math.rsqrt %177 : vector<8x1xf32>
    %179 = vector.broadcast %178 : vector<8x1xf32> to vector<8x32xf32>
    %180 = arith.mulf %175, %179 : vector<8x32xf32>
    %c0_58 = arith.constant 0 : index
    %c0_59 = arith.constant 0 : index
    %181 = vector.load %arg8[%c0_58, %c0_59] : memref<32x128xbf16, #tpu.memory_space<vmem>>, vector<32x128xbf16>
    %182 = arith.truncf %180 : vector<8x32xf32> to vector<8x32xbf16>
    %cst_60 = arith.constant dense<0.000000e+00> : vector<8x128xf32>
    %183 = tpu.matmul %182, %181, %cst_60 {dimension_numbers = #tpu.dot_dimension_numbers<[1], [0], [0], [1], [0, 0, 1, 1], [], []>} : vector<8x32xbf16>, vector<32x128xbf16>, vector<8x128xf32> -> vector<8x128xf32>
    %184 = vector.broadcast %11 : vector<1x128xf32> to vector<8x128xf32>
    %185 = arith.addf %183, %184 : vector<8x128xf32>
    %cst_61 = arith.constant 0.000000e+00 : f32
    %186 = vector.broadcast %cst_61 : f32 to vector<8x128xf32>
    %187 = arith.maximumf %185, %186 : vector<8x128xf32>
    %c0_62 = arith.constant 0 : index
    %c0_63 = arith.constant 0 : index
    %188 = vector.load %arg9[%c0_62, %c0_63] : memref<128x32xbf16, #tpu.memory_space<vmem>>, vector<128x32xbf16>
    %189 = arith.truncf %187 : vector<8x128xf32> to vector<8x128xbf16>
    %cst_64 = arith.constant dense<0.000000e+00> : vector<8x32xf32>
    %190 = tpu.matmul %189, %188, %cst_64 {dimension_numbers = #tpu.dot_dimension_numbers<[1], [0], [0], [1], [0, 0, 1, 1], [], []>} : vector<8x128xbf16>, vector<128x32xbf16>, vector<8x32xf32> -> vector<8x32xf32>
    %191 = arith.addf %162, %190 : vector<8x32xf32>
    %192 = vector.broadcast %7 : vector<1x32xf32> to vector<8x32xf32>
    %193 = arith.addf %191, %192 : vector<8x32xf32>
    %cst_65 = arith.constant dense<0.000000e+00> : vector<8xf32>
    %194 = vector.multi_reduction <add>, %193, %cst_65 [1] : vector<8x32xf32> to vector<8xf32>
    %195 = vector.shape_cast %194 : vector<8xf32> to vector<8x1xf32>
    %cst_66 = arith.constant 3.200000e+01 : f32
    %196 = vector.broadcast %cst_66 : f32 to vector<8x1xf32>
    %197 = arith.divf %195, %196 : vector<8x1xf32>
    %198 = vector.broadcast %197 : vector<8x1xf32> to vector<8x32xf32>
    %199 = arith.subf %193, %198 : vector<8x32xf32>
    %200 = arith.mulf %199, %199 : vector<8x32xf32>
    %cst_67 = arith.constant dense<0.000000e+00> : vector<8xf32>
    %201 = vector.multi_reduction <add>, %200, %cst_67 [1] : vector<8x32xf32> to vector<8xf32>
    %202 = vector.shape_cast %201 : vector<8xf32> to vector<8x1xf32>
    %cst_68 = arith.constant 3.200000e+01 : f32
    %203 = vector.broadcast %cst_68 : f32 to vector<8x1xf32>
    %204 = arith.divf %202, %203 : vector<8x1xf32>
    %205 = vector.broadcast %197 : vector<8x1xf32> to vector<8x32xf32>
    %206 = arith.subf %193, %205 : vector<8x32xf32>
    %cst_69 = arith.constant 9.99999974E-6 : f32
    %207 = vector.broadcast %cst_69 : f32 to vector<8x1xf32>
    %208 = arith.addf %204, %207 : vector<8x1xf32>
    %209 = math.rsqrt %208 : vector<8x1xf32>
    %210 = vector.broadcast %209 : vector<8x1xf32> to vector<8x32xf32>
    %211 = arith.mulf %206, %210 : vector<8x32xf32>
    %212 = vector.broadcast %8 : vector<1x32xf32> to vector<8x32xf32>
    %213 = arith.mulf %211, %212 : vector<8x32xf32>
    %214 = vector.broadcast %9 : vector<1x32xf32> to vector<8x32xf32>
    %215 = arith.addf %213, %214 : vector<8x32xf32>
    %c0_70 = arith.constant 0 : index
    %c0_71 = arith.constant 0 : index
    %c0_72 = arith.constant 0 : index
    %216 = vector.load %arg13[%c0_70, %c0_71, %c0_72] : memref<1x8x32xf32, #tpu.memory_space<vmem>>, vector<1x8x32xf32>
    %217 = vector.shape_cast %216 : vector<1x8x32xf32> to vector<8x32xf32>
    %218 = vector.shape_cast %215 : vector<8x32xf32> to vector<1x8x32xf32>
    tpu.vector_store %arg13[%c0_70, %c0_71, %c0_72], %218 {strides = array<i32>} : memref<1x8x32xf32, #tpu.memory_space<vmem>>, vector<1x8x32xf32>,
    return
  }
  func.func @transform_0(%arg0: i32) -> (i32, i32, i32) {
    %c0_i32 = arith.constant 0 : i32
    %c0_i32_0 = arith.constant 0 : i32
    %c0_i32_1 = arith.constant 0 : i32
    return %arg0, %c0_i32, %c0_i32_0 : i32, i32, i32
  }
  func.func @transform_1(%arg0: i32) -> (i32, i32) {
    %c0_i32 = arith.constant 0 : i32
    %c0_i32_0 = arith.constant 0 : i32
    %c0_i32_1 = arith.constant 0 : i32
    return %c0_i32, %c0_i32_0 : i32, i32
  }
  func.func @transform_2(%arg0: i32) -> (i32, i32) {
    %c0_i32 = arith.constant 0 : i32
    %c0_i32_0 = arith.constant 0 : i32
    %c0_i32_1 = arith.constant 0 : i32
    return %c0_i32, %c0_i32_0 : i32, i32
  }
  func.func @transform_3(%arg0: i32) -> (i32, i32) {
    %c0_i32 = arith.constant 0 : i32
    %c0_i32_0 = arith.constant 0 : i32
    %c0_i32_1 = arith.constant 0 : i32
    return %c0_i32, %c0_i32_0 : i32, i32
  }
  func.func @transform_4(%arg0: i32) -> (i32, i32) {
    %c0_i32 = arith.constant 0 : i32
    %c0_i32_0 = arith.constant 0 : i32
    %c0_i32_1 = arith.constant 0 : i32
    return %c0_i32, %c0_i32_0 : i32, i32
  }
  func.func @transform_5(%arg0: i32) -> (i32, i32) {
    %c0_i32 = arith.constant 0 : i32
    %c0_i32_0 = arith.constant 0 : i32
    %c0_i32_1 = arith.constant 0 : i32
    return %c0_i32, %c0_i32_0 : i32, i32
  }
  func.func @transform_6(%arg0: i32) -> (i32, i32) {
    %c0_i32 = arith.constant 0 : i32
    %c0_i32_0 = arith.constant 0 : i32
    %c0_i32_1 = arith.constant 0 : i32
    return %c0_i32, %c0_i32_0 : i32, i32
  }
  func.func @transform_7(%arg0: i32) -> (i32, i32) {
    %c0_i32 = arith.constant 0 : i32
    %c0_i32_0 = arith.constant 0 : i32
    %c0_i32_1 = arith.constant 0 : i32
    return %c0_i32, %c0_i32_0 : i32, i32
  }
  func.func @transform_8(%arg0: i32) -> (i32, i32) {
    %c0_i32 = arith.constant 0 : i32
    %c0_i32_0 = arith.constant 0 : i32
    %c0_i32_1 = arith.constant 0 : i32
    return %c0_i32, %c0_i32_0 : i32, i32
  }
  func.func @transform_9(%arg0: i32) -> (i32, i32) {
    %c0_i32 = arith.constant 0 : i32
    %c0_i32_0 = arith.constant 0 : i32
    %c0_i32_1 = arith.constant 0 : i32
    return %c0_i32, %c0_i32_0 : i32, i32
  }
  func.func @transform_10(%arg0: i32) -> (i32, i32) {
    %c0_i32 = arith.constant 0 : i32
    %c0_i32_0 = arith.constant 0 : i32
    %c0_i32_1 = arith.constant 0 : i32
    return %c0_i32, %c0_i32_0 : i32, i32
  }
  func.func @transform_11(%arg0: i32) -> (i32, i32) {
    %c0_i32 = arith.constant 0 : i32
    %c0_i32_0 = arith.constant 0 : i32
    %c0_i32_1 = arith.constant 0 : i32
    return %c0_i32, %c0_i32_0 : i32, i32
  }
  func.func @transform_12(%arg0: i32) -> (i32, i32, i32) {
    %c0_i32 = arith.constant 0 : i32
    %c0_i32_0 = arith.constant 0 : i32
    %c0_i32_1 = arith.constant 0 : i32
    return %arg0, %c0_i32, %c0_i32_0 : i32, i32, i32
  }
}

module attributes {stable_mosaic.version = 11 : i64} {
  func.func @_conformer_kernel(%arg0: i32, %arg1: memref<1x8x32xf32, #tpu.memory_space<vmem>>, %arg2: memref<32x96xbf16, #tpu.memory_space<vmem>>, %arg3: memref<32x32xbf16, #tpu.memory_space<vmem>>, %arg4: memref<32x128xbf16, #tpu.memory_space<vmem>>, %arg5: memref<128x32xbf16, #tpu.memory_space<vmem>>, %arg6: memref<96x32xbf16, #tpu.memory_space<vmem>>, %arg7: memref<96x32xbf16, #tpu.memory_space<vmem>>, %arg8: memref<32x128xbf16, #tpu.memory_space<vmem>>, %arg9: memref<128x32xbf16, #tpu.memory_space<vmem>>, %arg10: memref<1x96xf32, #tpu.memory_space<vmem>>, %arg11: memref<2x128xf32, #tpu.memory_space<vmem>>, %arg12: memref<7x32xf32, #tpu.memory_space<vmem>>, %arg13: memref<1x8x32xf32, #tpu.memory_space<vmem>>) attributes {dimension_semantics = [#tpu.dimension_semantics<parallel>], iteration_bounds = array<i64: 2>, scalar_prefetch = 0 : i64, scratch_operands = 0 : i64, tpu.core_type = #tpu.core_type<tc>, window_params = [{transform_indices = @transform_0, window_bounds = array<i64: 1, 8, 32>}, {pipeline_mode = #tpu.pipeline_mode<synchronous>, transform_indices = @transform_1, window_bounds = array<i64: 32, 96>}, {pipeline_mode = #tpu.pipeline_mode<synchronous>, transform_indices = @transform_2, window_bounds = array<i64: 32, 32>}, {pipeline_mode = #tpu.pipeline_mode<synchronous>, transform_indices = @transform_3, window_bounds = array<i64: 32, 128>}, {pipeline_mode = #tpu.pipeline_mode<synchronous>, transform_indices = @transform_4, window_bounds = array<i64: 128, 32>}, {pipeline_mode = #tpu.pipeline_mode<synchronous>, transform_indices = @transform_5, window_bounds = array<i64: 96, 32>}, {pipeline_mode = #tpu.pipeline_mode<synchronous>, transform_indices = @transform_6, window_bounds = array<i64: 96, 32>}, {pipeline_mode = #tpu.pipeline_mode<synchronous>, transform_indices = @transform_7, window_bounds = array<i64: 32, 128>}, {pipeline_mode = #tpu.pipeline_mode<synchronous>, transform_indices = @transform_8, window_bounds = array<i64: 128, 32>}, {pipeline_mode = #tpu.pipeline_mode<synchronous>, transform_indices = @transform_9, window_bounds = array<i64: 1, 96>}, {pipeline_mode = #tpu.pipeline_mode<synchronous>, transform_indices = @transform_10, window_bounds = array<i64: 2, 128>}, {pipeline_mode = #tpu.pipeline_mode<synchronous>, transform_indices = @transform_11, window_bounds = array<i64: 7, 32>}, {transform_indices = @transform_12, window_bounds = array<i64: 1, 8, 32>}]} {
    %c0 = arith.constant 0 : index
    %c0_0 = arith.constant 0 : index
    %0 = vector.load %arg12[%c0, %c0_0] : memref<7x32xf32, #tpu.memory_space<vmem>>, vector<7x32xf32>
    %c0_1 = arith.constant 0 : index
    %c0_2 = arith.constant 0 : index
    %1 = vector.load %arg11[%c0_1, %c0_2] : memref<2x128xf32, #tpu.memory_space<vmem>>, vector<2x128xf32>
    %c0_3 = arith.constant 0 : index
    %c0_4 = arith.constant 0 : index
    %2 = vector.load %arg10[%c0_3, %c0_4] : memref<1x96xf32, #tpu.memory_space<vmem>>, vector<1x96xf32>
    %3 = vector.extract_strided_slice %0 {offsets = [0, 0], sizes = [1, 32], strides = [1, 1]} : vector<7x32xf32> to vector<1x32xf32>
    %4 = vector.extract_strided_slice %0 {offsets = [1, 0], sizes = [1, 32], strides = [1, 1]} : vector<7x32xf32> to vector<1x32xf32>
    %5 = vector.extract_strided_slice %0 {offsets = [2, 0], sizes = [1, 32], strides = [1, 1]} : vector<7x32xf32> to vector<1x32xf32>
    %6 = vector.extract_strided_slice %0 {offsets = [3, 0], sizes = [1, 32], strides = [1, 1]} : vector<7x32xf32> to vector<1x32xf32>
    %7 = vector.extract_strided_slice %0 {offsets = [4, 0], sizes = [1, 32], strides = [1, 1]} : vector<7x32xf32> to vector<1x32xf32>
    %8 = vector.extract_strided_slice %0 {offsets = [5, 0], sizes = [1, 32], strides = [1, 1]} : vector<7x32xf32> to vector<1x32xf32>
    %9 = vector.extract_strided_slice %0 {offsets = [6, 0], sizes = [1, 32], strides = [1, 1]} : vector<7x32xf32> to vector<1x32xf32>
    %10 = vector.extract_strided_slice %1 {offsets = [0, 0], sizes = [1, 128], strides = [1, 1]} : vector<2x128xf32> to vector<1x128xf32>
    %11 = vector.extract_strided_slice %1 {offsets = [1, 0], sizes = [1, 128], strides = [1, 1]} : vector<2x128xf32> to vector<1x128xf32>
    %c0_5 = arith.constant 0 : index
    %c0_6 = arith.constant 0 : index
    %c0_7 = arith.constant 0 : index
    %12 = vector.load %arg1[%c0_5, %c0_6, %c0_7] : memref<1x8x32xf32, #tpu.memory_space<vmem>>, vector<1x8x32xf32>
    %13 = vector.shape_cast %12 : vector<1x8x32xf32> to vector<8x32xf32>
    %c0_8 = arith.constant 0 : index
    %c0_9 = arith.constant 0 : index
    %14 = vector.load %arg2[%c0_8, %c0_9] : memref<32x96xbf16, #tpu.memory_space<vmem>>, vector<32x96xbf16>
    %15 = arith.truncf %13 : vector<8x32xf32> to vector<8x32xbf16>
    %cst = arith.constant dense<0.000000e+00> : vector<8x96xf32>
    %16 = tpu.matmul %15, %14, %cst {dimension_numbers = #tpu.dot_dimension_numbers<[1], [0], [0], [1], [0, 0, 1, 1], [], []>} : vector<8x32xbf16>, vector<32x96xbf16>, vector<8x96xf32> -> vector<8x96xf32>
    %17 = vector.broadcast %2 : vector<1x96xf32> to vector<8x96xf32>
    %18 = arith.addf %16, %17 : vector<8x96xf32>
    %19 = vector.extract_strided_slice %18 {offsets = [0, 0], sizes = [8, 32], strides = [1, 1]} : vector<8x96xf32> to vector<8x32xf32>
    %20 = arith.truncf %19 : vector<8x32xf32> to vector<8x32xbf16>
    %21 = vector.extract_strided_slice %18 {offsets = [0, 32], sizes = [8, 32], strides = [1, 1]} : vector<8x96xf32> to vector<8x32xf32>
    %22 = arith.truncf %21 : vector<8x32xf32> to vector<8x32xbf16>
    %23 = vector.extract_strided_slice %18 {offsets = [0, 64], sizes = [8, 32], strides = [1, 1]} : vector<8x96xf32> to vector<8x32xf32>
    %24 = arith.truncf %23 : vector<8x32xf32> to vector<8x32xbf16>
    %25 = vector.extract_strided_slice %20 {offsets = [0, 0], sizes = [8, 8], strides = [1, 1]} : vector<8x32xbf16> to vector<8x8xbf16>
    %26 = vector.extract_strided_slice %22 {offsets = [0, 0], sizes = [8, 8], strides = [1, 1]} : vector<8x32xbf16> to vector<8x8xbf16>
    %cst_10 = arith.constant dense<0.000000e+00> : vector<8x8xf32>
    %27 = tpu.matmul %25, %26, %cst_10 {dimension_numbers = #tpu.dot_dimension_numbers<[1], [1], [0], [0], [0, 0, 1, 0], [], []>} : vector<8x8xbf16>, vector<8x8xbf16>, vector<8x8xf32> -> vector<8x8xf32>
    %cst_11 = arith.constant dense<0xFF800000> : vector<8xf32>
    %28 = vector.multi_reduction <maximumf>, %27, %cst_11 [1] : vector<8x8xf32> to vector<8xf32>
    %29 = vector.shape_cast %28 : vector<8xf32> to vector<8x1xf32>
    %30 = vector.broadcast %29 : vector<8x1xf32> to vector<8x8xf32>
    %31 = arith.subf %27, %30 : vector<8x8xf32>
    %32 = math.exp %31 : vector<8x8xf32>
    %cst_12 = arith.constant dense<0.000000e+00> : vector<8xf32>
    %33 = vector.multi_reduction <add>, %32, %cst_12 [1] : vector<8x8xf32> to vector<8xf32>
    %34 = vector.shape_cast %33 : vector<8xf32> to vector<8x1xf32>
    %35 = tpu.reciprocal %34 {approx = true} : vector<8x1xf32> -> vector<8x1xf32>
    %36 = arith.truncf %32 : vector<8x8xf32> to vector<8x8xbf16>
    %37 = vector.extract_strided_slice %24 {offsets = [0, 0], sizes = [8, 8], strides = [1, 1]} : vector<8x32xbf16> to vector<8x8xbf16>
    %cst_13 = arith.constant dense<0.000000e+00> : vector<8x8xf32>
    %38 = tpu.matmul %36, %37, %cst_13 {dimension_numbers = #tpu.dot_dimension_numbers<[1], [0], [0], [1], [0, 0, 1, 1], [], []>} : vector<8x8xbf16>, vector<8x8xbf16>, vector<8x8xf32> -> vector<8x8xf32>
    %39 = vector.broadcast %35 : vector<8x1xf32> to vector<8x8xf32>
    %40 = arith.mulf %38, %39 : vector<8x8xf32>
    %41 = vector.extract_strided_slice %20 {offsets = [0, 8], sizes = [8, 8], strides = [1, 1]} : vector<8x32xbf16> to vector<8x8xbf16>
    %42 = vector.extract_strided_slice %22 {offsets = [0, 8], sizes = [8, 8], strides = [1, 1]} : vector<8x32xbf16> to vector<8x8xbf16>
    %cst_14 = arith.constant dense<0.000000e+00> : vector<8x8xf32>
    %43 = tpu.matmul %41, %42, %cst_14 {dimension_numbers = #tpu.dot_dimension_numbers<[1], [1], [0], [0], [0, 0, 1, 0], [], []>} : vector<8x8xbf16>, vector<8x8xbf16>, vector<8x8xf32> -> vector<8x8xf32>
    %cst_15 = arith.constant dense<0xFF800000> : vector<8xf32>
    %44 = vector.multi_reduction <maximumf>, %43, %cst_15 [1] : vector<8x8xf32> to vector<8xf32>
    %45 = vector.shape_cast %44 : vector<8xf32> to vector<8x1xf32>
    %46 = vector.broadcast %45 : vector<8x1xf32> to vector<8x8xf32>
    %47 = arith.subf %43, %46 : vector<8x8xf32>
    %48 = math.exp %47 : vector<8x8xf32>
    %cst_16 = arith.constant dense<0.000000e+00> : vector<8xf32>
    %49 = vector.multi_reduction <add>, %48, %cst_16 [1] : vector<8x8xf32> to vector<8xf32>
    %50 = vector.shape_cast %49 : vector<8xf32> to vector<8x1xf32>
    %51 = tpu.reciprocal %50 {approx = true} : vector<8x1xf32> -> vector<8x1xf32>
    %52 = arith.truncf %48 : vector<8x8xf32> to vector<8x8xbf16>
    %53 = vector.extract_strided_slice %24 {offsets = [0, 8], sizes = [8, 8], strides = [1, 1]} : vector<8x32xbf16> to vector<8x8xbf16>
    %cst_17 = arith.constant dense<0.000000e+00> : vector<8x8xf32>
    %54 = tpu.matmul %52, %53, %cst_17 {dimension_numbers = #tpu.dot_dimension_numbers<[1], [0], [0], [1], [0, 0, 1, 1], [], []>} : vector<8x8xbf16>, vector<8x8xbf16>, vector<8x8xf32> -> vector<8x8xf32>
    %55 = vector.broadcast %51 : vector<8x1xf32> to vector<8x8xf32>
    %56 = arith.mulf %54, %55 : vector<8x8xf32>
    %57 = vector.extract_strided_slice %20 {offsets = [0, 16], sizes = [8, 8], strides = [1, 1]} : vector<8x32xbf16> to vector<8x8xbf16>
    %58 = vector.extract_strided_slice %22 {offsets = [0, 16], sizes = [8, 8], strides = [1, 1]} : vector<8x32xbf16> to vector<8x8xbf16>
    %cst_18 = arith.constant dense<0.000000e+00> : vector<8x8xf32>
    %59 = tpu.matmul %57, %58, %cst_18 {dimension_numbers = #tpu.dot_dimension_numbers<[1], [1], [0], [0], [0, 0, 1, 0], [], []>} : vector<8x8xbf16>, vector<8x8xbf16>, vector<8x8xf32> -> vector<8x8xf32>
    %cst_19 = arith.constant dense<0xFF800000> : vector<8xf32>
    %60 = vector.multi_reduction <maximumf>, %59, %cst_19 [1] : vector<8x8xf32> to vector<8xf32>
    %61 = vector.shape_cast %60 : vector<8xf32> to vector<8x1xf32>
    %62 = vector.broadcast %61 : vector<8x1xf32> to vector<8x8xf32>
    %63 = arith.subf %59, %62 : vector<8x8xf32>
    %64 = math.exp %63 : vector<8x8xf32>
    %cst_20 = arith.constant dense<0.000000e+00> : vector<8xf32>
    %65 = vector.multi_reduction <add>, %64, %cst_20 [1] : vector<8x8xf32> to vector<8xf32>
    %66 = vector.shape_cast %65 : vector<8xf32> to vector<8x1xf32>
    %67 = tpu.reciprocal %66 {approx = true} : vector<8x1xf32> -> vector<8x1xf32>
    %68 = arith.truncf %64 : vector<8x8xf32> to vector<8x8xbf16>
    %69 = vector.extract_strided_slice %24 {offsets = [0, 16], sizes = [8, 8], strides = [1, 1]} : vector<8x32xbf16> to vector<8x8xbf16>
    %cst_21 = arith.constant dense<0.000000e+00> : vector<8x8xf32>
    %70 = tpu.matmul %68, %69, %cst_21 {dimension_numbers = #tpu.dot_dimension_numbers<[1], [0], [0], [1], [0, 0, 1, 1], [], []>} : vector<8x8xbf16>, vector<8x8xbf16>, vector<8x8xf32> -> vector<8x8xf32>
    %71 = vector.broadcast %67 : vector<8x1xf32> to vector<8x8xf32>
    %72 = arith.mulf %70, %71 : vector<8x8xf32>
    %73 = vector.extract_strided_slice %20 {offsets = [0, 24], sizes = [8, 8], strides = [1, 1]} : vector<8x32xbf16> to vector<8x8xbf16>
    %74 = vector.extract_strided_slice %22 {offsets = [0, 24], sizes = [8, 8], strides = [1, 1]} : vector<8x32xbf16> to vector<8x8xbf16>
    %cst_22 = arith.constant dense<0.000000e+00> : vector<8x8xf32>
    %75 = tpu.matmul %73, %74, %cst_22 {dimension_numbers = #tpu.dot_dimension_numbers<[1], [1], [0], [0], [0, 0, 1, 0], [], []>} : vector<8x8xbf16>, vector<8x8xbf16>, vector<8x8xf32> -> vector<8x8xf32>
    %cst_23 = arith.constant dense<0xFF800000> : vector<8xf32>
    %76 = vector.multi_reduction <maximumf>, %75, %cst_23 [1] : vector<8x8xf32> to vector<8xf32>
    %77 = vector.shape_cast %76 : vector<8xf32> to vector<8x1xf32>
    %78 = vector.broadcast %77 : vector<8x1xf32> to vector<8x8xf32>
    %79 = arith.subf %75, %78 : vector<8x8xf32>
    %80 = math.exp %79 : vector<8x8xf32>
    %cst_24 = arith.constant dense<0.000000e+00> : vector<8xf32>
    %81 = vector.multi_reduction <add>, %80, %cst_24 [1] : vector<8x8xf32> to vector<8xf32>
    %82 = vector.shape_cast %81 : vector<8xf32> to vector<8x1xf32>
    %83 = tpu.reciprocal %82 {approx = true} : vector<8x1xf32> -> vector<8x1xf32>
    %84 = arith.truncf %80 : vector<8x8xf32> to vector<8x8xbf16>
    %85 = vector.extract_strided_slice %24 {offsets = [0, 24], sizes = [8, 8], strides = [1, 1]} : vector<8x32xbf16> to vector<8x8xbf16>
    %cst_25 = arith.constant dense<0.000000e+00> : vector<8x8xf32>
    %86 = tpu.matmul %84, %85, %cst_25 {dimension_numbers = #tpu.dot_dimension_numbers<[1], [0], [0], [1], [0, 0, 1, 1], [], []>} : vector<8x8xbf16>, vector<8x8xbf16>, vector<8x8xf32> -> vector<8x8xf32>
    %87 = vector.broadcast %83 : vector<8x1xf32> to vector<8x8xf32>
    %88 = arith.mulf %86, %87 : vector<8x8xf32>
    %89 = tpu.concatenate %40, %56, %72, %88 in 1 : vector<8x8xf32>, vector<8x8xf32>, vector<8x8xf32>, vector<8x8xf32> -> vector<8x32xf32>
    %c0_26 = arith.constant 0 : index
    %c0_27 = arith.constant 0 : index
    %90 = vector.load %arg3[%c0_26, %c0_27] : memref<32x32xbf16, #tpu.memory_space<vmem>>, vector<32x32xbf16>
    %91 = arith.truncf %89 : vector<8x32xf32> to vector<8x32xbf16>
    %cst_28 = arith.constant dense<0.000000e+00> : vector<8x32xf32>
    %92 = tpu.matmul %91, %90, %cst_28 {dimension_numbers = #tpu.dot_dimension_numbers<[1], [0], [0], [1], [0, 0, 1, 1], [], []>} : vector<8x32xbf16>, vector<32x32xbf16>, vector<8x32xf32> -> vector<8x32xf32>
    %93 = arith.addf %13, %92 : vector<8x32xf32>
    %94 = vector.broadcast %3 : vector<1x32xf32> to vector<8x32xf32>
    %95 = arith.addf %93, %94 : vector<8x32xf32>
    %cst_29 = arith.constant dense<0.000000e+00> : vector<8xf32>
    %96 = vector.multi_reduction <add>, %95, %cst_29 [1] : vector<8x32xf32> to vector<8xf32>
    %97 = vector.shape_cast %96 : vector<8xf32> to vector<8x1xf32>
    %cst_30 = arith.constant 3.200000e+01 : f32
    %98 = vector.broadcast %cst_30 : f32 to vector<8x1xf32>
    %99 = arith.divf %97, %98 : vector<8x1xf32>
    %100 = vector.broadcast %99 : vector<8x1xf32> to vector<8x32xf32>
    %101 = arith.subf %95, %100 : vector<8x32xf32>
    %102 = arith.mulf %101, %101 : vector<8x32xf32>
    %cst_31 = arith.constant dense<0.000000e+00> : vector<8xf32>
    %103 = vector.multi_reduction <add>, %102, %cst_31 [1] : vector<8x32xf32> to vector<8xf32>
    %104 = vector.shape_cast %103 : vector<8xf32> to vector<8x1xf32>
    %cst_32 = arith.constant 3.200000e+01 : f32
    %105 = vector.broadcast %cst_32 : f32 to vector<8x1xf32>
    %106 = arith.divf %104, %105 : vector<8x1xf32>
    %107 = vector.broadcast %99 : vector<8x1xf32> to vector<8x32xf32>
    %108 = arith.subf %95, %107 : vector<8x32xf32>
    %cst_33 = arith.constant 9.99999974E-6 : f32
    %109 = vector.broadcast %cst_33 : f32 to vector<8x1xf32>
    %110 = arith.addf %106, %109 : vector<8x1xf32>
    %111 = math.rsqrt %110 : vector<8x1xf32>
    %112 = vector.broadcast %111 : vector<8x1xf32> to vector<8x32xf32>
    %113 = arith.mulf %108, %112 : vector<8x32xf32>
    %c0_34 = arith.constant 0 : index
    %c0_35 = arith.constant 0 : index
    %114 = vector.load %arg4[%c0_34, %c0_35] : memref<32x128xbf16, #tpu.memory_space<vmem>>, vector<32x128xbf16>
    %115 = arith.truncf %113 : vector<8x32xf32> to vector<8x32xbf16>
    %cst_36 = arith.constant dense<0.000000e+00> : vector<8x128xf32>
    %116 = tpu.matmul %115, %114, %cst_36 {dimension_numbers = #tpu.dot_dimension_numbers<[1], [0], [0], [1], [0, 0, 1, 1], [], []>} : vector<8x32xbf16>, vector<32x128xbf16>, vector<8x128xf32> -> vector<8x128xf32>
    %117 = vector.broadcast %10 : vector<1x128xf32> to vector<8x128xf32>
    %118 = arith.addf %116, %117 : vector<8x128xf32>
    %cst_37 = arith.constant 0.000000e+00 : f32
    %119 = vector.broadcast %cst_37 : f32 to vector<8x128xf32>
    %120 = arith.maximumf %118, %119 : vector<8x128xf32>
    %c0_38 = arith.constant 0 : index
    %c0_39 = arith.constant 0 : index
    %121 = vector.load %arg5[%c0_38, %c0_39] : memref<128x32xbf16, #tpu.memory_space<vmem>>, vector<128x32xbf16>
    %122 = arith.truncf %120 : vector<8x128xf32> to vector<8x128xbf16>
    %cst_40 = arith.constant dense<0.000000e+00> : vector<8x32xf32>
    %123 = tpu.matmul %122, %121, %cst_40 {dimension_numbers = #tpu.dot_dimension_numbers<[1], [0], [0], [1], [0, 0, 1, 1], [], []>} : vector<8x128xbf16>, vector<128x32xbf16>, vector<8x32xf32> -> vector<8x32xf32>
    %124 = arith.addf %95, %123 : vector<8x32xf32>
    %125 = vector.broadcast %4 : vector<1x32xf32> to vector<8x32xf32>
    %126 = arith.addf %124, %125 : vector<8x32xf32>
    %cst_41 = arith.constant 0.000000e+00 : bf16
    %127 = vector.broadcast %cst_41 : bf16 to vector<1x32xbf16>
    %c0_42 = arith.constant 0 : index
    %c0_43 = arith.constant 0 : index
    %128 = vector.load %arg6[%c0_42, %c0_43] : memref<96x32xbf16, #tpu.memory_space<vmem>>, vector<96x32xbf16>
    %129 = arith.truncf %126 : vector<8x32xf32> to vector<8x32xbf16>
    %130 = vector.extract_strided_slice %129 {offsets = [0, 0], sizes = [7, 32], strides = [1, 1]} : vector<8x32xbf16> to vector<7x32xbf16>
    %131 = tpu.concatenate %127, %130 in 0 : vector<1x32xbf16>, vector<7x32xbf16> -> vector<8x32xbf16>
    %132 = vector.extract_strided_slice %129 {offsets = [1, 0], sizes = [7, 32], strides = [1, 1]} : vector<8x32xbf16> to vector<7x32xbf16>
    %133 = tpu.concatenate %132, %127 in 0 : vector<7x32xbf16>, vector<1x32xbf16> -> vector<8x32xbf16>
    %134 = vector.extract_strided_slice %128 {offsets = [0, 0], sizes = [32, 32], strides = [1, 1]} : vector<96x32xbf16> to vector<32x32xbf16>
    %cst_44 = arith.constant dense<0.000000e+00> : vector<8x32xf32>
    %135 = tpu.matmul %131, %134, %cst_44 {dimension_numbers = #tpu.dot_dimension_numbers<[1], [0], [0], [1], [0, 0, 1, 1], [], []>} : vector<8x32xbf16>, vector<32x32xbf16>, vector<8x32xf32> -> vector<8x32xf32>
    %136 = vector.extract_strided_slice %128 {offsets = [32, 0], sizes = [32, 32], strides = [1, 1]} : vector<96x32xbf16> to vector<32x32xbf16>
    %cst_45 = arith.constant dense<0.000000e+00> : vector<8x32xf32>
    %137 = tpu.matmul %129, %136, %cst_45 {dimension_numbers = #tpu.dot_dimension_numbers<[1], [0], [0], [1], [0, 0, 1, 1], [], []>} : vector<8x32xbf16>, vector<32x32xbf16>, vector<8x32xf32> -> vector<8x32xf32>
    %138 = arith.addf %135, %137 : vector<8x32xf32>
    %139 = vector.extract_strided_slice %128 {offsets = [64, 0], sizes = [32, 32], strides = [1, 1]} : vector<96x32xbf16> to vector<32x32xbf16>
    %cst_46 = arith.constant dense<0.000000e+00> : vector<8x32xf32>
    %140 = tpu.matmul %133, %139, %cst_46 {dimension_numbers = #tpu.dot_dimension_numbers<[1], [0], [0], [1], [0, 0, 1, 1], [], []>} : vector<8x32xbf16>, vector<32x32xbf16>, vector<8x32xf32> -> vector<8x32xf32>
    %141 = arith.addf %138, %140 : vector<8x32xf32>
    %142 = vector.broadcast %5 : vector<1x32xf32> to vector<8x32xf32>
    %143 = arith.addf %141, %142 : vector<8x32xf32>
    %cst_47 = arith.constant 0.000000e+00 : f32
    %144 = vector.broadcast %cst_47 : f32 to vector<8x32xf32>
    %145 = arith.maximumf %143, %144 : vector<8x32xf32>
    %c0_48 = arith.constant 0 : index
    %c0_49 = arith.constant 0 : index
    %146 = vector.load %arg7[%c0_48, %c0_49] : memref<96x32xbf16, #tpu.memory_space<vmem>>, vector<96x32xbf16>
    %147 = arith.truncf %145 : vector<8x32xf32> to vector<8x32xbf16>
    %148 = vector.extract_strided_slice %147 {offsets = [0, 0], sizes = [7, 32], strides = [1, 1]} : vector<8x32xbf16> to vector<7x32xbf16>
    %149 = tpu.concatenate %127, %148 in 0 : vector<1x32xbf16>, vector<7x32xbf16> -> vector<8x32xbf16>
    %150 = vector.extract_strided_slice %147 {offsets = [1, 0], sizes = [7, 32], strides = [1, 1]} : vector<8x32xbf16> to vector<7x32xbf16>
    %151 = tpu.concatenate %150, %127 in 0 : vector<7x32xbf16>, vector<1x32xbf16> -> vector<8x32xbf16>
    %152 = vector.extract_strided_slice %146 {offsets = [0, 0], sizes = [32, 32], strides = [1, 1]} : vector<96x32xbf16> to vector<32x32xbf16>
    %cst_50 = arith.constant dense<0.000000e+00> : vector<8x32xf32>
    %153 = tpu.matmul %149, %152, %cst_50 {dimension_numbers = #tpu.dot_dimension_numbers<[1], [0], [0], [1], [0, 0, 1, 1], [], []>} : vector<8x32xbf16>, vector<32x32xbf16>, vector<8x32xf32> -> vector<8x32xf32>
    %154 = vector.extract_strided_slice %146 {offsets = [32, 0], sizes = [32, 32], strides = [1, 1]} : vector<96x32xbf16> to vector<32x32xbf16>
    %cst_51 = arith.constant dense<0.000000e+00> : vector<8x32xf32>
    %155 = tpu.matmul %147, %154, %cst_51 {dimension_numbers = #tpu.dot_dimension_numbers<[1], [0], [0], [1], [0, 0, 1, 1], [], []>} : vector<8x32xbf16>, vector<32x32xbf16>, vector<8x32xf32> -> vector<8x32xf32>
    %156 = arith.addf %153, %155 : vector<8x32xf32>
    %157 = vector.extract_strided_slice %146 {offsets = [64, 0], sizes = [32, 32], strides = [1, 1]} : vector<96x32xbf16> to vector<32x32xbf16>
    %cst_52 = arith.constant dense<0.000000e+00> : vector<8x32xf32>
    %158 = tpu.matmul %151, %157, %cst_52 {dimension_numbers = #tpu.dot_dimension_numbers<[1], [0], [0], [1], [0, 0, 1, 1], [], []>} : vector<8x32xbf16>, vector<32x32xbf16>, vector<8x32xf32> -> vector<8x32xf32>
    %159 = arith.addf %156, %158 : vector<8x32xf32>
    %160 = vector.broadcast %6 : vector<1x32xf32> to vector<8x32xf32>
    %161 = arith.addf %159, %160 : vector<8x32xf32>
    %162 = arith.addf %126, %161 : vector<8x32xf32>
    %cst_53 = arith.constant dense<0.000000e+00> : vector<8xf32>
    %163 = vector.multi_reduction <add>, %162, %cst_53 [1] : vector<8x32xf32> to vector<8xf32>
    %164 = vector.shape_cast %163 : vector<8xf32> to vector<8x1xf32>
    %cst_54 = arith.constant 3.200000e+01 : f32
    %165 = vector.broadcast %cst_54 : f32 to vector<8x1xf32>
    %166 = arith.divf %164, %165 : vector<8x1xf32>
    %167 = vector.broadcast %166 : vector<8x1xf32> to vector<8x32xf32>
    %168 = arith.subf %162, %167 : vector<8x32xf32>
    %169 = arith.mulf %168, %168 : vector<8x32xf32>
    %cst_55 = arith.constant dense<0.000000e+00> : vector<8xf32>
    %170 = vector.multi_reduction <add>, %169, %cst_55 [1] : vector<8x32xf32> to vector<8xf32>
    %171 = vector.shape_cast %170 : vector<8xf32> to vector<8x1xf32>
    %cst_56 = arith.constant 3.200000e+01 : f32
    %172 = vector.broadcast %cst_56 : f32 to vector<8x1xf32>
    %173 = arith.divf %171, %172 : vector<8x1xf32>
    %174 = vector.broadcast %166 : vector<8x1xf32> to vector<8x32xf32>
    %175 = arith.subf %162, %174 : vector<8x32xf32>
    %cst_57 = arith.constant 9.99999974E-6 : f32
    %176 = vector.broadcast %cst_57 : f32 to vector<8x1xf32>
    %177 = arith.addf %173, %176 : vector<8x1xf32>
    %178 = math.rsqrt %177 : vector<8x1xf32>
    %179 = vector.broadcast %178 : vector<8x1xf32> to vector<8x32xf32>
    %180 = arith.mulf %175, %179 : vector<8x32xf32>
    %c0_58 = arith.constant 0 : index
    %c0_59 = arith.constant 0 : index
    %181 = vector.load %arg8[%c0_58, %c0_59] : memref<32x128xbf16, #tpu.memory_space<vmem>>, vector<32x128xbf16>
    %182 = arith.truncf %180 : vector<8x32xf32> to vector<8x32xbf16>
    %cst_60 = arith.constant dense<0.000000e+00> : vector<8x128xf32>
    %183 = tpu.matmul %182, %181, %cst_60 {dimension_numbers = #tpu.dot_dimension_numbers<[1], [0], [0], [1], [0, 0, 1, 1], [], []>} : vector<8x32xbf16>, vector<32x128xbf16>, vector<8x128xf32> -> vector<8x128xf32>
    %184 = vector.broadcast %11 : vector<1x128xf32> to vector<8x128xf32>
    %185 = arith.addf %183, %184 : vector<8x128xf32>
    %cst_61 = arith.constant 0.000000e+00 : f32
    %186 = vector.broadcast %cst_61 : f32 to vector<8x128xf32>
    %187 = arith.maximumf %185, %186 : vector<8x128xf32>
    %c0_62 = arith.constant 0 : index
    %c0_63 = arith.constant 0 : index
    %188 = vector.load %arg9[%c0_62, %c0_63] : memref<128x32xbf16, #tpu.memory_space<vmem>>, vector<128x32xbf16>
    %189 = arith.truncf %187 : vector<8x128xf32> to vector<8x128xbf16>
    %cst_64 = arith.constant dense<0.000000e+00> : vector<8x32xf32>
    %190 = tpu.matmul %189, %188, %cst_64 {dimension_numbers = #tpu.dot_dimension_numbers<[1], [0], [0], [1], [0, 0, 1, 1], [], []>} : vector<8x128xbf16>, vector<128x32xbf16>, vector<8x32xf32> -> vector<8x32xf32>
    %191 = arith.addf %162, %190 : vector<8x32xf32>
    %192 = vector.broadcast %7 : vector<1x32xf32> to vector<8x32xf32>
    %193 = arith.addf %191, %192 : vector<8x32xf32>
    %cst_65 = arith.constant dense<0.000000e+00> : vector<8xf32>
    %194 = vector.multi_reduction <add>, %193, %cst_65 [1] : vector<8x32xf32> to vector<8xf32>
    %195 = vector.shape_cast %194 : vector<8xf32> to vector<8x1xf32>
    %cst_66 = arith.constant 3.200000e+01 : f32
    %196 = vector.broadcast %cst_66 : f32 to vector<8x1xf32>
    %197 = arith.divf %195, %196 : vector<8x1xf32>
    %198 = vector.broadcast %197 : vector<8x1xf32> to vector<8x32xf32>
    %199 = arith.subf %193, %198 : vector<8x32xf32>
    %200 = arith.mulf %199, %199 : vector<8x32xf32>
    %cst_67 = arith.constant dense<0.000000e+00> : vector<8xf32>
    %201 = vector.multi_reduction <add>, %200, %cst_67 [1] : vector<8x32xf32> to vector<8xf32>
    %202 = vector.shape_cast %201 : vector<8xf32> to vector<8x1xf32>
    %cst_68 = arith.constant 3.200000e+01 : f32
    %203 = vector.broadcast %cst_68 : f32 to vector<8x1xf32>
    %204 = arith.divf %202, %203 : vector<8x1xf32>
    %205 = vector.broadcast %197 : vector<8x1xf32> to vector<8x32xf32>
    %206 = arith.subf %193, %205 : vector<8x32xf32>
    %cst_69 = arith.constant 9.99999974E-6 : f32
    %207 = vector.broadcast %cst_69 : f32 to vector<8x1xf32>
    %208 = arith.addf %204, %207 : vector<8x1xf32>
    %209 = math.rsqrt %208 : vector<8x1xf32>
    %210 = vector.broadcast %209 : vector<8x1xf32> to vector<8x32xf32>
    %211 = arith.mulf %206, %210 : vector<8x32xf32>
    %212 = vector.broadcast %8 : vector<1x32xf32> to vector<8x32xf32>
    %213 = arith.mulf %211, %212 : vector<8x32xf32>
    %214 = vector.broadcast %9 : vector<1x32xf32> to vector<8x32xf32>
    %215 = arith.addf %213, %214 : vector<8x32xf32>
    %c0_70 = arith.constant 0 : index
    %c0_71 = arith.constant 0 : index
    %c0_72 = arith.constant 0 : index
    %216 = vector.load %arg13[%c0_70, %c0_71, %c0_72] : memref<1x8x32xf32, #tpu.memory_space<vmem>>, vector<1x8x32xf32>
    %217 = vector.shape_cast %216 : vector<1x8x32xf32> to vector<8x32xf32>
    %218 = vector.shape_cast %215 : vector<8x32xf32> to vector<1x8x32xf32>
    tpu.vector_store %arg13[%c0_70, %c0_71, %c0_72], %218 {strides = array<i32>} : memref<1x8x32xf32, #tpu.memory_space<vmem>>, vector<1x8x32xf32>,
    return
  }
  func.func @transform_0(%arg0: i32) -> (i32, i32, i32) {
    %c0_i32 = arith.constant 0 : i32
    %c0_i32_0 = arith.constant 0 : i32
    %c0_i32_1 = arith.constant 0 : i32
    return %arg0, %c0_i32, %c0_i32_0 : i32, i32, i32
  }
  func.func @transform_1(%arg0: i32) -> (i32, i32) {
    %c0_i32 = arith.constant 0 : i32
    %c0_i32_0 = arith.constant 0 : i32
    %c0_i32_1 = arith.constant 0 : i32
    return %c0_i32, %c0_i32_0 : i32, i32
  }
  func.func @transform_2(%arg0: i32) -> (i32, i32) {
    %c0_i32 = arith.constant 0 : i32
    %c0_i32_0 = arith.constant 0 : i32
    %c0_i32_1 = arith.constant 0 : i32
    return %c0_i32, %c0_i32_0 : i32, i32
  }
  func.func @transform_3(%arg0: i32) -> (i32, i32) {
    %c0_i32 = arith.constant 0 : i32
    %c0_i32_0 = arith.constant 0 : i32
    %c0_i32_1 = arith.constant 0 : i32
    return %c0_i32, %c0_i32_0 : i32, i32
  }
  func.func @transform_4(%arg0: i32) -> (i32, i32) {
    %c0_i32 = arith.constant 0 : i32
    %c0_i32_0 = arith.constant 0 : i32
    %c0_i32_1 = arith.constant 0 : i32
    return %c0_i32, %c0_i32_0 : i32, i32
  }
  func.func @transform_5(%arg0: i32) -> (i32, i32) {
    %c0_i32 = arith.constant 0 : i32
    %c0_i32_0 = arith.constant 0 : i32
    %c0_i32_1 = arith.constant 0 : i32
    return %c0_i32, %c0_i32_0 : i32, i32
  }
  func.func @transform_6(%arg0: i32) -> (i32, i32) {
    %c0_i32 = arith.constant 0 : i32
    %c0_i32_0 = arith.constant 0 : i32
    %c0_i32_1 = arith.constant 0 : i32
    return %c0_i32, %c0_i32_0 : i32, i32
  }
  func.func @transform_7(%arg0: i32) -> (i32, i32) {
    %c0_i32 = arith.constant 0 : i32
    %c0_i32_0 = arith.constant 0 : i32
    %c0_i32_1 = arith.constant 0 : i32
    return %c0_i32, %c0_i32_0 : i32, i32
  }
  func.func @transform_8(%arg0: i32) -> (i32, i32) {
    %c0_i32 = arith.constant 0 : i32
    %c0_i32_0 = arith.constant 0 : i32
    %c0_i32_1 = arith.constant 0 : i32
    return %c0_i32, %c0_i32_0 : i32, i32
  }
  func.func @transform_9(%arg0: i32) -> (i32, i32) {
    %c0_i32 = arith.constant 0 : i32
    %c0_i32_0 = arith.constant 0 : i32
    %c0_i32_1 = arith.constant 0 : i32
    return %c0_i32, %c0_i32_0 : i32, i32
  }
  func.func @transform_10(%arg0: i32) -> (i32, i32) {
    %c0_i32 = arith.constant 0 : i32
    %c0_i32_0 = arith.constant 0 : i32
    %c0_i32_1 = arith.constant 0 : i32
    return %c0_i32, %c0_i32_0 : i32, i32
  }
  func.func @transform_11(%arg0: i32) -> (i32, i32) {
    %c0_i32 = arith.constant 0 : i32
    %c0_i32_0 = arith.constant 0 : i32
    %c0_i32_1 = arith.constant 0 : i32
    return %c0_i32, %c0_i32_0 : i32, i32
  }
  func.func @transform_12(%arg0: i32) -> (i32, i32, i32) {
    %c0_i32 = arith.constant 0 : i32
    %c0_i32_0 = arith.constant 0 : i32
    %c0_i32_1 = arith.constant 0 : i32
    return %arg0, %c0_i32, %c0_i32_0 : i32, i32, i32
  }
}

</mosaic_0001>

<bundles_post_ra>
// kernel: tpu_custom_call.1
= control target key start
LH: loop header
LB: loop body
LE: loop exit
PB: predicated region body
PF: predicated region fallthrough
CT: control target
= control target key end

     0   :  { %s2861_s0 = inlined_call_operand.vmem [shape: f32[2,8,32], index: 0, kind: input, shape index: {}]   ;;  %s2862_s1 = inlined_call_operand.vmem [shape: bf16[32,96], index: 1, kind: input, shape index: {}]   ;;  %s2863_s2 = inlined_call_operand.vmem [shape: bf16[32,32], index: 2, kind: input, shape index: {}]   ;;  %s2864_s3 = inlined_call_operand.vmem [shape: bf16[32,128], index: 3, kind: input, shape index: {}]   ;;  %s2865_s4 = inlined_call_operand.vmem [shape: bf16[128,32], index: 4, kind: input, shape index: {}]   ;;  %s2866_s5 = inlined_call_operand.vmem [shape: bf16[96,32], index: 5, kind: input, shape index: {}]   ;;  %s2867_s6 = inlined_call_operand.vmem [shape: bf16[96,32], index: 6, kind: input, shape index: {}]   ;;  %s2868_s7 = inlined_call_operand.vmem [shape: bf16[32,128], index: 7, kind: input, shape index: {}]   ;;  %s2869_s8 = inlined_call_operand.vmem [shape: bf16[128,32], index: 8, kind: input, shape index: {}]   ;;  %s2870_s9 = inlined_call_operand.vmem [shape: f32[1,96], index: 9, kind: input, shape index: {}]   ;;  %s2871_s10 = inlined_call_operand.vmem [shape: f32[2,128], index: 10, kind: input, shape index: {}]   ;;  %s2872_s11 = inlined_call_operand.vmem [shape: f32[7,32], index: 11, kind: input, shape index: {}]   ;;  %s2873_s12 = inlined_call_operand.hbm [shape: f32[2,8,32], index: 12, kind: output, shape index: {}]  }
   0x1   :  { %2874 = sst [smem:[#allocation5_spill]] %s2861_s0 }
   0x2   :  { %2875 = sst [smem:[#allocation6_spill]] %s2862_s1 }
   0x3   :  { %17 = vsyncpa [#allocation3], 0 }
   0x4   :  { %19 = vsyncpa [#allocation3 + $0x1], 0  ;;  %s2438_s21 = smov 0   ;;  %s2440_s22 = smov 0  }
   0x5   :  { %s2442_s23 = smov 0   ;;  %s2444_s24 = smov 0  }
   0x6 LB: > { %s2459_s25 = sadd.s32 4294967295, %s2354_s24   ;;  %s1882_s26 = sadd.s32 4294967294, %s2354_s24   ;;  %s2354_s24 = sphi %s2444_s24, %s2887_s24   ;;  %s2350_s23 = sphi %s2442_s23, %s2886_s23   ;;  %s2346_s22 = sphi %s2440_s22, %s2885_s22   ;;  %s2342_s21 = sphi %s2438_s21, %s2884_s21  }
   0x7   : > { %s2463_s27 = sadd.s32 1, %s2354_s24   ;;  %s289_s28 = sadd.s32 1, %s2350_s23 }
   0x8   : > { %s286_s29 = ssub.s32 %s2354_s24, %s2463_s27  ;;  %p299_p0 = scmp.ne.s32.totalorder %s2350_s23, %s2346_s22 }
   0x9   : > { %p287_p1 = scmp.eq.s32.totalorder %s286_s29, 0  ;;  %p300_p2 = scmp.eq.s32.totalorder %s2459_s25, 1 }
   0xa   : > { %p305_p3 = scmp.ne.s32.totalorder %s2346_s22, %s2342_s21  ;;  %p306_p4 = scmp.eq.s32.totalorder %s1882_s26, 1 }
   0xb   : > { %s2474_s30 = scalar_select %p287_p1, %s2350_s23, %s289_s28  }
   0xc   : > { %p2476_p5 = por %p300_p2, %p299_p0  ;;  %p2480_p6 = por %p306_p4, %p305_p3 }
   0xd   : > { %p1885_p7 = scmp.ge.s32.totalorder %s2354_s24, 1  ;;  %p364_p8 = scmp.lt.s32.totalorder %s2354_s24, 3 }
   0xf   : > { %p365_p9 = pnand %p1885_p7, %p364_p8 }
  0x10   : > { %s2878_s1 = sld [smem:[#allocation6_spill]] (!%p365_p9)  ;;  %v2356_v1 = vmov (!%p365_p9), 0.0   ;;  %vm2357_vm0 = vmmov (!%p365_p9), 0   ;;  %p405_p10 = scmp.lt.s32.totalorder (!%p365_p9), %s2459_s25, 1  ;;  %vm437_vm1 = vcmask (!%p365_p9), 261120   ;;  %vm485_vm2 = vcmask (!%p365_p9), 64512  }
  0x11   : > { %368 = sbr.rel (%p365_p9) target bundleno = 3968 (0xf80), region = 68  ;;  %2011 = vmatprep.subr.bf16.mxu1 (!%p365_p9), %v2356_v1  ;;  %2037 = vmatprep.subr.bf16.mxu0 (!%p365_p9), %v2356_v1  ;;  %s2879_s0 = sld [smem:[#allocation5_spill]] (!%p365_p9)  ;;  %v1888_v5 = vld [vmem:[%s2870_s9] ss:$0 sm:$0xff] (!%p365_p9)  ;;  %vm548_vm3 = vcmask (!%p365_p9), 1043456   ;;  %vm936_vm4 = vcmask (!%p365_p9), 130048  }
  0x12   : > { %2015 = vmatprep.mubr.msk.bf16.mxu1 (!%p365_p9), %vm2357_vm0, %v2356_v1  ;;  %2039 = vmatprep.mubr.msk.bf16.mxu0 (!%p365_p9), %vm2357_vm0, %v2356_v1  ;;  %s2358_s17 = smov (!%p365_p9), 64   ;;  %s2359_s18 = smov (!%p365_p9), 96   ;;  %vm938_vm5 = vcmask (!%p365_p9), 195584   ;;  %vm1217_vm6 = vcmask (!%p365_p9), 1040384   ;;  %vm1218_vm7 = vsmask.f32 (!%p365_p9), 256 }
  0x13   : > { %s2362_s26 = smov (!%p365_p9), 80   ;;  %s2363_s28 = smov (!%p365_p9), 112   ;;  %vm2691_vm8 = vmand (!%p365_p9), %vm1217_vm6, %vm1218_vm7  ;;  %vm1225_vm9 = vsmask.f32 (!%p365_p9), 3328 }
  0x14   : > { %s2365_s15 = smov (!%p365_p9), 104   ;;  %s2366_s16 = smov (!%p365_p9), 56   ;;  %vm2709_vm10 = vmand (!%p365_p9), %vm548_vm3, %vm1225_vm9 }
  0x16   : > { %v2234_v0 = vld [vmem:[%s2878_s1] sm:$0xff] (!%p365_p9)   ;;  %v2235_v2 = vld [vmem:[%s2878_s1 + $0x8] sm:$0xff] (!%p365_p9)  }
  0x17   : > { %2012 = vmatpush3.bf16.msra.mxu1 (!%p365_p9), %v2234_v0 }
  0x18   : > { %2013 = vmatprep.subr.bf16.mxu1 %v2356_v1  ;;  %s406_s19 = scalar_select %p405_p10, %s2459_s25, 1 }
  0x1a   : > { %s1887_s20 = sshll.u32 %s406_s19, 3  ;;  %s2360_s19 = smov 88  }
  0x1b   : > { %2014 = vmatpush3.bf16.msra.mxu1 %v2235_v2  ;;  %s408_s29 = scalar_lea.vmem %s2879_s0, %s1887_s20  ;;  %s2361_s20 = smov 120  }
  0x1c   : > { %2019 = vmatprep.subr.bf16.mxu1 %v2356_v1  ;;  %v2505_v3 = vld [vmem:[%s408_s29] sm:$0xff]  ;;  %s2364_s29 = smov 72  }
  0x1d   : > { %v418_v4 = vpack.c.bf16 %v2505_v3, %v2505_v3 }
  0x1f   : > { %2016 = vmatmul.mubr.msk.bf16.vlgmr.msra.gmra.mrb[0].mxu1 %vm437_vm1, %v418_v4 }
  0x20   : > { %2021 = vmatprep.mubr.msk.bf16.mxu1 %vm2357_vm0, %v2356_v1 }
  0xf2   : > { %v475_v6 = vpop.f32.mrb[0].mxu1 }
  0xf3   : > { %v476_v7 = vadd.f32 %v1888_v5, %v475_v6  ;;  %v2017_v8 = vpop.f32.mrb[1].mxu1 }
  0xf4   : > { %v478_v9 = vpop.f32.mrb[2].mxu1 }
  0xf5   : > { %v2515_v10 = vpack.c.bf16 %v476_v7, %v476_v7  ;;  %v2018_v11 = vpop.f32.mrb[3].mxu1 }
  0xf7   : > { %543 = vrot.lane.b32.xlu1 %v2515_v10, %s2358_s17  ;;  %483 = vrot.lane.b32.xlu0 %v2515_v10, %s2359_s18  ;;  %s2367_s17 = smov 48   ;;  %s2368_s18 = smov 40  }
  0xfb   : > { %595 = vrot.lane.b32.xlu1 %v2515_v10, %s2360_s19 }
  0xff   : > { %593 = vrot.lane.b32.xlu1 %v2515_v10, %s2361_s20 }
 0x103   : > { %705 = vrot.lane.b32.xlu1 %v2515_v10, %s2362_s26  ;;  %s2369_s26 = smov 8  }
 0x107   : > { %703 = vrot.lane.b32.xlu1 %v2515_v10, %s2363_s28  ;;  %s402_s28 = sand.u32 1, %s2346_s22  }
 0x10b   : > { %815 = vrot.lane.b32.xlu1 %v2515_v10, %s2364_s29  ;;  %s1886_s29 = sshll.u32 %s402_s28, 3 }
 0x10f   : > { %813 = vrot.lane.b32.xlu1 %v2515_v10, %s2365_s15  ;;  %s2370_s15 = smov 16  }
 0x169   : > { %v484_v12 = vpop.permute.xlu0 %483  ;;  %v544_v14 = vpop.permute.xlu1 %543 }
 0x16a   : > { %v490_v13 = vsel %vm485_vm2, %v484_v12, 0  ;;  %v550_v15 = vsel %vm548_vm3, %v544_v14, 0 }
 0x16b   : > { %2020 = vmatpush3.bf16.xpose.msra.mxu1 %v490_v13 }
 0x16c   : > { %2025 = vmatprep.subr.bf16.mxu1 %v2356_v1 }
 0x16d   : > { %v596_v26 = vpop.permute.xlu1 %595 }
 0x16e   : > { %v601_v30 = vsel %vm485_vm2, %v596_v26, 0 }
 0x171   : > { %v594_v27 = vpop.permute.xlu1 %593 }
 0x172   : > { %2022 = vmatmul.mubr.msk.bf16.vlgmr.msra.gmra.mrb[4].mxu1 %vm485_vm2, %v2515_v10 }
 0x173   : > { %2026 = vmatpush3.bf16.msra.mxu1 %v550_v15  ;;  %2027 = vmatprep.mubr.msk.bf16.mxu1 %vm2357_vm0, %v2356_v1 }
 0x174   : > { %2031 = vmatprep.subr.bf16.mxu1 %v2356_v1 }
 0x175   : > { %v706_v31 = vpop.permute.xlu1 %705 }
 0x176   : > { %v711_v33 = vsel %vm485_vm2, %v706_v31, 0 }
 0x179   : > { %v704_v32 = vpop.permute.xlu1 %703 }
 0x17d   : > { %v816_v34 = vpop.permute.xlu1 %815 }
 0x17e   : > { %v821_v35 = vsel %vm485_vm2, %v816_v34, 0 }
 0x181   : > { %v814_v36 = vpop.permute.xlu1 %813 }
 0x245   : > { %v526_v16 = vpop.f32.mrb[4].mxu1 }
 0x246   : > { %v2023_v17 = vpop.f32.mrb[5].mxu1  ;;  %v532_v18 = vsel %vm485_vm2, %v526_v16, -inf }
 0x247   : > { %533 = vmax.xlane.f32.xlu0 %v532_v18  ;;  %v529_v19 = vpop.f32.mrb[6].mxu1 }
 0x248   : > { %v2024_v20 = vpop.f32.mrb[7].mxu1  ;;  %v2236_v19 = vld [vmem:[%s2863_s2] sm:$0xff]  }
 0x25d   : > { %654 = vrot.lane.b32.xlu0 %v2515_v10, %s2366_s16  ;;  %s2371_s16 = smov 24  }
 0x2d4   : > { %v534_v21 = vpop.xlane.xlu0 %533 }
 0x2d5   : > { %v535_v22 = vsub.f32 %v526_v16, %v534_v21 }
 0x2d7   : > { %v536_v23 = vmul.f32 1.442695, %v535_v22 }
 0x2d8   : > { %v655_v24 = vpop.permute.xlu0 %654 }
 0x2d9   : > { %2270 = vpow2.f32 %v536_v23  ;;  %v660_v25 = vsel %vm548_vm3, %v655_v24, 0 }
 0x2da   : > { %2038 = vmatpush3.bf16.msra.mxu0 %v660_v25 }
 0x2db   : > { %2049 = vmatprep.subr.bf16.mxu0 %v2356_v1 }
 0x2e3   : > { %v2537_v28 = vpop.eup %2270 }
 0x2e4   : > { %v542_v29 = vpack.c.bf16 %v2537_v28, %v2537_v28  ;;  %v538_v16 = vsel %vm485_vm2, %v2537_v28, 0.0 }
 0x2e6   : > { %2028 = vmatmul.mubr.msk.bf16.vlgmr.msra.gmra.mrb[8].mxu1 %vm485_vm2, %v542_v29 }
 0x2e7   : > { %2032 = vmatpush3.bf16.xpose.msra.mxu1 %v601_v30  ;;  %2033 = vmatprep.mubr.msk.bf16.mxu1 %vm2357_vm0, %v2356_v1 }
 0x2e8   : > { %2043 = vmatprep.subr.bf16.mxu1 %v2356_v1 }
 0x2ee   : > { %2034 = vmatmul.mubr.msk.bf16.vlgmr.msra.gmra.mrb[12].mxu1 %vm485_vm2, %v594_v27  ;;  %v2237_v27 = vld [vmem:[%s2863_s2 + $0x8] sm:$0xff]  }
 0x2ef   : > { %2044 = vmatpush3.bf16.xpose.msra.mxu1 %v711_v33  ;;  %2045 = vmatprep.mubr.msk.bf16.mxu1 %vm2357_vm0, %v2356_v1 }
 0x2f0   : > { %2055 = vmatprep.subr.bf16.mxu1 %v2356_v1 }
 0x2f6   : > { %2046 = vmatmul.mubr.msk.bf16.vlgmr.msra.gmra.mrb[16].mxu1 %vm485_vm2, %v704_v32 }
 0x2f7   : > { %2056 = vmatpush3.bf16.xpose.msra.mxu1 %v821_v35  ;;  %2057 = vmatprep.mubr.msk.bf16.mxu1 %vm2357_vm0, %v2356_v1 }
 0x2f8   : > { %2067 = vmatprep.subr.bf16.mxu1 %v2356_v1 }
 0x2fe   : > { %2058 = vmatmul.mubr.msk.bf16.vlgmr.msra.gmra.mrb[20].mxu1 %vm485_vm2, %v814_v36 }
 0x2ff   : > { %2071 = vmatprep.mubr.msk.bf16.mxu1 %vm2357_vm0, %v2356_v1  ;;  %2068 = vmatpush3.bf16.msra.mxu1 %v2236_v19  ;;  %v2247_v19 = vld [vmem:[%s2865_s4 + $0x38] sm:$0xff]  }
 0x300   : > { %2069 = vmatprep.subr.bf16.mxu1 %v2356_v1 }
 0x303   : > { %2070 = vmatpush3.bf16.msra.mxu1 %v2237_v27 }
 0x304   : > { %2083 = vmatprep.subr.bf16.mxu1 %v2356_v1 }
 0x3b9   : > { %v2559_v37 = vpop.f32.mrb[8].mxu1 }
 0x3ba   : > { %v2029_v38 = vpop.f32.mrb[9].mxu1 }
 0x3bb   : > { %v589_v39 = vpop.f32.mrb[10].mxu1 }
 0x3bc   : > { %v2030_v40 = vpop.f32.mrb[11].mxu1 }
 0x3c1   : > { %v637_v41 = vpop.f32.mrb[12].mxu1 }
 0x3c2   : > { %v2035_v42 = vpop.f32.mrb[13].mxu1  ;;  %v643_v43 = vsel %vm485_vm2, %v637_v41, -inf }
 0x3c3   : > { %644 = vmax.xlane.f32.xlu1 %v643_v43  ;;  %v640_v44 = vpop.f32.mrb[14].mxu1 }
 0x3c4   : > { %v2036_v45 = vpop.f32.mrb[15].mxu1 }
 0x3c9   : > { %v747_v46 = vpop.f32.mrb[16].mxu1 }
 0x3ca   : > { %v2047_v47 = vpop.f32.mrb[17].mxu1  ;;  %v753_v48 = vsel %vm485_vm2, %v747_v46, -inf }
 0x3cb   : > { %754 = vmax.xlane.f32.xlu0 %v753_v48  ;;  %v750_v49 = vpop.f32.mrb[18].mxu1 }
 0x3cc   : > { %v2048_v50 = vpop.f32.mrb[19].mxu1 }
 0x3d1   : > { %v857_v51 = vpop.f32.mrb[20].mxu1 }
 0x3d2   : > { %v2059_v52 = vpop.f32.mrb[21].mxu1  ;;  %v863_v53 = vsel %vm485_vm2, %v857_v51, -inf }
 0x3d3   : > { %864 = vmax.xlane.f32.xlu0 %v863_v53  ;;  %v860_v54 = vpop.f32.mrb[22].mxu1 }
 0x3d4   : > { %764 = vrot.lane.b32.xlu1 %v2515_v10, %s2367_s17  ;;  %v2060_v55 = vpop.f32.mrb[23].mxu1 }
 0x3e9   : > { %874 = vrot.lane.b32.xlu0 %v2515_v10, %s2368_s18 }
 0x450   : > { %v645_v56 = vpop.xlane.xlu1 %644 }
 0x451   : > { %v646_v57 = vsub.f32 %v637_v41, %v645_v56 }
 0x453   : > { %v647_v58 = vmul.f32 1.442695, %v646_v57 }
 0x454   : > { %v765_v63 = vpop.permute.xlu1 %764 }
 0x455   : > { %2272 = vpow2.f32 %v647_v58  ;;  %v770_v6 = vsel %vm548_vm3, %v765_v63, 0 }
 0x458   : > { %v755_v59 = vpop.xlane.xlu0 %754 }
 0x459   : > { %v756_v60 = vsub.f32 %v747_v46, %v755_v59 }
 0x45b   : > { %v757_v61 = vmul.f32 1.442695, %v756_v60 }
 0x45d   : > { %2274 = vpow2.f32 %v757_v61 }
 0x45f   : > { %v2273_v62 = vpop.eup %2272 }
 0x460   : > { %v865_v0 = vpop.xlane.xlu0 %864  ;;  %v649_v2 = vsel %vm485_vm2, %v2273_v62, 0.0  ;;  %v653_v4 = vpack.c.bf16 %v2273_v62, %v2273_v62 }
 0x461   : > { %v866_v5 = vsub.f32 %v857_v51, %v865_v0  ;;  %650 = vadd.xlane.f32.xlu0 %v649_v2  ;;  %v1001_v51 = vlaneseq }
 0x462   : > { %2040 = vmatmul.mubr.msk.bf16.vlgmr.msra.gmra.mrb[0].mxu0 %vm485_vm2, %v653_v4 }
 0x463   : > { %v867_v7 = vmul.f32 1.442695, %v866_v5  ;;  %2050 = vmatpush3.bf16.msra.mxu0 %v770_v6  ;;  %2051 = vmatprep.mubr.msk.bf16.mxu0 %vm2357_vm0, %v2356_v1  ;;  %v2597_v52 = vshrl.u32 %v1001_v51, 7  ;;  %v2239_v5 = vld [vmem:[%s2864_s3 + $0x8] sm:$0xff]   ;;  %v2240_v6 = vld [vmem:[%s2865_s4] sm:$0xff]  }
 0x464   : > { %2061 = vmatprep.subr.bf16.mxu0 %v2356_v1  ;;  %v875_v9 = vpop.permute.xlu0 %874  ;;  %v2253_v51 = vld [vmem:[%s2866_s5 + $0x28] sm:$0xff]  }
 0x465   : > { %2276 = vpow2.f32 %v867_v7  ;;  %v880_v12 = vsel %vm548_vm3, %v875_v9, 0  ;;  %v1003_v53 = vsub.s32 0, %v2597_v52  ;;  %v2241_v7 = vld [vmem:[%s2865_s4 + $0x8] sm:$0xff]   ;;  %v2243_v9 = vld [vmem:[%s2865_s4 + $0x18] sm:$0xff]  }
 0x467   : > { %v2275_v8 = vpop.eup %2274 }
 0x468   : > { %v759_v10 = vsel %vm485_vm2, %v2275_v8, 0.0  ;;  %v763_v11 = vpack.c.bf16 %v2275_v8, %v2275_v8  ;;  %v2242_v8 = vld [vmem:[%s2865_s4 + $0x10] sm:$0xff]  }
 0x469   : > { %760 = vadd.xlane.f32.xlu1 %v759_v10  ;;  %v2244_v10 = vld [vmem:[%s2865_s4 + $0x20] sm:$0xff]  }
 0x46a   : > { %2052 = vmatmul.mubr.msk.bf16.vlgmr.msra.gmra.mrb[4].mxu0 %vm485_vm2, %v763_v11  ;;  %v2245_v11 = vld [vmem:[%s2865_s4 + $0x28] sm:$0xff]  }
 0x46b   : > { %2062 = vmatpush3.bf16.msra.mxu0 %v880_v12  ;;  %2063 = vmatprep.mubr.msk.bf16.mxu0 %vm2357_vm0, %v2356_v1 }
 0x46c   : > { %2075 = vmatprep.subr.bf16.mxu0 %v2356_v1 }
 0x46f   : > { %v2277_v13 = vpop.eup %2276 }
 0x470   : > { %v869_v14 = vsel %vm485_vm2, %v2277_v13, 0.0  ;;  %v873_v15 = vpack.c.bf16 %v2277_v13, %v2277_v13 }
 0x471   : > { %870 = vadd.xlane.f32.xlu0 %v869_v14 }
 0x472   : > { %2064 = vmatmul.mubr.msk.bf16.vlgmr.msra.gmra.mrb[8].mxu0 %vm485_vm2, %v873_v15 }
 0x473   : > { %2079 = vmatprep.mubr.msk.bf16.mxu0 %vm2357_vm0, %v2356_v1 }
 0x475   : > { %539 = vadd.xlane.f32.xlu0 %v538_v16 }
 0x4ee   : > { %v651_v17 = vpop.xlane.xlu0 %650 }
 0x4ef   : > { %2278 = vrcp.f32 %v651_v17 }
 0x4f6   : > { %v761_v18 = vpop.xlane.xlu1 %760 }
 0x4f7   : > { %2280 = vrcp.f32 %v761_v18  ;;  %v2246_v18 = vld [vmem:[%s2865_s4 + $0x30] sm:$0xff]  }
 0x4f9   : > { %v2279_v20 = vpop.eup %2278 }
 0x4fe   : > { %v871_v25 = vpop.xlane.xlu0 %870 }
 0x4ff   : > { %2282 = vrcp.f32 %v871_v25 }
 0x501   : > { %v2281_v28 = vpop.eup %2280 }
 0x502   : > { %v540_v41 = vpop.xlane.xlu0 %539 }
 0x503   : > { %2284 = vrcp.f32 %v540_v41 }
 0x509   : > { %v2283_v34 = vpop.eup %2282 }
 0x50d   : > { %v2285_v42 = vpop.eup %2284 }
 0x50e   : > { %v592_v44 = vmul.f32 %v2285_v42, %v2559_v37  ;;  %v2603_v37 = vld [vmem:[%s2872_s11] sm:$0x7f] }
 0x50f   : > { %v1004_v54 = vrot.slane %v2603_v37, %v1003_v53 }
 0x535   : > { %v696_v21 = vpop.f32.mrb[0].mxu0 }
 0x536   : > { %v702_v22 = vmul.f32 %v2279_v20, %v696_v21  ;;  %v2041_v23 = vpop.f32.mrb[1].mxu0  ;;  %v2659_v20 = vld [vmem:[%s2871_s10] sm:$0x3] }
 0x537   : > { %v699_v24 = vpop.f32.mrb[2].mxu0  ;;  %v1028_v21 = vrot.slane %v2659_v20, %v1003_v53 }
 0x538   : > { %v2042_v26 = vpop.f32.mrb[3].mxu0  ;;  %924 = vrot.lane.b32.xlu0 %v702_v22, %s2369_s26  ;;  %s1810_s26 = scalar_lea.sflag [#allocation3], %s402_s28 }
 0x53d   : > { %v806_v29 = vpop.f32.mrb[4].mxu0 }
 0x53e   : > { %v812_v30 = vmul.f32 %v2281_v28, %v806_v29  ;;  %v2053_v31 = vpop.f32.mrb[5].mxu0  ;;  %v2248_v29 = vld [vmem:[%s2866_s5 + $0x10] sm:$0xff]  }
 0x53f   : > { %v809_v32 = vpop.f32.mrb[6].mxu0  ;;  %v1193_v31 = vsub.s32 1, %v2597_v52 }
 0x540   : > { %v2054_v33 = vpop.f32.mrb[7].mxu0  ;;  %928 = vrot.lane.b32.xlu1 %v812_v30, %s2370_s15  ;;  %v2249_v30 = vld [vmem:[%s2866_s5 + $0x18] sm:$0xff]   ;;  %s1944_s15 = sshll.u32 %s2459_s25, 7  ;;  %s2372_s25 = smov [#allocation2]  }
 0x541   : > { %v1194_v32 = vrot.slane %v2603_v37, %v1193_v31  ;;  %s2818_s20 = scalar_lea.hbm %s2873_s12, %s1944_s15 }
 0x545   : > { %v916_v35 = vpop.f32.mrb[8].mxu0 }
 0x546   : > { %v922_v36 = vmul.f32 %v2283_v34, %v916_v35  ;;  %v2065_v38 = vpop.f32.mrb[9].mxu0 }
 0x547   : > { %v919_v39 = vpop.f32.mrb[10].mxu0 }
 0x548   : > { %v2066_v40 = vpop.f32.mrb[11].mxu0  ;;  %932 = vrot.lane.b32.xlu0 %v922_v36, %s2371_s16  ;;  %s404_s16 = scalar_lea.vmem [#allocation2], %s1886_s29  ;;  %s2296_s29 = sshll.u32 %s2372_s25, 4  ;;  %s2297_s29 = int_to_ptr.vmem [resolvable:$false] %s2296_s29 }
 0x549   : > { %v2250_v40 = vld [vmem:[%s2866_s5] sm:$0xff]   ;;  %s1823_s17 = sshll.u32 %s404_s16, 4  ;;  %s2298_s1 = scalar_lea.vmem %s2297_s29, 256  ;;  %s2820_s17 = int_to_ptr.vmem [resolvable:$true] %s1823_s17 }
 0x54a   : > { %s2292_s0 = scalar_lea.vmem %s2820_s17, 128  ;;  %p2299_p0 = scmp.lt.s32.totalorder %s2820_s17, %s2297_s29 }
 0x54b   : > { %p2293_p11 = scmp.ne.s32.totalorder %s2820_s17, %s2292_s0  ;;  %p2300_p1 = scmp.lt.s32.totalorder %s2298_s1, %s2292_s0 }
 0x54d   : > { %p2294_p12 = pnand %p2293_p11, %p2476_p5  ;;  %p2301_p2 = por %p2300_p1, %p2299_p0 }
 0x54f   : > { %p2295_p13 = pneg %p2294_p12 }
 0x551   : > { %p2302_p3 = pnand %p2301_p2, %p2295_p13 }
 0x5aa   : > { %v925_v43 = vpop.permute.xlu0 %924 }
 0x5ab   : > { %v935_v46 = vsel %vm485_vm2, %v592_v44, %v925_v43  ;;  %v2251_v43 = vld [vmem:[%s2866_s5 + $0x8] sm:$0xff]  }
 0x5b2   : > { %v929_v45 = vpop.permute.xlu1 %928 }
 0x5b3   : > { %v937_v47 = vsel %vm936_vm4, %v935_v46, %v929_v45 }
 0x5ba   : > { %v933_v48 = vpop.permute.xlu0 %932 }
 0x5bb   : > { %v939_v49 = vsel %vm938_vm5, %v937_v47, %v933_v48  ;;  %v2252_v48 = vld [vmem:[%s2866_s5 + $0x20] sm:$0xff]  }
 0x5bc   : > { %v944_v50 = vpack.c.bf16 %v939_v49, %v939_v49 }
 0x5be   : > { %2072 = vmatmul.mubr.msk.bf16.vlgmr.msra.gmra.mrb[24].mxu1 %vm437_vm1, %v944_v50 }
 0x5bf   : > { %2099 = vmatprep.mubr.msk.bf16.mxu1 %vm2357_vm0, %v2356_v1  ;;  %2084 = vmatpush3.bf16.msra.mxu1 %v2240_v6  ;;  %v1395_v6 = vsub.s32 2, %v2597_v52 }
 0x5c0   : > { %2085 = vmatprep.subr.bf16.mxu1 %v2356_v1 }
 0x5c3   : > { %2086 = vmatpush3.bf16.msra.mxu1 %v2241_v7  ;;  %v1396_v7 = vrot.slane %v2603_v37, %v1395_v6  ;;  %v2269_v6 = vld [vmem:[%s2869_s8 + $0x38] sm:$0xff]  }
 0x5c4   : > { %2087 = vmatprep.subr.bf16.mxu1 %v2356_v1 }
 0x5c7   : > { %2088 = vmatpush3.bf16.msra.mxu1 %v2242_v8 }
 0x5c8   : > { %2089 = vmatprep.subr.bf16.mxu1 %v2356_v1 }
 0x5cb   : > { %2090 = vmatpush3.bf16.msra.mxu1 %v2243_v9 }
 0x5cc   : > { %2091 = vmatprep.subr.bf16.mxu1 %v2356_v1 }
 0x5cf   : > { %2092 = vmatpush3.bf16.msra.mxu1 %v2244_v10 }
 0x5d0   : > { %2093 = vmatprep.subr.bf16.mxu1 %v2356_v1 }
 0x5d3   : > { %2094 = vmatpush3.bf16.msra.mxu1 %v2245_v11 }
 0x5d4   : > { %2095 = vmatprep.subr.bf16.mxu1 %v2356_v1 }
 0x5d7   : > { %2096 = vmatpush3.bf16.msra.mxu1 %v2246_v18 }
 0x5d8   : > { %2097 = vmatprep.subr.bf16.mxu1 %v2356_v1 }
 0x5db   : > { %2098 = vmatpush3.bf16.msra.mxu1 %v2247_v19  ;;  %v2259_v19 = vld [vmem:[%s2867_s6 + $0x28] sm:$0xff]  }
 0x5dc   : > { %2135 = vmatprep.subr.bf16.mxu1 %v2356_v1 }
 0x691   : > { %v994_v55 = vpop.f32.mrb[24].mxu1 }
 0x692   : > { %v1000_v56 = vadd.f32 %v994_v55, %v2505_v3  ;;  %v2073_v57 = vpop.f32.mrb[25].mxu1  ;;  %v2238_v3 = vld [vmem:[%s2864_s3] sm:$0xff]  }
 0x693   : > { %v997_v58 = vpop.f32.mrb[26].mxu1  ;;  %2076 = vmatpush3.bf16.msra.mxu0 %v2238_v3  ;;  %v2255_v57 = vld [vmem:[%s2867_s6 + $0x18] sm:$0xff]  }
 0x694   : > { %v2607_v59 = vadd.f32 %v1004_v54, %v1000_v56  ;;  %v2074_v60 = vpop.f32.mrb[27].mxu1  ;;  %2077 = vmatprep.subr.bf16.mxu0 %v2356_v1  ;;  %v2254_v56 = vld [vmem:[%s2867_s6 + $0x10] sm:$0xff]   ;;  %v2256_v58 = vld [vmem:[%s2867_s6] sm:$0xff]  }
 0x696   : > { %v1006_v61 = vsel %vm437_vm1, %v2607_v59, 0.0 }
 0x697   : > { %1007 = vadd.xlane.f32.xlu0 %v1006_v61  ;;  %2078 = vmatpush3.bf16.msra.mxu0 %v2239_v5 }
 0x698   : > { %2103 = vmatprep.subr.bf16.mxu0 %v2356_v1 }
 0x724   : > { %v1008_v62 = vpop.xlane.xlu0 %1007 }
 0x725   : > { %v1010_v63 = vmul.f32 0.03125, %v1008_v62 }
 0x727   : > { %v1011_v0 = vsub.f32 %v2607_v59, %v1010_v63 }
 0x729   : > { %v1012_v2 = vmul.f32 %v1011_v0, %v1011_v0 }
 0x72b   : > { %v1013_v4 = vsel %vm437_vm1, %v1012_v2, 0.0 }
 0x72c   : > { %1014 = vadd.xlane.f32.xlu1 %v1013_v4 }
 0x7b9   : > { %v1015_v12 = vpop.xlane.xlu1 %1014 }
 0x7ba   : > { %v1016_v13 = vmul.f32 0.03125, %v1015_v12 }
 0x7bc   : > { %v1017_v14 = vadd.f32 1e-05, %v1016_v13 }
 0x7be   : > { %2286 = vrsqrt.f32 %v1017_v14 }
 0x7c8   : > { %v2287_v15 = vpop.eup %2286 }
 0x7c9   : > { %v1019_v16 = vmul.f32 %v2287_v15, %v1011_v0  ;;  %v2257_v15 = vld [vmem:[%s2867_s6 + $0x20] sm:$0xff]  }
 0x7cb   : > { %v1024_v17 = vpack.c.bf16 %v1019_v16, %v1019_v16 }
 0x7cd   : > { %2080 = vmatmul.mubr.msk.bf16.vlgmr.msra.gmra.mrb[12].mxu0 %vm437_vm1, %v1024_v17 }
 0x7ce   : > { %2107 = vmatprep.mubr.msk.bf16.mxu0 %vm2357_vm0, %v2356_v1  ;;  %2104 = vmatpush3.bf16.msra.mxu0 %v2248_v29 }
 0x7cf   : > { %2105 = vmatprep.subr.bf16.mxu0 %v2356_v1 }
 0x7d2   : > { %2106 = vmatpush3.bf16.msra.mxu0 %v2249_v30 }
 0x7d3   : > { %2111 = vmatprep.subr.bf16.mxu0 %v2356_v1 }
 0x8a0   : > { %v1078_v22 = vpop.f32.mrb[12].mxu0 }
 0x8a1   : > { %v1079_v23 = vadd.f32 %v1078_v22, %v1028_v21  ;;  %v2081_v24 = vpop.f32.mrb[13].mxu0 }
 0x8a2   : > { %v1081_v25 = vpop.f32.mrb[14].mxu0 }
 0x8a3   : > { %v1084_v26 = vmax.f32 %v1079_v23, 0.0  ;;  %v2082_v27 = vpop.f32.mrb[15].mxu0 }
 0x8a5   : > { %v1101_v28 = vpack.c.bf16 %v1084_v26, %v1084_v26 }
 0x8a7   : > { %2100 = vmatmul.mubr.bf16.vlgmr.msra.gmra.mrb[28].mxu1 %v1101_v28 }
 0x8a8   : > { %2139 = vmatprep.mubr.msk.bf16.mxu1 %vm2357_vm0, %v2356_v1  ;;  %2136 = vmatpush3.bf16.msra.mxu1 %v2256_v58  ;;  %v2264_v58 = vld [vmem:[%s2869_s8 + $0x10] sm:$0xff]  }
 0x8a9   : > { %2137 = vmatprep.subr.bf16.mxu1 %v2356_v1 }
 0x97a   : > { %v1184_v33 = vpop.f32.mrb[28].mxu1 }
 0x97b   : > { %v1190_v34 = vadd.f32 %v1184_v33, %v2607_v59  ;;  %v2101_v35 = vpop.f32.mrb[29].mxu1  ;;  %v2258_v59 = vld [vmem:[%s2867_s6 + $0x8] sm:$0xff]  }
 0x97c   : > { %v1187_v36 = vpop.f32.mrb[30].mxu1  ;;  %2138 = vmatpush3.bf16.msra.mxu1 %v2258_v59  ;;  %v2265_v59 = vld [vmem:[%s2869_s8 + $0x18] sm:$0xff]  }
 0x97d   : > { %v2677_v38 = vadd.f32 %v1194_v32, %v1190_v34  ;;  %v2102_v39 = vpop.f32.mrb[31].mxu1  ;;  %2151 = vmatprep.subr.bf16.mxu1 %v2356_v1  ;;  %v1592_v32 = vsub.s32 3, %v2597_v52 }
 0x97f   : > { %v1208_v41 = vpack.c.bf16 %v2677_v38, %v2677_v38  ;;  %v1593_v39 = vrot.slane %v2603_v37, %v1592_v32  ;;  %v1805_v32 = vsub.s32 6, %v2597_v52 }
 0x981   : > { %v1210_v42 = vshrl.u32 %v1208_v41, 16  ;;  %2108 = vmatmul.mubr.msk.bf16.vlgmr.msra.gmra.mrb[16].mxu0 %vm437_vm1, %v1208_v41  ;;  %v1213_v44 = vshll.u32 %v1208_v41, 16 }
 0x982   : > { %2112 = vmatpush3.bf16.msra.mxu0 %v2250_v40  ;;  %2115 = vmatprep.mubr.msk.bf16.mxu0 %vm2357_vm0, %v2356_v1 }
 0x983   : > { %2113 = vmatprep.subr.bf16.mxu0 %v2356_v1  ;;  %v1212_v45 = vrot.slane %v1210_v42, 7  ;;  %v1221_v50 = vrot.slane %v1213_v44, 1 }
 0x985   : > { %v1215_v47 = vor.u32 %v1213_v44, %v1212_v45  ;;  %v1222_v53 = vor.u32 %v1221_v50, %v1210_v42 }
 0x986   : > { %2114 = vmatpush3.bf16.msra.mxu0 %v2251_v43 }
 0x987   : > { %v1220_v49 = vsel %vm2691_vm8, 0, %v1215_v47  ;;  %2119 = vmatprep.subr.bf16.mxu0 %v2356_v1  ;;  %v1227_v55 = vsel %vm2709_vm10, %v1222_v53, 0 }
 0x989   : > { %2116 = vmatmul.mubr.msk.bf16.vlgmr.msra.gmra.mrb[20].mxu0 %vm437_vm1, %v1220_v49 }
 0x98a   : > { %2120 = vmatpush3.bf16.msra.mxu0 %v2252_v48  ;;  %2123 = vmatprep.mubr.msk.bf16.mxu0 %vm2357_vm0, %v2356_v1 }
 0x98b   : > { %2121 = vmatprep.subr.bf16.mxu0 %v2356_v1 }
 0x98e   : > { %2122 = vmatpush3.bf16.msra.mxu0 %v2253_v51 }
 0x98f   : > { %2127 = vmatprep.subr.bf16.mxu0 %v2356_v1 }
 0x991   : > { %2124 = vmatmul.mubr.msk.bf16.vlgmr.msra.gmra.mrb[24].mxu0 %vm437_vm1, %v1227_v55  ;;  %v2260_v55 = vld [vmem:[%s2868_s7] sm:$0xff]  }
 0x992   : > { %2131 = vmatprep.mubr.msk.bf16.mxu0 %vm2357_vm0, %v2356_v1  ;;  %2128 = vmatpush3.bf16.msra.mxu0 %v2254_v56  ;;  %v2261_v56 = vld [vmem:[%s2868_s7 + $0x8] sm:$0xff]  }
 0x993   : > { %2129 = vmatprep.subr.bf16.mxu0 %v2356_v1 }
 0x996   : > { %2130 = vmatpush3.bf16.msra.mxu0 %v2255_v57  ;;  %v2263_v57 = vld [vmem:[%s2869_s8 + $0x8] sm:$0xff]  }
 0x997   : > { %2143 = vmatprep.subr.bf16.mxu0 %v2356_v1 }
 0xa54   : > { %v1276_v60 = vpop.f32.mrb[16].mxu0 }
 0xa55   : > { %v2109_v61 = vpop.f32.mrb[17].mxu0 }
 0xa56   : > { %v1279_v62 = vpop.f32.mrb[18].mxu0  ;;  %v2267_v61 = vld [vmem:[%s2869_s8 + $0x28] sm:$0xff]  }
 0xa57   : > { %v2110_v63 = vpop.f32.mrb[19].mxu0 }
 0xa5c   : > { %v1331_v0 = vpop.f32.mrb[20].mxu0 }
 0xa5d   : > { %v1332_v2 = vadd.f32 %v1331_v0, %v1276_v60  ;;  %v2117_v4 = vpop.f32.mrb[21].mxu0  ;;  %v2266_v60 = vld [vmem:[%s2869_s8 + $0x20] sm:$0xff]  }
 0xa5e   : > { %v1334_v3 = vpop.f32.mrb[22].mxu0 }
 0xa5f   : > { %v2118_v5 = vpop.f32.mrb[23].mxu0 }
 0xa60   : > { %v2268_v5 = vld [vmem:[%s2869_s8 + $0x30] sm:$0xff]  }
 0xa64   : > { %v1386_v8 = vpop.f32.mrb[24].mxu0 }
 0xa65   : > { %v1392_v9 = vadd.f32 %v1386_v8, %v1332_v2  ;;  %v2125_v10 = vpop.f32.mrb[25].mxu0 }
 0xa66   : > { %v1389_v11 = vpop.f32.mrb[26].mxu0 }
 0xa67   : > { %v1397_v12 = vadd.f32 %v1396_v7, %v1392_v9  ;;  %v2126_v13 = vpop.f32.mrb[27].mxu0  ;;  %v1617_v7 = vrot.slane %v2659_v20, %v1193_v31 }
 0xa69   : > { %v1398_v14 = vmax.f32 %v1397_v12, 0.0 }
 0xa6b   : > { %v1411_v16 = vpack.c.bf16 %v1398_v14, %v1398_v14 }
 0xa6d   : > { %v1413_v17 = vshrl.u32 %v1411_v16, 16  ;;  %v1416_v18 = vshll.u32 %v1411_v16, 16  ;;  %2132 = vmatmul.mubr.msk.bf16.vlgmr.msra.gmra.mrb[28].mxu0 %vm437_vm1, %v1411_v16 }
 0xa6e   : > { %2144 = vmatpush3.bf16.msra.mxu0 %v2257_v15  ;;  %2147 = vmatprep.mubr.msk.bf16.mxu0 %vm2357_vm0, %v2356_v1  ;;  %v1782_v15 = vsub.s32 4, %v2597_v52 }
 0xa6f   : > { %2145 = vmatprep.subr.bf16.mxu0 %v2356_v1  ;;  %v1415_v21 = vrot.slane %v1413_v17, 7  ;;  %v1421_v22 = vrot.slane %v1416_v18, 1 }
 0xa71   : > { %v1418_v23 = vor.u32 %v1416_v18, %v1415_v21  ;;  %v1422_v24 = vor.u32 %v1421_v22, %v1413_v17 }
 0xa72   : > { %2146 = vmatpush3.bf16.msra.mxu0 %v2259_v19 }
 0xa73   : > { %v1420_v25 = vsel %vm2691_vm8, 0, %v1418_v23  ;;  %v1424_v26 = vsel %vm2709_vm10, %v1422_v24, 0  ;;  %2159 = vmatprep.subr.bf16.mxu0 %v2356_v1 }
 0xa74   : > { %2140 = vmatmul.mubr.msk.bf16.vlgmr.msra.gmra.mrb[32].mxu1 %vm437_vm1, %v1420_v25 }
 0xa75   : > { %2148 = vmatmul.mubr.msk.bf16.vlgmr.msra.gmra.mrb[32].mxu0 %vm437_vm1, %v1424_v26  ;;  %2155 = vmatprep.mubr.msk.bf16.mxu1 %vm2357_vm0, %v2356_v1 }
 0xa76   : > { %2175 = vmatprep.mubr.msk.bf16.mxu0 %vm2357_vm0, %v2356_v1  ;;  %2152 = vmatpush3.bf16.msra.mxu1 %v2260_v55 }
 0xa77   : > { %2153 = vmatprep.subr.bf16.mxu1 %v2356_v1 }
 0xa7a   : > { %2154 = vmatpush3.bf16.msra.mxu1 %v2261_v56 }
 0xb40   : > { %v1473_v27 = vpop.f32.mrb[28].mxu0 }
 0xb41   : > { %v2133_v28 = vpop.f32.mrb[29].mxu0 }
 0xb42   : > { %v1476_v29 = vpop.f32.mrb[30].mxu0 }
 0xb43   : > { %v2134_v30 = vpop.f32.mrb[31].mxu0 }
 0xb44   : > { %v1800_v30 = vsub.s32 5, %v2597_v52 }
 0xb47   : > { %v1528_v33 = vpop.f32.mrb[32].mxu1 }
 0xb48   : > { %v1529_v34 = vadd.f32 %v1528_v33, %v1473_v27  ;;  %v2141_v35 = vpop.f32.mrb[33].mxu1  ;;  %v1583_v36 = vpop.f32.mrb[32].mxu0  ;;  %v1801_v33 = vrot.slane %v2603_v37, %v1800_v30 }
 0xb49   : > { %v1531_v40 = vpop.f32.mrb[34].mxu1  ;;  %v2149_v41 = vpop.f32.mrb[33].mxu0 }
 0xb4a   : > { %v1589_v42 = vadd.f32 %v1583_v36, %v1529_v34  ;;  %v2142_v43 = vpop.f32.mrb[35].mxu1  ;;  %v1586_v44 = vpop.f32.mrb[34].mxu0  ;;  %v1806_v36 = vrot.slane %v2603_v37, %v1805_v32 }
 0xb4b   : > { %v2150_v45 = vpop.f32.mrb[35].mxu0 }
 0xb4c   : > { %v1594_v46 = vadd.f32 %v1593_v39, %v1589_v42 }
 0xb4e   : > { %v1595_v47 = vadd.f32 %v1594_v46, %v2677_v38  ;;  %v2262_v38 = vld [vmem:[%s2869_s8] sm:$0xff]  }
 0xb4f   : > { %2160 = vmatpush3.bf16.msra.mxu0 %v2262_v38 }
 0xb50   : > { %v1596_v48 = vsel %vm437_vm1, %v1595_v47, 0.0  ;;  %2161 = vmatprep.subr.bf16.mxu0 %v2356_v1 }
 0xb51   : > { %1597 = vadd.xlane.f32.xlu0 %v1596_v48 }
 0xb53   : > { %2162 = vmatpush3.bf16.msra.mxu0 %v2263_v57 }
 0xb54   : > { %2163 = vmatprep.subr.bf16.mxu0 %v2356_v1 }
 0xb57   : > { %2164 = vmatpush3.bf16.msra.mxu0 %v2264_v58 }
 0xb58   : > { %2165 = vmatprep.subr.bf16.mxu0 %v2356_v1 }
 0xb5b   : > { %2166 = vmatpush3.bf16.msra.mxu0 %v2265_v59 }
 0xb5c   : > { %2167 = vmatprep.subr.bf16.mxu0 %v2356_v1 }
 0xb5f   : > { %2168 = vmatpush3.bf16.msra.mxu0 %v2266_v60 }
 0xb60   : > { %2169 = vmatprep.subr.bf16.mxu0 %v2356_v1 }
 0xb63   : > { %2170 = vmatpush3.bf16.msra.mxu0 %v2267_v61 }
 0xb64   : > { %2171 = vmatprep.subr.bf16.mxu0 %v2356_v1 }
 0xb67   : > { %2172 = vmatpush3.bf16.msra.mxu0 %v2268_v5 }
 0xb68   : > { %2173 = vmatprep.subr.bf16.mxu0 %v2356_v1  ;;  %v1783_v1 = vrot.slane %v2603_v37, %v1782_v15 }
 0xb6b   : > { %2174 = vmatpush3.bf16.msra.mxu0 %v2269_v6 }
 0xbde   : > { %v1598_v49 = vpop.xlane.xlu0 %1597 }
 0xbdf   : > { %v1599_v50 = vmul.f32 0.03125, %v1598_v49 }
 0xbe1   : > { %v1600_v51 = vsub.f32 %v1595_v47, %v1599_v50 }
 0xbe3   : > { %v1601_v53 = vmul.f32 %v1600_v51, %v1600_v51 }
 0xbe5   : > { %v1602_v54 = vsel %vm437_vm1, %v1601_v53, 0.0 }
 0xbe6   : > { %1603 = vadd.xlane.f32.xlu0 %v1602_v54 }
 0xc73   : > { %v1604_v62 = vpop.xlane.xlu0 %1603 }
 0xc74   : > { %v1605_v63 = vmul.f32 0.03125, %v1604_v62 }
 0xc76   : > { %v1606_v0 = vadd.f32 1e-05, %v1605_v63 }
 0xc78   : > { %2288 = vrsqrt.f32 %v1606_v0 }
 0xc82   : > { %v2289_v2 = vpop.eup %2288 }
 0xc83   : > { %v1608_v4 = vmul.f32 %v2289_v2, %v1600_v51 }
 0xc85   : > { %v1613_v3 = vpack.c.bf16 %v1608_v4, %v1608_v4 }
 0xc87   : > { %2156 = vmatmul.mubr.msk.bf16.vlgmr.msra.gmra.mrb[36].mxu1 %vm437_vm1, %v1613_v3 }
 0xd5a   : > { %v1667_v8 = vpop.f32.mrb[36].mxu1 }
 0xd5b   : > { %v1668_v9 = vadd.f32 %v1667_v8, %v1617_v7  ;;  %v2157_v10 = vpop.f32.mrb[37].mxu1 }
 0xd5c   : > { %v1670_v11 = vpop.f32.mrb[38].mxu1 }
 0xd5d   : > { %v1673_v12 = vmax.f32 %v1668_v9, 0.0  ;;  %v2158_v13 = vpop.f32.mrb[39].mxu1 }
 0xd5f   : > { %v1690_v14 = vpack.c.bf16 %v1673_v12, %v1673_v12 }
 0xd61   : > { %2176 = vmatmul.mubr.bf16.vlgmr.msra.gmra.mrb[36].mxu0 %v1690_v14 }
 0xe34   : > { %v1773_v16 = vpop.f32.mrb[36].mxu0 }
 0xe35   : > { %v1779_v17 = vadd.f32 %v1773_v16, %v1595_v47  ;;  %v2177_v18 = vpop.f32.mrb[37].mxu0 }
 0xe36   : > { %v1776_v19 = vpop.f32.mrb[38].mxu0 }
 0xe37   : > { %v2178_v21 = vpop.f32.mrb[39].mxu0  ;;  %v1784_v22 = vadd.f32 %v1783_v1, %v1779_v17 }
 0xe39   : > { %v1785_v20 = vsel %vm437_vm1, %v1784_v22, 0.0 }
 0xe3a   : > { %1786 = vadd.xlane.f32.xlu1 %v1785_v20 }
 0xec7   : > { %v1787_v31 = vpop.xlane.xlu1 %1786 }
 0xec8   : > { %v1788_v23 = vmul.f32 0.03125, %v1787_v31 }
 0xeca   : > { %v1789_v24 = vsub.f32 %v1784_v22, %v1788_v23 }
 0xecc   : > { %v1790_v25 = vmul.f32 %v1789_v24, %v1789_v24 }
 0xece   : > { %v1791_v26 = vsel %vm437_vm1, %v1790_v25, 0.0 }
 0xecf   : > { %1792 = vadd.xlane.f32.xlu0 %v1791_v26 }
 0xf5c   : > { %v1793_v27 = vpop.xlane.xlu0 %1792 }
 0xf5d   : > { %v1794_v28 = vmul.f32 0.03125, %v1793_v27 }
 0xf5f   : > { %v1795_v29 = vadd.f32 1e-05, %v1794_v28 }
 0xf61   : > { %2290 = vrsqrt.f32 %v1795_v29 }
 0xf6b   : > { %v2291_v34 = vpop.eup %2290 }
 0xf6c   : > { %v1797_v35 = vmul.f32 %v2291_v34, %v1789_v24 }
 0xf6e   : > { %v1802_v39 = vmul.f32 %v1801_v33, %v1797_v35 }
 0xf70   : > { %v1807_v40 = vadd.f32 %v1806_v36, %v1802_v39 }
 0xf72   : > { %1808 = vst.msk [vmem:[%s404_s16] sm:$0xff] %vm437_vm1, %v1807_v40 }
 0xf73   : > { %2305 = shalt.err (!%p2302_p3)
}
 0xf74   : > { %s2306_s28 = scalar_lea.hbm %s2818_s20, 128  ;;  %s2310_s18 = scalar_lea.hbm %s2873_s12, 256 }
 0xf75   : > { %p2307_p4 = scmp.ne.s32.totalorder %s2818_s20, %s2306_s28  ;;  %p2311_p9 = scmp.lt.u32.totalorder %s2818_s20, %s2873_s12 }
 0xf76   : > { %p2312_p10 = scmp.lt.u32.totalorder %s2310_s18, %s2306_s28  ;;  %p2314_p12 = scmp.lt.u32.totalorder %s2306_s28, %s2818_s20 }
 0xf77   : > { %p2308_p7 = pnand %p2307_p4, %p2476_p5 }
 0xf78   : > { %p2313_p11 = por %p2312_p10, %p2311_p9 }
 0xf79   : > { %p2309_p8 = pneg %p2308_p7 }
 0xf7a   : > { %p2315_p13 = por %p2314_p12, %p2313_p11 }
 0xf7c   : > { %p2316_p0 = pnand %p2315_p13, %p2309_p8 }
 0xf7e   : > { %2319 = shalt.err (!%p2316_p0)
}
 0xf7f   : > { %2179 = dma.vmem_to_hbm [thread:$0]  (%p2476_p5), %s2820_s17, 128, %s2818_s20, %s1810_s26  }
 0xf80 PF: > { %p2185_p1 = scmp.ge.s32.totalorder %s2354_s24, 2  ;;  %s1835_s0 = sand.u32 1, %s2342_s21  }
 0xf81   : > { %s1836_s1 = scalar_lea.sflag [#allocation3], %s1835_s0 }
 0xf82   : > { %p2182_p2 = pnand %p2185_p1, %p2480_p6 }
 0xf84   : > { %2337 = dma.done.wait (!%p2182_p2), %s1836_s1, 128  }
 0xf85   : > { %2339 = vsyncadd (!%p2182_p2), %s1836_s1, 4294967168  ;;  %p22_p3 = scmp.ge.s32.totalorder %s2463_s27, 4   ;;  %s2884_s21 = smov %s2346_s22 }
 0xf86   : > { %s2885_s22 = smov %s2350_s23  ;;  %s2886_s23 = smov %s2474_s30 }
 0xf87   : > { %s2887_s24 = smov %s2463_s27  ;;  %24 = sbr.rel (!%p22_p3) target bundleno = 6 (0x6), region = 103 }
 0xf8e   :  { %1841 = vsyncpa [#allocation3], 1 }
 0xf8f   :  { %1843 = vsyncpa [#allocation3 + $0x1], 1 }

// kernel: tpu_custom_call.1
= control target key start
LH: loop header
LB: loop body
LE: loop exit
PB: predicated region body
PF: predicated region fallthrough
CT: control target
= control target key end

     0   :  { %s2861_s0 = inlined_call_operand.vmem [shape: f32[2,8,32], index: 0, kind: input, shape index: {}]   ;;  %s2862_s1 = inlined_call_operand.vmem [shape: bf16[32,96], index: 1, kind: input, shape index: {}]   ;;  %s2863_s2 = inlined_call_operand.vmem [shape: bf16[32,32], index: 2, kind: input, shape index: {}]   ;;  %s2864_s3 = inlined_call_operand.vmem [shape: bf16[32,128], index: 3, kind: input, shape index: {}]   ;;  %s2865_s4 = inlined_call_operand.vmem [shape: bf16[128,32], index: 4, kind: input, shape index: {}]   ;;  %s2866_s5 = inlined_call_operand.vmem [shape: bf16[96,32], index: 5, kind: input, shape index: {}]   ;;  %s2867_s6 = inlined_call_operand.vmem [shape: bf16[96,32], index: 6, kind: input, shape index: {}]   ;;  %s2868_s7 = inlined_call_operand.vmem [shape: bf16[32,128], index: 7, kind: input, shape index: {}]   ;;  %s2869_s8 = inlined_call_operand.vmem [shape: bf16[128,32], index: 8, kind: input, shape index: {}]   ;;  %s2870_s9 = inlined_call_operand.vmem [shape: f32[1,96], index: 9, kind: input, shape index: {}]   ;;  %s2871_s10 = inlined_call_operand.vmem [shape: f32[2,128], index: 10, kind: input, shape index: {}]   ;;  %s2872_s11 = inlined_call_operand.vmem [shape: f32[7,32], index: 11, kind: input, shape index: {}]   ;;  %s2873_s12 = inlined_call_operand.hbm [shape: f32[2,8,32], index: 12, kind: output, shape index: {}]  }
   0x1   :  { %2874 = sst [smem:[#allocation5_spill]] %s2861_s0 }
   0x2   :  { %2875 = sst [smem:[#allocation6_spill]] %s2862_s1 }
   0x3   :  { %17 = vsyncpa [#allocation3], 0 }
   0x4   :  { %19 = vsyncpa [#allocation3 + $0x1], 0  ;;  %s2438_s21 = smov 0   ;;  %s2440_s22 = smov 0  }
   0x5   :  { %s2442_s23 = smov 0   ;;  %s2444_s24 = smov 0  }
   0x6 LB: > { %s2459_s25 = sadd.s32 4294967295, %s2354_s24   ;;  %s1882_s26 = sadd.s32 4294967294, %s2354_s24   ;;  %s2354_s24 = sphi %s2444_s24, %s2887_s24   ;;  %s2350_s23 = sphi %s2442_s23, %s2886_s23   ;;  %s2346_s22 = sphi %s2440_s22, %s2885_s22   ;;  %s2342_s21 = sphi %s2438_s21, %s2884_s21  }
   0x7   : > { %s2463_s27 = sadd.s32 1, %s2354_s24   ;;  %s289_s28 = sadd.s32 1, %s2350_s23 }
   0x8   : > { %s286_s29 = ssub.s32 %s2354_s24, %s2463_s27  ;;  %p299_p0 = scmp.ne.s32.totalorder %s2350_s23, %s2346_s22 }
   0x9   : > { %p287_p1 = scmp.eq.s32.totalorder %s286_s29, 0  ;;  %p300_p2 = scmp.eq.s32.totalorder %s2459_s25, 1 }
   0xa   : > { %p305_p3 = scmp.ne.s32.totalorder %s2346_s22, %s2342_s21  ;;  %p306_p4 = scmp.eq.s32.totalorder %s1882_s26, 1 }
   0xb   : > { %s2474_s30 = scalar_select %p287_p1, %s2350_s23, %s289_s28  }
   0xc   : > { %p2476_p5 = por %p300_p2, %p299_p0  ;;  %p2480_p6 = por %p306_p4, %p305_p3 }
   0xd   : > { %p1885_p7 = scmp.ge.s32.totalorder %s2354_s24, 1  ;;  %p364_p8 = scmp.lt.s32.totalorder %s2354_s24, 3 }
   0xf   : > { %p365_p9 = pnand %p1885_p7, %p364_p8 }
  0x10   : > { %s2878_s1 = sld [smem:[#allocation6_spill]] (!%p365_p9)  ;;  %v2356_v1 = vmov (!%p365_p9), 0.0   ;;  %vm2357_vm0 = vmmov (!%p365_p9), 0   ;;  %p405_p10 = scmp.lt.s32.totalorder (!%p365_p9), %s2459_s25, 1  ;;  %vm437_vm1 = vcmask (!%p365_p9), 261120   ;;  %vm485_vm2 = vcmask (!%p365_p9), 64512  }
  0x11   : > { %368 = sbr.rel (%p365_p9) target bundleno = 3968 (0xf80), region = 68  ;;  %2011 = vmatprep.subr.bf16.mxu1 (!%p365_p9), %v2356_v1  ;;  %2037 = vmatprep.subr.bf16.mxu0 (!%p365_p9), %v2356_v1  ;;  %s2879_s0 = sld [smem:[#allocation5_spill]] (!%p365_p9)  ;;  %v1888_v5 = vld [vmem:[%s2870_s9] ss:$0 sm:$0xff] (!%p365_p9)  ;;  %vm548_vm3 = vcmask (!%p365_p9), 1043456   ;;  %vm936_vm4 = vcmask (!%p365_p9), 130048  }
  0x12   : > { %2015 = vmatprep.mubr.msk.bf16.mxu1 (!%p365_p9), %vm2357_vm0, %v2356_v1  ;;  %2039 = vmatprep.mubr.msk.bf16.mxu0 (!%p365_p9), %vm2357_vm0, %v2356_v1  ;;  %s2358_s17 = smov (!%p365_p9), 64   ;;  %s2359_s18 = smov (!%p365_p9), 96   ;;  %vm938_vm5 = vcmask (!%p365_p9), 195584   ;;  %vm1217_vm6 = vcmask (!%p365_p9), 1040384   ;;  %vm1218_vm7 = vsmask.f32 (!%p365_p9), 256 }
  0x13   : > { %s2362_s26 = smov (!%p365_p9), 80   ;;  %s2363_s28 = smov (!%p365_p9), 112   ;;  %vm2691_vm8 = vmand (!%p365_p9), %vm1217_vm6, %vm1218_vm7  ;;  %vm1225_vm9 = vsmask.f32 (!%p365_p9), 3328 }
  0x14   : > { %s2365_s15 = smov (!%p365_p9), 104   ;;  %s2366_s16 = smov (!%p365_p9), 56   ;;  %vm2709_vm10 = vmand (!%p365_p9), %vm548_vm3, %vm1225_vm9 }
  0x16   : > { %v2234_v0 = vld [vmem:[%s2878_s1] sm:$0xff] (!%p365_p9)   ;;  %v2235_v2 = vld [vmem:[%s2878_s1 + $0x8] sm:$0xff] (!%p365_p9)  }
  0x17   : > { %2012 = vmatpush3.bf16.msra.mxu1 (!%p365_p9), %v2234_v0 }
  0x18   : > { %2013 = vmatprep.subr.bf16.mxu1 %v2356_v1  ;;  %s406_s19 = scalar_select %p405_p10, %s2459_s25, 1 }
  0x1a   : > { %s1887_s20 = sshll.u32 %s406_s19, 3  ;;  %s2360_s19 = smov 88  }
  0x1b   : > { %2014 = vmatpush3.bf16.msra.mxu1 %v2235_v2  ;;  %s408_s29 = scalar_lea.vmem %s2879_s0, %s1887_s20  ;;  %s2361_s20 = smov 120  }
  0x1c   : > { %2019 = vmatprep.subr.bf16.mxu1 %v2356_v1  ;;  %v2505_v3 = vld [vmem:[%s408_s29] sm:$0xff]  ;;  %s2364_s29 = smov 72  }
  0x1d   : > { %v418_v4 = vpack.c.bf16 %v2505_v3, %v2505_v3 }
  0x1f   : > { %2016 = vmatmul.mubr.msk.bf16.vlgmr.msra.gmra.mrb[0].mxu1 %vm437_vm1, %v418_v4 }
  0x20   : > { %2021 = vmatprep.mubr.msk.bf16.mxu1 %vm2357_vm0, %v2356_v1 }
  0xf2   : > { %v475_v6 = vpop.f32.mrb[0].mxu1 }
  0xf3   : > { %v476_v7 = vadd.f32 %v1888_v5, %v475_v6  ;;  %v2017_v8 = vpop.f32.mrb[1].mxu1 }
  0xf4   : > { %v478_v9 = vpop.f32.mrb[2].mxu1 }
  0xf5   : > { %v2515_v10 = vpack.c.bf16 %v476_v7, %v476_v7  ;;  %v2018_v11 = vpop.f32.mrb[3].mxu1 }
  0xf7   : > { %543 = vrot.lane.b32.xlu1 %v2515_v10, %s2358_s17  ;;  %483 = vrot.lane.b32.xlu0 %v2515_v10, %s2359_s18  ;;  %s2367_s17 = smov 48   ;;  %s2368_s18 = smov 40  }
  0xfb   : > { %595 = vrot.lane.b32.xlu1 %v2515_v10, %s2360_s19 }
  0xff   : > { %593 = vrot.lane.b32.xlu1 %v2515_v10, %s2361_s20 }
 0x103   : > { %705 = vrot.lane.b32.xlu1 %v2515_v10, %s2362_s26  ;;  %s2369_s26 = smov 8  }
 0x107   : > { %703 = vrot.lane.b32.xlu1 %v2515_v10, %s2363_s28  ;;  %s402_s28 = sand.u32 1, %s2346_s22  }
 0x10b   : > { %815 = vrot.lane.b32.xlu1 %v2515_v10, %s2364_s29  ;;  %s1886_s29 = sshll.u32 %s402_s28, 3 }
 0x10f   : > { %813 = vrot.lane.b32.xlu1 %v2515_v10, %s2365_s15  ;;  %s2370_s15 = smov 16  }
 0x169   : > { %v484_v12 = vpop.permute.xlu0 %483  ;;  %v544_v14 = vpop.permute.xlu1 %543 }
 0x16a   : > { %v490_v13 = vsel %vm485_vm2, %v484_v12, 0  ;;  %v550_v15 = vsel %vm548_vm3, %v544_v14, 0 }
 0x16b   : > { %2020 = vmatpush3.bf16.xpose.msra.mxu1 %v490_v13 }
 0x16c   : > { %2025 = vmatprep.subr.bf16.mxu1 %v2356_v1 }
 0x16d   : > { %v596_v26 = vpop.permute.xlu1 %595 }
 0x16e   : > { %v601_v30 = vsel %vm485_vm2, %v596_v26, 0 }
 0x171   : > { %v594_v27 = vpop.permute.xlu1 %593 }
 0x172   : > { %2022 = vmatmul.mubr.msk.bf16.vlgmr.msra.gmra.mrb[4].mxu1 %vm485_vm2, %v2515_v10 }
 0x173   : > { %2026 = vmatpush3.bf16.msra.mxu1 %v550_v15  ;;  %2027 = vmatprep.mubr.msk.bf16.mxu1 %vm2357_vm0, %v2356_v1 }
 0x174   : > { %2031 = vmatprep.subr.bf16.mxu1 %v2356_v1 }
 0x175   : > { %v706_v31 = vpop.permute.xlu1 %705 }
 0x176   : > { %v711_v33 = vsel %vm485_vm2, %v706_v31, 0 }
 0x179   : > { %v704_v32 = vpop.permute.xlu1 %703 }
 0x17d   : > { %v816_v34 = vpop.permute.xlu1 %815 }
 0x17e   : > { %v821_v35 = vsel %vm485_vm2, %v816_v34, 0 }
 0x181   : > { %v814_v36 = vpop.permute.xlu1 %813 }
 0x245   : > { %v526_v16 = vpop.f32.mrb[4].mxu1 }
 0x246   : > { %v2023_v17 = vpop.f32.mrb[5].mxu1  ;;  %v532_v18 = vsel %vm485_vm2, %v526_v16, -inf }
 0x247   : > { %533 = vmax.xlane.f32.xlu0 %v532_v18  ;;  %v529_v19 = vpop.f32.mrb[6].mxu1 }
 0x248   : > { %v2024_v20 = vpop.f32.mrb[7].mxu1  ;;  %v2236_v19 = vld [vmem:[%s2863_s2] sm:$0xff]  }
 0x25d   : > { %654 = vrot.lane.b32.xlu0 %v2515_v10, %s2366_s16  ;;  %s2371_s16 = smov 24  }
 0x2d4   : > { %v534_v21 = vpop.xlane.xlu0 %533 }
 0x2d5   : > { %v535_v22 = vsub.f32 %v526_v16, %v534_v21 }
 0x2d7   : > { %v536_v23 = vmul.f32 1.442695, %v535_v22 }
 0x2d8   : > { %v655_v24 = vpop.permute.xlu0 %654 }
 0x2d9   : > { %2270 = vpow2.f32 %v536_v23  ;;  %v660_v25 = vsel %vm548_vm3, %v655_v24, 0 }
 0x2da   : > { %2038 = vmatpush3.bf16.msra.mxu0 %v660_v25 }
 0x2db   : > { %2049 = vmatprep.subr.bf16.mxu0 %v2356_v1 }
 0x2e3   : > { %v2537_v28 = vpop.eup %2270 }
 0x2e4   : > { %v542_v29 = vpack.c.bf16 %v2537_v28, %v2537_v28  ;;  %v538_v16 = vsel %vm485_vm2, %v2537_v28, 0.0 }
 0x2e6   : > { %2028 = vmatmul.mubr.msk.bf16.vlgmr.msra.gmra.mrb[8].mxu1 %vm485_vm2, %v542_v29 }
 0x2e7   : > { %2032 = vmatpush3.bf16.xpose.msra.mxu1 %v601_v30  ;;  %2033 = vmatprep.mubr.msk.bf16.mxu1 %vm2357_vm0, %v2356_v1 }
 0x2e8   : > { %2043 = vmatprep.subr.bf16.mxu1 %v2356_v1 }
 0x2ee   : > { %2034 = vmatmul.mubr.msk.bf16.vlgmr.msra.gmra.mrb[12].mxu1 %vm485_vm2, %v594_v27  ;;  %v2237_v27 = vld [vmem:[%s2863_s2 + $0x8] sm:$0xff]  }
 0x2ef   : > { %2044 = vmatpush3.bf16.xpose.msra.mxu1 %v711_v33  ;;  %2045 = vmatprep.mubr.msk.bf16.mxu1 %vm2357_vm0, %v2356_v1 }
 0x2f0   : > { %2055 = vmatprep.subr.bf16.mxu1 %v2356_v1 }
 0x2f6   : > { %2046 = vmatmul.mubr.msk.bf16.vlgmr.msra.gmra.mrb[16].mxu1 %vm485_vm2, %v704_v32 }
 0x2f7   : > { %2056 = vmatpush3.bf16.xpose.msra.mxu1 %v821_v35  ;;  %2057 = vmatprep.mubr.msk.bf16.mxu1 %vm2357_vm0, %v2356_v1 }
 0x2f8   : > { %2067 = vmatprep.subr.bf16.mxu1 %v2356_v1 }
 0x2fe   : > { %2058 = vmatmul.mubr.msk.bf16.vlgmr.msra.gmra.mrb[20].mxu1 %vm485_vm2, %v814_v36 }
 0x2ff   : > { %2071 = vmatprep.mubr.msk.bf16.mxu1 %vm2357_vm0, %v2356_v1  ;;  %2068 = vmatpush3.bf16.msra.mxu1 %v2236_v19  ;;  %v2247_v19 = vld [vmem:[%s2865_s4 + $0x38] sm:$0xff]  }
 0x300   : > { %2069 = vmatprep.subr.bf16.mxu1 %v2356_v1 }
 0x303   : > { %2070 = vmatpush3.bf16.msra.mxu1 %v2237_v27 }
 0x304   : > { %2083 = vmatprep.subr.bf16.mxu1 %v2356_v1 }
 0x3b9   : > { %v2559_v37 = vpop.f32.mrb[8].mxu1 }
 0x3ba   : > { %v2029_v38 = vpop.f32.mrb[9].mxu1 }
 0x3bb   : > { %v589_v39 = vpop.f32.mrb[10].mxu1 }
 0x3bc   : > { %v2030_v40 = vpop.f32.mrb[11].mxu1 }
 0x3c1   : > { %v637_v41 = vpop.f32.mrb[12].mxu1 }
 0x3c2   : > { %v2035_v42 = vpop.f32.mrb[13].mxu1  ;;  %v643_v43 = vsel %vm485_vm2, %v637_v41, -inf }
 0x3c3   : > { %644 = vmax.xlane.f32.xlu1 %v643_v43  ;;  %v640_v44 = vpop.f32.mrb[14].mxu1 }
 0x3c4   : > { %v2036_v45 = vpop.f32.mrb[15].mxu1 }
 0x3c9   : > { %v747_v46 = vpop.f32.mrb[16].mxu1 }
 0x3ca   : > { %v2047_v47 = vpop.f32.mrb[17].mxu1  ;;  %v753_v48 = vsel %vm485_vm2, %v747_v46, -inf }
 0x3cb   : > { %754 = vmax.xlane.f32.xlu0 %v753_v48  ;;  %v750_v49 = vpop.f32.mrb[18].mxu1 }
 0x3cc   : > { %v2048_v50 = vpop.f32.mrb[19].mxu1 }
 0x3d1   : > { %v857_v51 = vpop.f32.mrb[20].mxu1 }
 0x3d2   : > { %v2059_v52 = vpop.f32.mrb[21].mxu1  ;;  %v863_v53 = vsel %vm485_vm2, %v857_v51, -inf }
 0x3d3   : > { %864 = vmax.xlane.f32.xlu0 %v863_v53  ;;  %v860_v54 = vpop.f32.mrb[22].mxu1 }
 0x3d4   : > { %764 = vrot.lane.b32.xlu1 %v2515_v10, %s2367_s17  ;;  %v2060_v55 = vpop.f32.mrb[23].mxu1 }
 0x3e9   : > { %874 = vrot.lane.b32.xlu0 %v2515_v10, %s2368_s18 }
 0x450   : > { %v645_v56 = vpop.xlane.xlu1 %644 }
 0x451   : > { %v646_v57 = vsub.f32 %v637_v41, %v645_v56 }
 0x453   : > { %v647_v58 = vmul.f32 1.442695, %v646_v57 }
 0x454   : > { %v765_v63 = vpop.permute.xlu1 %764 }
 0x455   : > { %2272 = vpow2.f32 %v647_v58  ;;  %v770_v6 = vsel %vm548_vm3, %v765_v63, 0 }
 0x458   : > { %v755_v59 = vpop.xlane.xlu0 %754 }
 0x459   : > { %v756_v60 = vsub.f32 %v747_v46, %v755_v59 }
 0x45b   : > { %v757_v61 = vmul.f32 1.442695, %v756_v60 }
 0x45d   : > { %2274 = vpow2.f32 %v757_v61 }
 0x45f   : > { %v2273_v62 = vpop.eup %2272 }
 0x460   : > { %v865_v0 = vpop.xlane.xlu0 %864  ;;  %v649_v2 = vsel %vm485_vm2, %v2273_v62, 0.0  ;;  %v653_v4 = vpack.c.bf16 %v2273_v62, %v2273_v62 }
 0x461   : > { %v866_v5 = vsub.f32 %v857_v51, %v865_v0  ;;  %650 = vadd.xlane.f32.xlu0 %v649_v2  ;;  %v1001_v51 = vlaneseq }
 0x462   : > { %2040 = vmatmul.mubr.msk.bf16.vlgmr.msra.gmra.mrb[0].mxu0 %vm485_vm2, %v653_v4 }
 0x463   : > { %v867_v7 = vmul.f32 1.442695, %v866_v5  ;;  %2050 = vmatpush3.bf16.msra.mxu0 %v770_v6  ;;  %2051 = vmatprep.mubr.msk.bf16.mxu0 %vm2357_vm0, %v2356_v1  ;;  %v2597_v52 = vshrl.u32 %v1001_v51, 7  ;;  %v2239_v5 = vld [vmem:[%s2864_s3 + $0x8] sm:$0xff]   ;;  %v2240_v6 = vld [vmem:[%s2865_s4] sm:$0xff]  }
 0x464   : > { %2061 = vmatprep.subr.bf16.mxu0 %v2356_v1  ;;  %v875_v9 = vpop.permute.xlu0 %874  ;;  %v2253_v51 = vld [vmem:[%s2866_s5 + $0x28] sm:$0xff]  }
 0x465   : > { %2276 = vpow2.f32 %v867_v7  ;;  %v880_v12 = vsel %vm548_vm3, %v875_v9, 0  ;;  %v1003_v53 = vsub.s32 0, %v2597_v52  ;;  %v2241_v7 = vld [vmem:[%s2865_s4 + $0x8] sm:$0xff]   ;;  %v2243_v9 = vld [vmem:[%s2865_s4 + $0x18] sm:$0xff]  }
 0x467   : > { %v2275_v8 = vpop.eup %2274 }
 0x468   : > { %v759_v10 = vsel %vm485_vm2, %v2275_v8, 0.0  ;;  %v763_v11 = vpack.c.bf16 %v2275_v8, %v2275_v8  ;;  %v2242_v8 = vld [vmem:[%s2865_s4 + $0x10] sm:$0xff]  }
 0x469   : > { %760 = vadd.xlane.f32.xlu1 %v759_v10  ;;  %v2244_v10 = vld [vmem:[%s2865_s4 + $0x20] sm:$0xff]  }
 0x46a   : > { %2052 = vmatmul.mubr.msk.bf16.vlgmr.msra.gmra.mrb[4].mxu0 %vm485_vm2, %v763_v11  ;;  %v2245_v11 = vld [vmem:[%s2865_s4 + $0x28] sm:$0xff]  }
 0x46b   : > { %2062 = vmatpush3.bf16.msra.mxu0 %v880_v12  ;;  %2063 = vmatprep.mubr.msk.bf16.mxu0 %vm2357_vm0, %v2356_v1 }
 0x46c   : > { %2075 = vmatprep.subr.bf16.mxu0 %v2356_v1 }
 0x46f   : > { %v2277_v13 = vpop.eup %2276 }
 0x470   : > { %v869_v14 = vsel %vm485_vm2, %v2277_v13, 0.0  ;;  %v873_v15 = vpack.c.bf16 %v2277_v13, %v2277_v13 }
 0x471   : > { %870 = vadd.xlane.f32.xlu0 %v869_v14 }
 0x472   : > { %2064 = vmatmul.mubr.msk.bf16.vlgmr.msra.gmra.mrb[8].mxu0 %vm485_vm2, %v873_v15 }
 0x473   : > { %2079 = vmatprep.mubr.msk.bf16.mxu0 %vm2357_vm0, %v2356_v1 }
 0x475   : > { %539 = vadd.xlane.f32.xlu0 %v538_v16 }
 0x4ee   : > { %v651_v17 = vpop.xlane.xlu0 %650 }
 0x4ef   : > { %2278 = vrcp.f32 %v651_v17 }
 0x4f6   : > { %v761_v18 = vpop.xlane.xlu1 %760 }
 0x4f7   : > { %2280 = vrcp.f32 %v761_v18  ;;  %v2246_v18 = vld [vmem:[%s2865_s4 + $0x30] sm:$0xff]  }
 0x4f9   : > { %v2279_v20 = vpop.eup %2278 }
 0x4fe   : > { %v871_v25 = vpop.xlane.xlu0 %870 }
 0x4ff   : > { %2282 = vrcp.f32 %v871_v25 }
 0x501   : > { %v2281_v28 = vpop.eup %2280 }
 0x502   : > { %v540_v41 = vpop.xlane.xlu0 %539 }
 0x503   : > { %2284 = vrcp.f32 %v540_v41 }
 0x509   : > { %v2283_v34 = vpop.eup %2282 }
 0x50d   : > { %v2285_v42 = vpop.eup %2284 }
 0x50e   : > { %v592_v44 = vmul.f32 %v2285_v42, %v2559_v37  ;;  %v2603_v37 = vld [vmem:[%s2872_s11] sm:$0x7f] }
 0x50f   : > { %v1004_v54 = vrot.slane %v2603_v37, %v1003_v53 }
 0x535   : > { %v696_v21 = vpop.f32.mrb[0].mxu0 }
 0x536   : > { %v702_v22 = vmul.f32 %v2279_v20, %v696_v21  ;;  %v2041_v23 = vpop.f32.mrb[1].mxu0  ;;  %v2659_v20 = vld [vmem:[%s2871_s10] sm:$0x3] }
 0x537   : > { %v699_v24 = vpop.f32.mrb[2].mxu0  ;;  %v1028_v21 = vrot.slane %v2659_v20, %v1003_v53 }
 0x538   : > { %v2042_v26 = vpop.f32.mrb[3].mxu0  ;;  %924 = vrot.lane.b32.xlu0 %v702_v22, %s2369_s26  ;;  %s1810_s26 = scalar_lea.sflag [#allocation3], %s402_s28 }
 0x53d   : > { %v806_v29 = vpop.f32.mrb[4].mxu0 }
 0x53e   : > { %v812_v30 = vmul.f32 %v2281_v28, %v806_v29  ;;  %v2053_v31 = vpop.f32.mrb[5].mxu0  ;;  %v2248_v29 = vld [vmem:[%s2866_s5 + $0x10] sm:$0xff]  }
 0x53f   : > { %v809_v32 = vpop.f32.mrb[6].mxu0  ;;  %v1193_v31 = vsub.s32 1, %v2597_v52 }
 0x540   : > { %v2054_v33 = vpop.f32.mrb[7].mxu0  ;;  %928 = vrot.lane.b32.xlu1 %v812_v30, %s2370_s15  ;;  %v2249_v30 = vld [vmem:[%s2866_s5 + $0x18] sm:$0xff]   ;;  %s1944_s15 = sshll.u32 %s2459_s25, 7  ;;  %s2372_s25 = smov [#allocation2]  }
 0x541   : > { %v1194_v32 = vrot.slane %v2603_v37, %v1193_v31  ;;  %s2818_s20 = scalar_lea.hbm %s2873_s12, %s1944_s15 }
 0x545   : > { %v916_v35 = vpop.f32.mrb[8].mxu0 }
 0x546   : > { %v922_v36 = vmul.f32 %v2283_v34, %v916_v35  ;;  %v2065_v38 = vpop.f32.mrb[9].mxu0 }
 0x547   : > { %v919_v39 = vpop.f32.mrb[10].mxu0 }
 0x548   : > { %v2066_v40 = vpop.f32.mrb[11].mxu0  ;;  %932 = vrot.lane.b32.xlu0 %v922_v36, %s2371_s16  ;;  %s404_s16 = scalar_lea.vmem [#allocation2], %s1886_s29  ;;  %s2296_s29 = sshll.u32 %s2372_s25, 4  ;;  %s2297_s29 = int_to_ptr.vmem [resolvable:$false] %s2296_s29 }
 0x549   : > { %v2250_v40 = vld [vmem:[%s2866_s5] sm:$0xff]   ;;  %s1823_s17 = sshll.u32 %s404_s16, 4  ;;  %s2298_s1 = scalar_lea.vmem %s2297_s29, 256  ;;  %s2820_s17 = int_to_ptr.vmem [resolvable:$true] %s1823_s17 }
 0x54a   : > { %s2292_s0 = scalar_lea.vmem %s2820_s17, 128  ;;  %p2299_p0 = scmp.lt.s32.totalorder %s2820_s17, %s2297_s29 }
 0x54b   : > { %p2293_p11 = scmp.ne.s32.totalorder %s2820_s17, %s2292_s0  ;;  %p2300_p1 = scmp.lt.s32.totalorder %s2298_s1, %s2292_s0 }
 0x54d   : > { %p2294_p12 = pnand %p2293_p11, %p2476_p5  ;;  %p2301_p2 = por %p2300_p1, %p2299_p0 }
 0x54f   : > { %p2295_p13 = pneg %p2294_p12 }
 0x551   : > { %p2302_p3 = pnand %p2301_p2, %p2295_p13 }
 0x5aa   : > { %v925_v43 = vpop.permute.xlu0 %924 }
 0x5ab   : > { %v935_v46 = vsel %vm485_vm2, %v592_v44, %v925_v43  ;;  %v2251_v43 = vld [vmem:[%s2866_s5 + $0x8] sm:$0xff]  }
 0x5b2   : > { %v929_v45 = vpop.permute.xlu1 %928 }
 0x5b3   : > { %v937_v47 = vsel %vm936_vm4, %v935_v46, %v929_v45 }
 0x5ba   : > { %v933_v48 = vpop.permute.xlu0 %932 }
 0x5bb   : > { %v939_v49 = vsel %vm938_vm5, %v937_v47, %v933_v48  ;;  %v2252_v48 = vld [vmem:[%s2866_s5 + $0x20] sm:$0xff]  }
 0x5bc   : > { %v944_v50 = vpack.c.bf16 %v939_v49, %v939_v49 }
 0x5be   : > { %2072 = vmatmul.mubr.msk.bf16.vlgmr.msra.gmra.mrb[24].mxu1 %vm437_vm1, %v944_v50 }
 0x5bf   : > { %2099 = vmatprep.mubr.msk.bf16.mxu1 %vm2357_vm0, %v2356_v1  ;;  %2084 = vmatpush3.bf16.msra.mxu1 %v2240_v6  ;;  %v1395_v6 = vsub.s32 2, %v2597_v52 }
 0x5c0   : > { %2085 = vmatprep.subr.bf16.mxu1 %v2356_v1 }
 0x5c3   : > { %2086 = vmatpush3.bf16.msra.mxu1 %v2241_v7  ;;  %v1396_v7 = vrot.slane %v2603_v37, %v1395_v6  ;;  %v2269_v6 = vld [vmem:[%s2869_s8 + $0x38] sm:$0xff]  }
 0x5c4   : > { %2087 = vmatprep.subr.bf16.mxu1 %v2356_v1 }
 0x5c7   : > { %2088 = vmatpush3.bf16.msra.mxu1 %v2242_v8 }
 0x5c8   : > { %2089 = vmatprep.subr.bf16.mxu1 %v2356_v1 }
 0x5cb   : > { %2090 = vmatpush3.bf16.msra.mxu1 %v2243_v9 }
 0x5cc   : > { %2091 = vmatprep.subr.bf16.mxu1 %v2356_v1 }
 0x5cf   : > { %2092 = vmatpush3.bf16.msra.mxu1 %v2244_v10 }
 0x5d0   : > { %2093 = vmatprep.subr.bf16.mxu1 %v2356_v1 }
 0x5d3   : > { %2094 = vmatpush3.bf16.msra.mxu1 %v2245_v11 }
 0x5d4   : > { %2095 = vmatprep.subr.bf16.mxu1 %v2356_v1 }
 0x5d7   : > { %2096 = vmatpush3.bf16.msra.mxu1 %v2246_v18 }
 0x5d8   : > { %2097 = vmatprep.subr.bf16.mxu1 %v2356_v1 }
 0x5db   : > { %2098 = vmatpush3.bf16.msra.mxu1 %v2247_v19  ;;  %v2259_v19 = vld [vmem:[%s2867_s6 + $0x28] sm:$0xff]  }
 0x5dc   : > { %2135 = vmatprep.subr.bf16.mxu1 %v2356_v1 }
 0x691   : > { %v994_v55 = vpop.f32.mrb[24].mxu1 }
 0x692   : > { %v1000_v56 = vadd.f32 %v994_v55, %v2505_v3  ;;  %v2073_v57 = vpop.f32.mrb[25].mxu1  ;;  %v2238_v3 = vld [vmem:[%s2864_s3] sm:$0xff]  }
 0x693   : > { %v997_v58 = vpop.f32.mrb[26].mxu1  ;;  %2076 = vmatpush3.bf16.msra.mxu0 %v2238_v3  ;;  %v2255_v57 = vld [vmem:[%s2867_s6 + $0x18] sm:$0xff]  }
 0x694   : > { %v2607_v59 = vadd.f32 %v1004_v54, %v1000_v56  ;;  %v2074_v60 = vpop.f32.mrb[27].mxu1  ;;  %2077 = vmatprep.subr.bf16.mxu0 %v2356_v1  ;;  %v2254_v56 = vld [vmem:[%s2867_s6 + $0x10] sm:$0xff]   ;;  %v2256_v58 = vld [vmem:[%s2867_s6] sm:$0xff]  }
 0x696   : > { %v1006_v61 = vsel %vm437_vm1, %v2607_v59, 0.0 }
 0x697   : > { %1007 = vadd.xlane.f32.xlu0 %v1006_v61  ;;  %2078 = vmatpush3.bf16.msra.mxu0 %v2239_v5 }
 0x698   : > { %2103 = vmatprep.subr.bf16.mxu0 %v2356_v1 }
 0x724   : > { %v1008_v62 = vpop.xlane.xlu0 %1007 }
 0x725   : > { %v1010_v63 = vmul.f32 0.03125, %v1008_v62 }
 0x727   : > { %v1011_v0 = vsub.f32 %v2607_v59, %v1010_v63 }
 0x729   : > { %v1012_v2 = vmul.f32 %v1011_v0, %v1011_v0 }
 0x72b   : > { %v1013_v4 = vsel %vm437_vm1, %v1012_v2, 0.0 }
 0x72c   : > { %1014 = vadd.xlane.f32.xlu1 %v1013_v4 }
 0x7b9   : > { %v1015_v12 = vpop.xlane.xlu1 %1014 }
 0x7ba   : > { %v1016_v13 = vmul.f32 0.03125, %v1015_v12 }
 0x7bc   : > { %v1017_v14 = vadd.f32 1e-05, %v1016_v13 }
 0x7be   : > { %2286 = vrsqrt.f32 %v1017_v14 }
 0x7c8   : > { %v2287_v15 = vpop.eup %2286 }
 0x7c9   : > { %v1019_v16 = vmul.f32 %v2287_v15, %v1011_v0  ;;  %v2257_v15 = vld [vmem:[%s2867_s6 + $0x20] sm:$0xff]  }
 0x7cb   : > { %v1024_v17 = vpack.c.bf16 %v1019_v16, %v1019_v16 }
 0x7cd   : > { %2080 = vmatmul.mubr.msk.bf16.vlgmr.msra.gmra.mrb[12].mxu0 %vm437_vm1, %v1024_v17 }
 0x7ce   : > { %2107 = vmatprep.mubr.msk.bf16.mxu0 %vm2357_vm0, %v2356_v1  ;;  %2104 = vmatpush3.bf16.msra.mxu0 %v2248_v29 }
 0x7cf   : > { %2105 = vmatprep.subr.bf16.mxu0 %v2356_v1 }
 0x7d2   : > { %2106 = vmatpush3.bf16.msra.mxu0 %v2249_v30 }
 0x7d3   : > { %2111 = vmatprep.subr.bf16.mxu0 %v2356_v1 }
 0x8a0   : > { %v1078_v22 = vpop.f32.mrb[12].mxu0 }
 0x8a1   : > { %v1079_v23 = vadd.f32 %v1078_v22, %v1028_v21  ;;  %v2081_v24 = vpop.f32.mrb[13].mxu0 }
 0x8a2   : > { %v1081_v25 = vpop.f32.mrb[14].mxu0 }
 0x8a3   : > { %v1084_v26 = vmax.f32 %v1079_v23, 0.0  ;;  %v2082_v27 = vpop.f32.mrb[15].mxu0 }
 0x8a5   : > { %v1101_v28 = vpack.c.bf16 %v1084_v26, %v1084_v26 }
 0x8a7   : > { %2100 = vmatmul.mubr.bf16.vlgmr.msra.gmra.mrb[28].mxu1 %v1101_v28 }
 0x8a8   : > { %2139 = vmatprep.mubr.msk.bf16.mxu1 %vm2357_vm0, %v2356_v1  ;;  %2136 = vmatpush3.bf16.msra.mxu1 %v2256_v58  ;;  %v2264_v58 = vld [vmem:[%s2869_s8 + $0x10] sm:$0xff]  }
 0x8a9   : > { %2137 = vmatprep.subr.bf16.mxu1 %v2356_v1 }
 0x97a   : > { %v1184_v33 = vpop.f32.mrb[28].mxu1 }
 0x97b   : > { %v1190_v34 = vadd.f32 %v1184_v33, %v2607_v59  ;;  %v2101_v35 = vpop.f32.mrb[29].mxu1  ;;  %v2258_v59 = vld [vmem:[%s2867_s6 + $0x8] sm:$0xff]  }
 0x97c   : > { %v1187_v36 = vpop.f32.mrb[30].mxu1  ;;  %2138 = vmatpush3.bf16.msra.mxu1 %v2258_v59  ;;  %v2265_v59 = vld [vmem:[%s2869_s8 + $0x18] sm:$0xff]  }
 0x97d   : > { %v2677_v38 = vadd.f32 %v1194_v32, %v1190_v34  ;;  %v2102_v39 = vpop.f32.mrb[31].mxu1  ;;  %2151 = vmatprep.subr.bf16.mxu1 %v2356_v1  ;;  %v1592_v32 = vsub.s32 3, %v2597_v52 }
 0x97f   : > { %v1208_v41 = vpack.c.bf16 %v2677_v38, %v2677_v38  ;;  %v1593_v39 = vrot.slane %v2603_v37, %v1592_v32  ;;  %v1805_v32 = vsub.s32 6, %v2597_v52 }
 0x981   : > { %v1210_v42 = vshrl.u32 %v1208_v41, 16  ;;  %2108 = vmatmul.mubr.msk.bf16.vlgmr.msra.gmra.mrb[16].mxu0 %vm437_vm1, %v1208_v41  ;;  %v1213_v44 = vshll.u32 %v1208_v41, 16 }
 0x982   : > { %2112 = vmatpush3.bf16.msra.mxu0 %v2250_v40  ;;  %2115 = vmatprep.mubr.msk.bf16.mxu0 %vm2357_vm0, %v2356_v1 }
 0x983   : > { %2113 = vmatprep.subr.bf16.mxu0 %v2356_v1  ;;  %v1212_v45 = vrot.slane %v1210_v42, 7  ;;  %v1221_v50 = vrot.slane %v1213_v44, 1 }
 0x985   : > { %v1215_v47 = vor.u32 %v1213_v44, %v1212_v45  ;;  %v1222_v53 = vor.u32 %v1221_v50, %v1210_v42 }
 0x986   : > { %2114 = vmatpush3.bf16.msra.mxu0 %v2251_v43 }
 0x987   : > { %v1220_v49 = vsel %vm2691_vm8, 0, %v1215_v47  ;;  %2119 = vmatprep.subr.bf16.mxu0 %v2356_v1  ;;  %v1227_v55 = vsel %vm2709_vm10, %v1222_v53, 0 }
 0x989   : > { %2116 = vmatmul.mubr.msk.bf16.vlgmr.msra.gmra.mrb[20].mxu0 %vm437_vm1, %v1220_v49 }
 0x98a   : > { %2120 = vmatpush3.bf16.msra.mxu0 %v2252_v48  ;;  %2123 = vmatprep.mubr.msk.bf16.mxu0 %vm2357_vm0, %v2356_v1 }
 0x98b   : > { %2121 = vmatprep.subr.bf16.mxu0 %v2356_v1 }
 0x98e   : > { %2122 = vmatpush3.bf16.msra.mxu0 %v2253_v51 }
 0x98f   : > { %2127 = vmatprep.subr.bf16.mxu0 %v2356_v1 }
 0x991   : > { %2124 = vmatmul.mubr.msk.bf16.vlgmr.msra.gmra.mrb[24].mxu0 %vm437_vm1, %v1227_v55  ;;  %v2260_v55 = vld [vmem:[%s2868_s7] sm:$0xff]  }
 0x992   : > { %2131 = vmatprep.mubr.msk.bf16.mxu0 %vm2357_vm0, %v2356_v1  ;;  %2128 = vmatpush3.bf16.msra.mxu0 %v2254_v56  ;;  %v2261_v56 = vld [vmem:[%s2868_s7 + $0x8] sm:$0xff]  }
 0x993   : > { %2129 = vmatprep.subr.bf16.mxu0 %v2356_v1 }
 0x996   : > { %2130 = vmatpush3.bf16.msra.mxu0 %v2255_v57  ;;  %v2263_v57 = vld [vmem:[%s2869_s8 + $0x8] sm:$0xff]  }
 0x997   : > { %2143 = vmatprep.subr.bf16.mxu0 %v2356_v1 }
 0xa54   : > { %v1276_v60 = vpop.f32.mrb[16].mxu0 }
 0xa55   : > { %v2109_v61 = vpop.f32.mrb[17].mxu0 }
 0xa56   : > { %v1279_v62 = vpop.f32.mrb[18].mxu0  ;;  %v2267_v61 = vld [vmem:[%s2869_s8 + $0x28] sm:$0xff]  }
 0xa57   : > { %v2110_v63 = vpop.f32.mrb[19].mxu0 }
 0xa5c   : > { %v1331_v0 = vpop.f32.mrb[20].mxu0 }
 0xa5d   : > { %v1332_v2 = vadd.f32 %v1331_v0, %v1276_v60  ;;  %v2117_v4 = vpop.f32.mrb[21].mxu0  ;;  %v2266_v60 = vld [vmem:[%s2869_s8 + $0x20] sm:$0xff]  }
 0xa5e   : > { %v1334_v3 = vpop.f32.mrb[22].mxu0 }
 0xa5f   : > { %v2118_v5 = vpop.f32.mrb[23].mxu0 }
 0xa60   : > { %v2268_v5 = vld [vmem:[%s2869_s8 + $0x30] sm:$0xff]  }
 0xa64   : > { %v1386_v8 = vpop.f32.mrb[24].mxu0 }
 0xa65   : > { %v1392_v9 = vadd.f32 %v1386_v8, %v1332_v2  ;;  %v2125_v10 = vpop.f32.mrb[25].mxu0 }
 0xa66   : > { %v1389_v11 = vpop.f32.mrb[26].mxu0 }
 0xa67   : > { %v1397_v12 = vadd.f32 %v1396_v7, %v1392_v9  ;;  %v2126_v13 = vpop.f32.mrb[27].mxu0  ;;  %v1617_v7 = vrot.slane %v2659_v20, %v1193_v31 }
 0xa69   : > { %v1398_v14 = vmax.f32 %v1397_v12, 0.0 }
 0xa6b   : > { %v1411_v16 = vpack.c.bf16 %v1398_v14, %v1398_v14 }
 0xa6d   : > { %v1413_v17 = vshrl.u32 %v1411_v16, 16  ;;  %v1416_v18 = vshll.u32 %v1411_v16, 16  ;;  %2132 = vmatmul.mubr.msk.bf16.vlgmr.msra.gmra.mrb[28].mxu0 %vm437_vm1, %v1411_v16 }
 0xa6e   : > { %2144 = vmatpush3.bf16.msra.mxu0 %v2257_v15  ;;  %2147 = vmatprep.mubr.msk.bf16.mxu0 %vm2357_vm0, %v2356_v1  ;;  %v1782_v15 = vsub.s32 4, %v2597_v52 }
 0xa6f   : > { %2145 = vmatprep.subr.bf16.mxu0 %v2356_v1  ;;  %v1415_v21 = vrot.slane %v1413_v17, 7  ;;  %v1421_v22 = vrot.slane %v1416_v18, 1 }
 0xa71   : > { %v1418_v23 = vor.u32 %v1416_v18, %v1415_v21  ;;  %v1422_v24 = vor.u32 %v1421_v22, %v1413_v17 }
 0xa72   : > { %2146 = vmatpush3.bf16.msra.mxu0 %v2259_v19 }
 0xa73   : > { %v1420_v25 = vsel %vm2691_vm8, 0, %v1418_v23  ;;  %v1424_v26 = vsel %vm2709_vm10, %v1422_v24, 0  ;;  %2159 = vmatprep.subr.bf16.mxu0 %v2356_v1 }
 0xa74   : > { %2140 = vmatmul.mubr.msk.bf16.vlgmr.msra.gmra.mrb[32].mxu1 %vm437_vm1, %v1420_v25 }
 0xa75   : > { %2148 = vmatmul.mubr.msk.bf16.vlgmr.msra.gmra.mrb[32].mxu0 %vm437_vm1, %v1424_v26  ;;  %2155 = vmatprep.mubr.msk.bf16.mxu1 %vm2357_vm0, %v2356_v1 }
 0xa76   : > { %2175 = vmatprep.mubr.msk.bf16.mxu0 %vm2357_vm0, %v2356_v1  ;;  %2152 = vmatpush3.bf16.msra.mxu1 %v2260_v55 }
 0xa77   : > { %2153 = vmatprep.subr.bf16.mxu1 %v2356_v1 }
 0xa7a   : > { %2154 = vmatpush3.bf16.msra.mxu1 %v2261_v56 }
 0xb40   : > { %v1473_v27 = vpop.f32.mrb[28].mxu0 }
 0xb41   : > { %v2133_v28 = vpop.f32.mrb[29].mxu0 }
 0xb42   : > { %v1476_v29 = vpop.f32.mrb[30].mxu0 }
 0xb43   : > { %v2134_v30 = vpop.f32.mrb[31].mxu0 }
 0xb44   : > { %v1800_v30 = vsub.s32 5, %v2597_v52 }
 0xb47   : > { %v1528_v33 = vpop.f32.mrb[32].mxu1 }
 0xb48   : > { %v1529_v34 = vadd.f32 %v1528_v33, %v1473_v27  ;;  %v2141_v35 = vpop.f32.mrb[33].mxu1  ;;  %v1583_v36 = vpop.f32.mrb[32].mxu0  ;;  %v1801_v33 = vrot.slane %v2603_v37, %v1800_v30 }
 0xb49   : > { %v1531_v40 = vpop.f32.mrb[34].mxu1  ;;  %v2149_v41 = vpop.f32.mrb[33].mxu0 }
 0xb4a   : > { %v1589_v42 = vadd.f32 %v1583_v36, %v1529_v34  ;;  %v2142_v43 = vpop.f32.mrb[35].mxu1  ;;  %v1586_v44 = vpop.f32.mrb[34].mxu0  ;;  %v1806_v36 = vrot.slane %v2603_v37, %v1805_v32 }
 0xb4b   : > { %v2150_v45 = vpop.f32.mrb[35].mxu0 }
 0xb4c   : > { %v1594_v46 = vadd.f32 %v1593_v39, %v1589_v42 }
 0xb4e   : > { %v1595_v47 = vadd.f32 %v1594_v46, %v2677_v38  ;;  %v2262_v38 = vld [vmem:[%s2869_s8] sm:$0xff]  }
 0xb4f   : > { %2160 = vmatpush3.bf16.msra.mxu0 %v2262_v38 }
 0xb50   : > { %v1596_v48 = vsel %vm437_vm1, %v1595_v47, 0.0  ;;  %2161 = vmatprep.subr.bf16.mxu0 %v2356_v1 }
 0xb51   : > { %1597 = vadd.xlane.f32.xlu0 %v1596_v48 }
 0xb53   : > { %2162 = vmatpush3.bf16.msra.mxu0 %v2263_v57 }
 0xb54   : > { %2163 = vmatprep.subr.bf16.mxu0 %v2356_v1 }
 0xb57   : > { %2164 = vmatpush3.bf16.msra.mxu0 %v2264_v58 }
 0xb58   : > { %2165 = vmatprep.subr.bf16.mxu0 %v2356_v1 }
 0xb5b   : > { %2166 = vmatpush3.bf16.msra.mxu0 %v2265_v59 }
 0xb5c   : > { %2167 = vmatprep.subr.bf16.mxu0 %v2356_v1 }
 0xb5f   : > { %2168 = vmatpush3.bf16.msra.mxu0 %v2266_v60 }
 0xb60   : > { %2169 = vmatprep.subr.bf16.mxu0 %v2356_v1 }
 0xb63   : > { %2170 = vmatpush3.bf16.msra.mxu0 %v2267_v61 }
 0xb64   : > { %2171 = vmatprep.subr.bf16.mxu0 %v2356_v1 }
 0xb67   : > { %2172 = vmatpush3.bf16.msra.mxu0 %v2268_v5 }
 0xb68   : > { %2173 = vmatprep.subr.bf16.mxu0 %v2356_v1  ;;  %v1783_v1 = vrot.slane %v2603_v37, %v1782_v15 }
 0xb6b   : > { %2174 = vmatpush3.bf16.msra.mxu0 %v2269_v6 }
 0xbde   : > { %v1598_v49 = vpop.xlane.xlu0 %1597 }
 0xbdf   : > { %v1599_v50 = vmul.f32 0.03125, %v1598_v49 }
 0xbe1   : > { %v1600_v51 = vsub.f32 %v1595_v47, %v1599_v50 }
 0xbe3   : > { %v1601_v53 = vmul.f32 %v1600_v51, %v1600_v51 }
 0xbe5   : > { %v1602_v54 = vsel %vm437_vm1, %v1601_v53, 0.0 }
 0xbe6   : > { %1603 = vadd.xlane.f32.xlu0 %v1602_v54 }
 0xc73   : > { %v1604_v62 = vpop.xlane.xlu0 %1603 }
 0xc74   : > { %v1605_v63 = vmul.f32 0.03125, %v1604_v62 }
 0xc76   : > { %v1606_v0 = vadd.f32 1e-05, %v1605_v63 }
 0xc78   : > { %2288 = vrsqrt.f32 %v1606_v0 }
 0xc82   : > { %v2289_v2 = vpop.eup %2288 }
 0xc83   : > { %v1608_v4 = vmul.f32 %v2289_v2, %v1600_v51 }
 0xc85   : > { %v1613_v3 = vpack.c.bf16 %v1608_v4, %v1608_v4 }
 0xc87   : > { %2156 = vmatmul.mubr.msk.bf16.vlgmr.msra.gmra.mrb[36].mxu1 %vm437_vm1, %v1613_v3 }
 0xd5a   : > { %v1667_v8 = vpop.f32.mrb[36].mxu1 }
 0xd5b   : > { %v1668_v9 = vadd.f32 %v1667_v8, %v1617_v7  ;;  %v2157_v10 = vpop.f32.mrb[37].mxu1 }
 0xd5c   : > { %v1670_v11 = vpop.f32.mrb[38].mxu1 }
 0xd5d   : > { %v1673_v12 = vmax.f32 %v1668_v9, 0.0  ;;  %v2158_v13 = vpop.f32.mrb[39].mxu1 }
 0xd5f   : > { %v1690_v14 = vpack.c.bf16 %v1673_v12, %v1673_v12 }
 0xd61   : > { %2176 = vmatmul.mubr.bf16.vlgmr.msra.gmra.mrb[36].mxu0 %v1690_v14 }
 0xe34   : > { %v1773_v16 = vpop.f32.mrb[36].mxu0 }
 0xe35   : > { %v1779_v17 = vadd.f32 %v1773_v16, %v1595_v47  ;;  %v2177_v18 = vpop.f32.mrb[37].mxu0 }
 0xe36   : > { %v1776_v19 = vpop.f32.mrb[38].mxu0 }
 0xe37   : > { %v2178_v21 = vpop.f32.mrb[39].mxu0  ;;  %v1784_v22 = vadd.f32 %v1783_v1, %v1779_v17 }
 0xe39   : > { %v1785_v20 = vsel %vm437_vm1, %v1784_v22, 0.0 }
 0xe3a   : > { %1786 = vadd.xlane.f32.xlu1 %v1785_v20 }
 0xec7   : > { %v1787_v31 = vpop.xlane.xlu1 %1786 }
 0xec8   : > { %v1788_v23 = vmul.f32 0.03125, %v1787_v31 }
 0xeca   : > { %v1789_v24 = vsub.f32 %v1784_v22, %v1788_v23 }
 0xecc   : > { %v1790_v25 = vmul.f32 %v1789_v24, %v1789_v24 }
 0xece   : > { %v1791_v26 = vsel %vm437_vm1, %v1790_v25, 0.0 }
 0xecf   : > { %1792 = vadd.xlane.f32.xlu0 %v1791_v26 }
 0xf5c   : > { %v1793_v27 = vpop.xlane.xlu0 %1792 }
 0xf5d   : > { %v1794_v28 = vmul.f32 0.03125, %v1793_v27 }
 0xf5f   : > { %v1795_v29 = vadd.f32 1e-05, %v1794_v28 }
 0xf61   : > { %2290 = vrsqrt.f32 %v1795_v29 }
 0xf6b   : > { %v2291_v34 = vpop.eup %2290 }
 0xf6c   : > { %v1797_v35 = vmul.f32 %v2291_v34, %v1789_v24 }
 0xf6e   : > { %v1802_v39 = vmul.f32 %v1801_v33, %v1797_v35 }
 0xf70   : > { %v1807_v40 = vadd.f32 %v1806_v36, %v1802_v39 }
 0xf72   : > { %1808 = vst.msk [vmem:[%s404_s16] sm:$0xff] %vm437_vm1, %v1807_v40 }
 0xf73   : > { %2305 = shalt.err (!%p2302_p3)
}
 0xf74   : > { %s2306_s28 = scalar_lea.hbm %s2818_s20, 128  ;;  %s2310_s18 = scalar_lea.hbm %s2873_s12, 256 }
 0xf75   : > { %p2307_p4 = scmp.ne.s32.totalorder %s2818_s20, %s2306_s28  ;;  %p2311_p9 = scmp.lt.u32.totalorder %s2818_s20, %s2873_s12 }
 0xf76   : > { %p2312_p10 = scmp.lt.u32.totalorder %s2310_s18, %s2306_s28  ;;  %p2314_p12 = scmp.lt.u32.totalorder %s2306_s28, %s2818_s20 }
 0xf77   : > { %p2308_p7 = pnand %p2307_p4, %p2476_p5 }
 0xf78   : > { %p2313_p11 = por %p2312_p10, %p2311_p9 }
 0xf79   : > { %p2309_p8 = pneg %p2308_p7 }
 0xf7a   : > { %p2315_p13 = por %p2314_p12, %p2313_p11 }
 0xf7c   : > { %p2316_p0 = pnand %p2315_p13, %p2309_p8 }
 0xf7e   : > { %2319 = shalt.err (!%p2316_p0)
}
 0xf7f   : > { %2179 = dma.vmem_to_hbm [thread:$0]  (%p2476_p5), %s2820_s17, 128, %s2818_s20, %s1810_s26  }
 0xf80 PF: > { %p2185_p1 = scmp.ge.s32.totalorder %s2354_s24, 2  ;;  %s1835_s0 = sand.u32 1, %s2342_s21  }
 0xf81   : > { %s1836_s1 = scalar_lea.sflag [#allocation3], %s1835_s0 }
 0xf82   : > { %p2182_p2 = pnand %p2185_p1, %p2480_p6 }
 0xf84   : > { %2337 = dma.done.wait (!%p2182_p2), %s1836_s1, 128  }
 0xf85   : > { %2339 = vsyncadd (!%p2182_p2), %s1836_s1, 4294967168  ;;  %p22_p3 = scmp.ge.s32.totalorder %s2463_s27, 4   ;;  %s2884_s21 = smov %s2346_s22 }
 0xf86   : > { %s2885_s22 = smov %s2350_s23  ;;  %s2886_s23 = smov %s2474_s30 }
 0xf87   : > { %s2887_s24 = smov %s2463_s27  ;;  %24 = sbr.rel (!%p22_p3) target bundleno = 6 (0x6), region = 103 }
 0xf8e   :  { %1841 = vsyncpa [#allocation3], 1 }
 0xf8f   :  { %1843 = vsyncpa [#allocation3 + $0x1], 1 }

</bundles_post_ra>
